<compile_context>
chip_gen: v7x
topology: tpu7x:2x2x1
jax: 0.10.0
libtpu: 0.0.40
codegen_flags: <defaults>
</compile_context>

<pallas_src>
import jax
import jax.numpy as jnp
from jax.experimental import pallas as pl
from jax.experimental.pallas import tpu as pltpu


def _make_conv_stats_kernel(OH, OW, C, OCp, KH, KW):
    """Conv (tap-loop, bf16 MXU) + per-channel sum / sum-of-squares partials."""

    def kernel(x_ref, w_ref, y_ref, sum_ref, sq_ref):
        # x_ref: (1, Hp, Wp, C) bf16   w_ref: (KH*KW, C, OCp) bf16
        # y_ref: (1, OH, OW, OCp) bf16 sum_ref/sq_ref: (1, 8, OCp) f32
        acc = jnp.zeros((OH * OW, OCp), jnp.float32)
        for kh in range(KH):
            for kw in range(KW):
                a = x_ref[0, kh:kh + OH, kw:kw + OW, :].reshape(OH * OW, C)
                acc = acc + jnp.dot(a, w_ref[kh * KW + kw],
                                    preferred_element_type=jnp.float32)

        y_ref[...] = acc.reshape(1, OH, OW, OCp).astype(y_ref.dtype)

        # Partial BN statistics from the f32 accumulator (not the bf16 store).
        # Reduce 256 rows -> 8 rows (vreg-aligned), finish the reduce in the
        # wrapper; avoids sub-8-sublane masked stores.
        g = (OH * OW) // 8
        sum_ref[0] = jnp.sum(acc.reshape(g, 8, OCp), axis=0)
        sq_ref[0] = jnp.sum((acc * acc).reshape(g, 8, OCp), axis=0)

    return kernel


def _make_bn_relu_pool_kernel(OH2, OCp):
    """BatchNorm affine + ReLU + 2x2/2 max-pool on a (OH, OW2, 2*OCp) image."""

    def kernel(y_ref, scale_ref, shift_ref, o_ref):
        # y_ref: (1, OH, OW2, 2*OCp) bf16; scale/shift: (1, 2*OCp) f32
        # o_ref: (1, OH2, OW2, OCp) f32
        y = y_ref[0].astype(jnp.float32)
        y = y * scale_ref[...] + shift_ref[...]        # BN affine
        y = jnp.maximum(y, 0.0)                        # ReLU
        for t in range(OH2):                           # static, unrolled
            m = jnp.maximum(y[2 * t], y[2 * t + 1])    # H-pair max: (OW2, 2*OCp)
            # W-pair max: the two 128-lane halves hold even/odd W pixels.
            o_ref[0, t] = jnp.maximum(m[:, :OCp], m[:, OCp:])

    return kernel


def cnn_block_forward(x_nchw, w_oihw, gamma, beta, *, stride=1, padding=1, eps=1e-5):
    N, C, H, W = x_nchw.shape
    OC, _, KH, KW = w_oihw.shape
    assert stride == 1, "Pallas path implemented for stride=1"
    OH = H + 2 * padding - KH + 1
    OW = W + 2 * padding - KW + 1
    assert OH % 2 == 0 and OW % 2 == 0, "MaxPool2d(2,2) path assumes even conv output"
    assert (OH * OW) % 8 == 0
    OH2, OW2 = OH // 2, OW // 2
    LANE = 128
    OCp = ((OC + LANE - 1) // LANE) * LANE
    Hp, Wp = H + 2 * padding, W + 2 * padding

    # ---- glue: NHWC + spatial zero-pad + bf16 (no im2col materialization) ----
    xp = jnp.pad(x_nchw, ((0, 0), (0, 0), (padding, padding), (padding, padding)))
    x_nhwc = jnp.transpose(xp, (0, 2, 3, 1)).astype(jnp.bfloat16)     # (N,Hp,Wp,C)

    # per-tap weights: (KH*KW, C, OCp), OC zero-padded to the lane width, bf16
    w_taps = jnp.transpose(w_oihw, (2, 3, 1, 0)).reshape(KH * KW, C, OC)
    w_taps = jnp.pad(w_taps, ((0, 0), (0, 0), (0, OCp - OC))).astype(jnp.bfloat16)

    conv_kernel = _make_conv_stats_kernel(OH, OW, C, OCp, KH, KW)
    conv_out, psum, psq = pl.pallas_call(
        conv_kernel,
        out_shape=(jax.ShapeDtypeStruct((N, OH, OW, OCp), jnp.bfloat16),
                   jax.ShapeDtypeStruct((N, 8, OCp), jnp.float32),
                   jax.ShapeDtypeStruct((N, 8, OCp), jnp.float32)),
        grid_spec=pltpu.PrefetchScalarGridSpec(
            num_scalar_prefetch=0, grid=(N,),
            in_specs=[pl.BlockSpec((1, Hp, Wp, C), lambda n: (n, 0, 0, 0)),
                      pl.BlockSpec((KH * KW, C, OCp), lambda n: (0, 0, 0))],
            out_specs=(pl.BlockSpec((1, OH, OW, OCp), lambda n: (n, 0, 0, 0)),
                       pl.BlockSpec((1, 8, OCp), lambda n: (n, 0, 0)),
                       pl.BlockSpec((1, 8, OCp), lambda n: (n, 0, 0)))),
        compiler_params=pltpu.CompilerParams(dimension_semantics=("parallel",)),
    )(x_nhwc, w_taps)

    # ---- training-mode BatchNorm stats (biased variance), f32 in the wrapper ----
    # Note: E[x^2]-E[x]^2 can cancel for large-mean activations; fine at these
    # scales since partials are exact f32 sums of the f32 MXU accumulator.
    cnt = jnp.float32(N * OH * OW)
    mean = psum.sum(axis=(0, 1)) / cnt                                 # (OCp,)
    var = jnp.maximum(psq.sum(axis=(0, 1)) / cnt - mean * mean, 0.0)
    gamma_p = jnp.pad(gamma.astype(jnp.float32), (0, OCp - OC))
    beta_p = jnp.pad(beta.astype(jnp.float32), (0, OCp - OC))
    scale = gamma_p * jax.lax.rsqrt(var + eps)
    shift = beta_p - mean * scale
    scale2 = jnp.tile(scale, 2)[None, :]                               # (1, 2*OCp)
    shift2 = jnp.tile(shift, 2)[None, :]

    # Free (row-major) reshape: adjacent W pixels -> two 128-lane halves.
    conv_pairs = conv_out.reshape(N, OH, OW2, 2 * OCp)

    pool_kernel = _make_bn_relu_pool_kernel(OH2, OCp)
    pooled = pl.pallas_call(
        pool_kernel,
        out_shape=jax.ShapeDtypeStruct((N, OH2, OW2, OCp), jnp.float32),
        grid_spec=pltpu.PrefetchScalarGridSpec(
            num_scalar_prefetch=0, grid=(N,),
            in_specs=[pl.BlockSpec((1, OH, OW2, 2 * OCp), lambda n: (n, 0, 0, 0)),
                      pl.BlockSpec((1, 2 * OCp), lambda n: (0, 0)),
                      pl.BlockSpec((1, 2 * OCp), lambda n: (0, 0))],
            out_specs=pl.BlockSpec((1, OH2, OW2, OCp), lambda n: (n, 0, 0, 0))),
        compiler_params=pltpu.CompilerParams(dimension_semantics=("parallel",)),
    )(conv_pairs, scale2, shift2)

    # Back to NCHW to match the PyTorch module's output layout.
    # TODO(synk): keep NHWC if the downstream consumer accepts it (saves a pass).
    return jnp.transpose(pooled[..., :OC], (0, 3, 1, 2))


if __name__ == "__main__":
    key = jax.random.PRNGKey(0)
    kx, kw = jax.random.split(key)

    # CNNBlock(in_channels=4, out_channels=8, kernel_size=3, stride=1, padding=1,
    #          use_pooling=True, use_batchnorm=True) -> conv has no bias.
    N, C, H, W = 2, 4, 16, 16
    OC, KH, KW = 8, 3, 3

    x = jax.random.normal(kx, (N, C, H, W), dtype=jnp.float32)
    conv_w = 0.01 * jax.random.normal(kw, (OC, C, KH, KW), dtype=jnp.float32)  # N(0, 0.01)
    gamma = jnp.ones((OC,), jnp.float32)   # BatchNorm2d default weight init
    beta = jnp.zeros((OC,), jnp.float32)   # BatchNorm2d default bias init

    out = jax.block_until_ready(
        cnn_block_forward(x, conv_w, gamma, beta, stride=1, padding=1))

    # pure-JAX reference (conv inputs rounded to bf16 to mirror the MXU path)
    xb = x.astype(jnp.bfloat16).astype(jnp.float32)
    wb = conv_w.astype(jnp.bfloat16).astype(jnp.float32)
    ref = jax.lax.conv_general_dilated(
        xb, wb, window_strides=(1, 1), padding=((1, 1), (1, 1)),
        dimension_numbers=("NCHW", "OIHW", "NCHW"))
    m = ref.mean(axis=(0, 2, 3), keepdims=True)
    v = ref.var(axis=(0, 2, 3), keepdims=True)
    ref = (gamma.reshape(1, OC, 1, 1) * (ref - m) * jax.lax.rsqrt(v + 1e-5)
           + beta.reshape(1, OC, 1, 1))
    ref = jnp.maximum(ref, 0.0)
    ref = ref.reshape(N, OC, H // 2, 2, W // 2, 2).max(axis=(3, 5))

    assert out.shape == (N, OC, H // 2, W // 2), out.shape
    assert jnp.allclose(out, ref, rtol=2e-2, atol=2e-2), \
        float(jnp.max(jnp.abs(out - ref)))
    print("KERNEL_OK")
</pallas_src>

<mosaic_0001>
module attributes {stable_mosaic.version = 11 : i64} {
  func.func @kernel(%arg0: i32, %arg1: memref<1x18x18x4xbf16, #tpu.memory_space<vmem>>, %arg2: memref<9x4x128xbf16, #tpu.memory_space<vmem>>, %arg3: memref<1x16x16x128xbf16, #tpu.memory_space<vmem>>, %arg4: memref<1x8x128xf32, #tpu.memory_space<vmem>>, %arg5: memref<1x8x128xf32, #tpu.memory_space<vmem>>) attributes {dimension_semantics = [#tpu.dimension_semantics<parallel>], iteration_bounds = array<i64: 2>, scalar_prefetch = 0 : i64, scratch_operands = 0 : i64, tpu.core_type = #tpu.core_type<tc>, window_params = [{transform_indices = @transform_0, window_bounds = array<i64: 1, 18, 18, 4>}, {pipeline_mode = #tpu.pipeline_mode<synchronous>, transform_indices = @transform_1, window_bounds = array<i64: 9, 4, 128>}, {transform_indices = @transform_2, window_bounds = array<i64: 1, 16, 16, 128>}, {transform_indices = @transform_3, window_bounds = array<i64: 1, 8, 128>}, {transform_indices = @transform_4, window_bounds = array<i64: 1, 8, 128>}]} {
    %cst = arith.constant 0.000000e+00 : f32
    %0 = vector.broadcast %cst : f32 to vector<256x128xf32>
    %c0 = arith.constant 0 : index
    %c0_0 = arith.constant 0 : index
    %c0_1 = arith.constant 0 : index
    %c0_2 = arith.constant 0 : index
    %1 = vector.load %arg1[%c0, %c0_0, %c0_1, %c0_2] : memref<1x18x18x4xbf16, #tpu.memory_space<vmem>>, vector<1x16x16x4xbf16>
    %2 = vector.shape_cast %1 : vector<1x16x16x4xbf16> to vector<16x16x4xbf16>
    %3 = vector.shape_cast %2 : vector<16x16x4xbf16> to vector<256x4xbf16>
    %c0_3 = arith.constant 0 : index
    %c0_4 = arith.constant 0 : index
    %c0_5 = arith.constant 0 : index
    %4 = vector.load %arg2[%c0_3, %c0_4, %c0_5] : memref<9x4x128xbf16, #tpu.memory_space<vmem>>, vector<1x4x128xbf16>
    %5 = vector.shape_cast %4 : vector<1x4x128xbf16> to vector<4x128xbf16>
    %cst_6 = arith.constant dense<0.000000e+00> : vector<256x128xf32>
    %6 = tpu.matmul %3, %5, %cst_6 {dimension_numbers = #tpu.dot_dimension_numbers<[1], [0], [0], [1], [0, 0, 1, 1], [], []>} : vector<256x4xbf16>, vector<4x128xbf16>, vector<256x128xf32> -> vector<256x128xf32>
    %7 = arith.addf %0, %6 : vector<256x128xf32>
    %c0_7 = arith.constant 0 : index
    %c0_8 = arith.constant 0 : index
    %c1 = arith.constant 1 : index
    %c0_9 = arith.constant 0 : index
    %8 = vector.load %arg1[%c0_7, %c0_8, %c1, %c0_9] : memref<1x18x18x4xbf16, #tpu.memory_space<vmem>>, vector<1x16x16x4xbf16>
    %9 = vector.shape_cast %8 : vector<1x16x16x4xbf16> to vector<16x16x4xbf16>
    %10 = vector.shape_cast %9 : vector<16x16x4xbf16> to vector<256x4xbf16>
    %c1_10 = arith.constant 1 : index
    %c0_11 = arith.constant 0 : index
    %c0_12 = arith.constant 0 : index
    %11 = vector.load %arg2[%c1_10, %c0_11, %c0_12] : memref<9x4x128xbf16, #tpu.memory_space<vmem>>, vector<1x4x128xbf16>
    %12 = vector.shape_cast %11 : vector<1x4x128xbf16> to vector<4x128xbf16>
    %cst_13 = arith.constant dense<0.000000e+00> : vector<256x128xf32>
    %13 = tpu.matmul %10, %12, %cst_13 {dimension_numbers = #tpu.dot_dimension_numbers<[1], [0], [0], [1], [0, 0, 1, 1], [], []>} : vector<256x4xbf16>, vector<4x128xbf16>, vector<256x128xf32> -> vector<256x128xf32>
    %14 = arith.addf %7, %13 : vector<256x128xf32>
    %c0_14 = arith.constant 0 : index
    %c0_15 = arith.constant 0 : index
    %c2 = arith.constant 2 : index
    %c0_16 = arith.constant 0 : index
    %15 = vector.load %arg1[%c0_14, %c0_15, %c2, %c0_16] : memref<1x18x18x4xbf16, #tpu.memory_space<vmem>>, vector<1x16x16x4xbf16>
    %16 = vector.shape_cast %15 : vector<1x16x16x4xbf16> to vector<16x16x4xbf16>
    %17 = vector.shape_cast %16 : vector<16x16x4xbf16> to vector<256x4xbf16>
    %c2_17 = arith.constant 2 : index
    %c0_18 = arith.constant 0 : index
    %c0_19 = arith.constant 0 : index
    %18 = vector.load %arg2[%c2_17, %c0_18, %c0_19] : memref<9x4x128xbf16, #tpu.memory_space<vmem>>, vector<1x4x128xbf16>
    %19 = vector.shape_cast %18 : vector<1x4x128xbf16> to vector<4x128xbf16>
    %cst_20 = arith.constant dense<0.000000e+00> : vector<256x128xf32>
    %20 = tpu.matmul %17, %19, %cst_20 {dimension_numbers = #tpu.dot_dimension_numbers<[1], [0], [0], [1], [0, 0, 1, 1], [], []>} : vector<256x4xbf16>, vector<4x128xbf16>, vector<256x128xf32> -> vector<256x128xf32>
    %21 = arith.addf %14, %20 : vector<256x128xf32>
    %c0_21 = arith.constant 0 : index
    %c1_22 = arith.constant 1 : index
    %c0_23 = arith.constant 0 : index
    %c0_24 = arith.constant 0 : index
    %22 = vector.load %arg1[%c0_21, %c1_22, %c0_23, %c0_24] : memref<1x18x18x4xbf16, #tpu.memory_space<vmem>>, vector<1x16x16x4xbf16>
    %23 = vector.shape_cast %22 : vector<1x16x16x4xbf16> to vector<16x16x4xbf16>
    %24 = vector.shape_cast %23 : vector<16x16x4xbf16> to vector<256x4xbf16>
    %c3 = arith.constant 3 : index
    %c0_25 = arith.constant 0 : index
    %c0_26 = arith.constant 0 : index
    %25 = vector.load %arg2[%c3, %c0_25, %c0_26] : memref<9x4x128xbf16, #tpu.memory_space<vmem>>, vector<1x4x128xbf16>
    %26 = vector.shape_cast %25 : vector<1x4x128xbf16> to vector<4x128xbf16>
    %cst_27 = arith.constant dense<0.000000e+00> : vector<256x128xf32>
    %27 = tpu.matmul %24, %26, %cst_27 {dimension_numbers = #tpu.dot_dimension_numbers<[1], [0], [0], [1], [0, 0, 1, 1], [], []>} : vector<256x4xbf16>, vector<4x128xbf16>, vector<256x128xf32> -> vector<256x128xf32>
    %28 = arith.addf %21, %27 : vector<256x128xf32>
    %c0_28 = arith.constant 0 : index
    %c1_29 = arith.constant 1 : index
    %c1_30 = arith.constant 1 : index
    %c0_31 = arith.constant 0 : index
    %29 = vector.load %arg1[%c0_28, %c1_29, %c1_30, %c0_31] : memref<1x18x18x4xbf16, #tpu.memory_space<vmem>>, vector<1x16x16x4xbf16>
    %30 = vector.shape_cast %29 : vector<1x16x16x4xbf16> to vector<16x16x4xbf16>
    %31 = vector.shape_cast %30 : vector<16x16x4xbf16> to vector<256x4xbf16>
    %c4 = arith.constant 4 : index
    %c0_32 = arith.constant 0 : index
    %c0_33 = arith.constant 0 : index
    %32 = vector.load %arg2[%c4, %c0_32, %c0_33] : memref<9x4x128xbf16, #tpu.memory_space<vmem>>, vector<1x4x128xbf16>
    %33 = vector.shape_cast %32 : vector<1x4x128xbf16> to vector<4x128xbf16>
    %cst_34 = arith.constant dense<0.000000e+00> : vector<256x128xf32>
    %34 = tpu.matmul %31, %33, %cst_34 {dimension_numbers = #tpu.dot_dimension_numbers<[1], [0], [0], [1], [0, 0, 1, 1], [], []>} : vector<256x4xbf16>, vector<4x128xbf16>, vector<256x128xf32> -> vector<256x128xf32>
    %35 = arith.addf %28, %34 : vector<256x128xf32>
    %c0_35 = arith.constant 0 : index
    %c1_36 = arith.constant 1 : index
    %c2_37 = arith.constant 2 : index
    %c0_38 = arith.constant 0 : index
    %36 = vector.load %arg1[%c0_35, %c1_36, %c2_37, %c0_38] : memref<1x18x18x4xbf16, #tpu.memory_space<vmem>>, vector<1x16x16x4xbf16>
    %37 = vector.shape_cast %36 : vector<1x16x16x4xbf16> to vector<16x16x4xbf16>
    %38 = vector.shape_cast %37 : vector<16x16x4xbf16> to vector<256x4xbf16>
    %c5 = arith.constant 5 : index
    %c0_39 = arith.constant 0 : index
    %c0_40 = arith.constant 0 : index
    %39 = vector.load %arg2[%c5, %c0_39, %c0_40] : memref<9x4x128xbf16, #tpu.memory_space<vmem>>, vector<1x4x128xbf16>
    %40 = vector.shape_cast %39 : vector<1x4x128xbf16> to vector<4x128xbf16>
    %cst_41 = arith.constant dense<0.000000e+00> : vector<256x128xf32>
    %41 = tpu.matmul %38, %40, %cst_41 {dimension_numbers = #tpu.dot_dimension_numbers<[1], [0], [0], [1], [0, 0, 1, 1], [], []>} : vector<256x4xbf16>, vector<4x128xbf16>, vector<256x128xf32> -> vector<256x128xf32>
    %42 = arith.addf %35, %41 : vector<256x128xf32>
    %c0_42 = arith.constant 0 : index
    %c2_43 = arith.constant 2 : index
    %c0_44 = arith.constant 0 : index
    %c0_45 = arith.constant 0 : index
    %43 = vector.load %arg1[%c0_42, %c2_43, %c0_44, %c0_45] : memref<1x18x18x4xbf16, #tpu.memory_space<vmem>>, vector<1x16x16x4xbf16>
    %44 = vector.shape_cast %43 : vector<1x16x16x4xbf16> to vector<16x16x4xbf16>
    %45 = vector.shape_cast %44 : vector<16x16x4xbf16> to vector<256x4xbf16>
    %c6 = arith.constant 6 : index
    %c0_46 = arith.constant 0 : index
    %c0_47 = arith.constant 0 : index
    %46 = vector.load %arg2[%c6, %c0_46, %c0_47] : memref<9x4x128xbf16, #tpu.memory_space<vmem>>, vector<1x4x128xbf16>
    %47 = vector.shape_cast %46 : vector<1x4x128xbf16> to vector<4x128xbf16>
    %cst_48 = arith.constant dense<0.000000e+00> : vector<256x128xf32>
    %48 = tpu.matmul %45, %47, %cst_48 {dimension_numbers = #tpu.dot_dimension_numbers<[1], [0], [0], [1], [0, 0, 1, 1], [], []>} : vector<256x4xbf16>, vector<4x128xbf16>, vector<256x128xf32> -> vector<256x128xf32>
    %49 = arith.addf %42, %48 : vector<256x128xf32>
    %c0_49 = arith.constant 0 : index
    %c2_50 = arith.constant 2 : index
    %c1_51 = arith.constant 1 : index
    %c0_52 = arith.constant 0 : index
    %50 = vector.load %arg1[%c0_49, %c2_50, %c1_51, %c0_52] : memref<1x18x18x4xbf16, #tpu.memory_space<vmem>>, vector<1x16x16x4xbf16>
    %51 = vector.shape_cast %50 : vector<1x16x16x4xbf16> to vector<16x16x4xbf16>
    %52 = vector.shape_cast %51 : vector<16x16x4xbf16> to vector<256x4xbf16>
    %c7 = arith.constant 7 : index
    %c0_53 = arith.constant 0 : index
    %c0_54 = arith.constant 0 : index
    %53 = vector.load %arg2[%c7, %c0_53, %c0_54] : memref<9x4x128xbf16, #tpu.memory_space<vmem>>, vector<1x4x128xbf16>
    %54 = vector.shape_cast %53 : vector<1x4x128xbf16> to vector<4x128xbf16>
    %cst_55 = arith.constant dense<0.000000e+00> : vector<256x128xf32>
    %55 = tpu.matmul %52, %54, %cst_55 {dimension_numbers = #tpu.dot_dimension_numbers<[1], [0], [0], [1], [0, 0, 1, 1], [], []>} : vector<256x4xbf16>, vector<4x128xbf16>, vector<256x128xf32> -> vector<256x128xf32>
    %56 = arith.addf %49, %55 : vector<256x128xf32>
    %c0_56 = arith.constant 0 : index
    %c2_57 = arith.constant 2 : index
    %c2_58 = arith.constant 2 : index
    %c0_59 = arith.constant 0 : index
    %57 = vector.load %arg1[%c0_56, %c2_57, %c2_58, %c0_59] : memref<1x18x18x4xbf16, #tpu.memory_space<vmem>>, vector<1x16x16x4xbf16>
    %58 = vector.shape_cast %57 : vector<1x16x16x4xbf16> to vector<16x16x4xbf16>
    %59 = vector.shape_cast %58 : vector<16x16x4xbf16> to vector<256x4xbf16>
    %c8 = arith.constant 8 : index
    %c0_60 = arith.constant 0 : index
    %c0_61 = arith.constant 0 : index
    %60 = vector.load %arg2[%c8, %c0_60, %c0_61] : memref<9x4x128xbf16, #tpu.memory_space<vmem>>, vector<1x4x128xbf16>
    %61 = vector.shape_cast %60 : vector<1x4x128xbf16> to vector<4x128xbf16>
    %cst_62 = arith.constant dense<0.000000e+00> : vector<256x128xf32>
    %62 = tpu.matmul %59, %61, %cst_62 {dimension_numbers = #tpu.dot_dimension_numbers<[1], [0], [0], [1], [0, 0, 1, 1], [], []>} : vector<256x4xbf16>, vector<4x128xbf16>, vector<256x128xf32> -> vector<256x128xf32>
    %63 = arith.addf %56, %62 : vector<256x128xf32>
    %64 = vector.shape_cast %63 : vector<256x128xf32> to vector<1x16x16x128xf32>
    %65 = arith.truncf %64 : vector<1x16x16x128xf32> to vector<1x16x16x128xbf16>
    %c0_63 = arith.constant 0 : index
    %c0_64 = arith.constant 0 : index
    %c0_65 = arith.constant 0 : index
    %c0_66 = arith.constant 0 : index
    %66 = vector.load %arg3[%c0_63, %c0_64, %c0_65, %c0_66] : memref<1x16x16x128xbf16, #tpu.memory_space<vmem>>, vector<1x16x16x128xbf16>
    tpu.vector_store %arg3[%c0_63, %c0_64, %c0_65, %c0_66], %65 {strides = array<i32>} : memref<1x16x16x128xbf16, #tpu.memory_space<vmem>>, vector<1x16x16x128xbf16>,
    %67 = vector.shape_cast %63 : vector<256x128xf32> to vector<32x8x128xf32>
    %cst_67 = arith.constant dense<0.000000e+00> : vector<8x128xf32>
    %68 = vector.multi_reduction <add>, %67, %cst_67 [0] : vector<32x8x128xf32> to vector<8x128xf32>
    %c0_68 = arith.constant 0 : index
    %c0_69 = arith.constant 0 : index
    %c0_70 = arith.constant 0 : index
    %69 = vector.load %arg4[%c0_68, %c0_69, %c0_70] : memref<1x8x128xf32, #tpu.memory_space<vmem>>, vector<1x8x128xf32>
    %70 = vector.shape_cast %69 : vector<1x8x128xf32> to vector<8x128xf32>
    %71 = vector.shape_cast %68 : vector<8x128xf32> to vector<1x8x128xf32>
    tpu.vector_store %arg4[%c0_68, %c0_69, %c0_70], %71 {strides = array<i32>} : memref<1x8x128xf32, #tpu.memory_space<vmem>>, vector<1x8x128xf32>,
    %72 = arith.mulf %63, %63 : vector<256x128xf32>
    %73 = vector.shape_cast %72 : vector<256x128xf32> to vector<32x8x128xf32>
    %cst_71 = arith.constant dense<0.000000e+00> : vector<8x128xf32>
    %74 = vector.multi_reduction <add>, %73, %cst_71 [0] : vector<32x8x128xf32> to vector<8x128xf32>
    %c0_72 = arith.constant 0 : index
    %c0_73 = arith.constant 0 : index
    %c0_74 = arith.constant 0 : index
    %75 = vector.load %arg5[%c0_72, %c0_73, %c0_74] : memref<1x8x128xf32, #tpu.memory_space<vmem>>, vector<1x8x128xf32>
    %76 = vector.shape_cast %75 : vector<1x8x128xf32> to vector<8x128xf32>
    %77 = vector.shape_cast %74 : vector<8x128xf32> to vector<1x8x128xf32>
    tpu.vector_store %arg5[%c0_72, %c0_73, %c0_74], %77 {strides = array<i32>} : memref<1x8x128xf32, #tpu.memory_space<vmem>>, vector<1x8x128xf32>,
    return
  }
  func.func @transform_0(%arg0: i32) -> (i32, i32, i32, i32) {
    %c0_i32 = arith.constant 0 : i32
    %c0_i32_0 = arith.constant 0 : i32
    %c0_i32_1 = arith.constant 0 : i32
    %c0_i32_2 = arith.constant 0 : i32
    return %arg0, %c0_i32, %c0_i32_0, %c0_i32_1 : i32, i32, i32, i32
  }
  func.func @transform_1(%arg0: i32) -> (i32, i32, i32) {
    %c0_i32 = arith.constant 0 : i32
    %c0_i32_0 = arith.constant 0 : i32
    %c0_i32_1 = arith.constant 0 : i32
    %c0_i32_2 = arith.constant 0 : i32
    return %c0_i32, %c0_i32_0, %c0_i32_1 : i32, i32, i32
  }
  func.func @transform_2(%arg0: i32) -> (i32, i32, i32, i32) {
    %c0_i32 = arith.constant 0 : i32
    %c0_i32_0 = arith.constant 0 : i32
    %c0_i32_1 = arith.constant 0 : i32
    %c0_i32_2 = arith.constant 0 : i32
    return %arg0, %c0_i32, %c0_i32_0, %c0_i32_1 : i32, i32, i32, i32
  }
  func.func @transform_3(%arg0: i32) -> (i32, i32, i32) {
    %c0_i32 = arith.constant 0 : i32
    %c0_i32_0 = arith.constant 0 : i32
    %c0_i32_1 = arith.constant 0 : i32
    return %arg0, %c0_i32, %c0_i32_0 : i32, i32, i32
  }
  func.func @transform_4(%arg0: i32) -> (i32, i32, i32) {
    %c0_i32 = arith.constant 0 : i32
    %c0_i32_0 = arith.constant 0 : i32
    %c0_i32_1 = arith.constant 0 : i32
    return %arg0, %c0_i32, %c0_i32_0 : i32, i32, i32
  }
}

</mosaic_0001>

<bundles_post_ra>
// kernel: tpu_custom_call.1
= control target key start
LH: loop header
LB: loop body
LE: loop exit
PB: predicated region body
PF: predicated region fallthrough
CT: control target
= control target key end

     0   :  { %10 = vsyncpa [#allocation3], 0  ;;  %s8880_s0 = inlined_call_operand.vmem [shape: bf16[2,18,18,4], index: 0, kind: input, shape index: {}]   ;;  %s8881_s1 = inlined_call_operand.vmem [shape: bf16[9,4,128], index: 1, kind: input, shape index: {}]   ;;  %s8882_s2 = inlined_call_operand.hbm [shape: bf16[2,16,16,128], index: 2, kind: output, shape index: {0}]   ;;  %s8883_s3 = inlined_call_operand.hbm [shape: f32[2,8,128], index: 3, kind: output, shape index: {1}]   ;;  %s8884_s4 = inlined_call_operand.hbm [shape: f32[2,8,128], index: 4, kind: output, shape index: {2}]  }
   0x1   :  { %12 = vsyncpa [#allocation3 + $0x1], 0 }
   0x2   :  { %13 = vsyncpa [#allocation5], 0 }
   0x3   :  { %15 = vsyncpa [#allocation5 + $0x1], 0  ;;  %s6954_s15 = smov 0   ;;  %s6956_s16 = smov 0  }
   0x4   :  { %s6958_s17 = smov 0   ;;  %s6960_s18 = smov 0  }
   0x5 LB: > { %s6975_s19 = sadd.s32 4294967295, %s6922_s18   ;;  %s8898_s20 = sadd.s32 4294967294, %s6922_s18   ;;  %s6922_s18 = sphi %s6960_s18, %s8960_s18   ;;  %s6918_s17 = sphi %s6958_s17, %s8959_s17   ;;  %s6914_s16 = sphi %s6956_s16, %s8958_s16   ;;  %s6910_s15 = sphi %s6954_s15, %s8957_s15  }
   0x6   : > { %s6979_s21 = sadd.s32 1, %s6922_s18   ;;  %s75_s22 = sadd.s32 1, %s6918_s17 }
   0x7   : > { %s72_s23 = ssub.s32 %s6922_s18, %s6979_s21  ;;  %p85_p0 = scmp.ne.s32.totalorder %s6918_s17, %s6914_s16 }
   0x8   : > { %p73_p1 = scmp.eq.s32.totalorder %s72_s23, 0  ;;  %p86_p2 = scmp.eq.s32.totalorder %s6975_s19, 1 }
   0x9   : > { %p91_p3 = scmp.ne.s32.totalorder %s6914_s16, %s6910_s15  ;;  %p92_p4 = scmp.eq.s32.totalorder %s8898_s20, 1 }
   0xa   : > { %s6992_s24 = scalar_select %p73_p1, %s6918_s17, %s75_s22  }
   0xb   : > { %p6994_p5 = por %p86_p2, %p85_p0  ;;  %p6998_p6 = por %p92_p4, %p91_p3 }
   0xc   : > { %p5206_p7 = scmp.ge.s32.totalorder %s6922_s18, 1  ;;  %p173_p8 = scmp.lt.s32.totalorder %s6922_s18, 3 }
   0xe   : > { %p174_p9 = pnand %p5206_p7, %p173_p8 }
  0x10   : > { %177 = sbr.rel (%p174_p9) target bundleno = 657 (0x291), region = 28 }
  0x17   : > { %v5211_v0 = vld [vmem:[%s8881_s1 + $0x2] sm:$0x3]  ;;  %vm750_vm0 = vcmask 1041408   ;;  %v5438_v1 = vld [vmem:[%s8881_s1 + $0x8] sm:$0x3]  ;;  %p209_p10 = scmp.lt.s32.totalorder %s6975_s19, 1 }
  0x18   : > { %6633 = vmatprep.subr.msk.bf16.mxu1 %vm750_vm0, %v5211_v0  ;;  %6637 = vmatprep.subr.msk.bf16.mxu0 %vm750_vm0, %v5438_v1  ;;  %v752_v2 = vsel %vm750_vm0, %v5211_v0, 0  ;;  %v7015_v3 = vsel %vm750_vm0, %v5438_v1, 0  ;;  %v247_v4 = vld [vmem:[%s8881_s1] sm:$0x3]  ;;  %v5503_v5 = vld [vmem:[%s8881_s1 + $0xa] sm:$0x3] }
  0x19   : > { %8901 = vst [vmem:[#allocation9_spill] sm:$0xff] %v7015_v3  ;;  %6070 = vmatpush3.bf16.msra.mxu1 %v752_v2  ;;  %6206 = vmatpush3.bf16.msra.mxu0 %v7015_v3  ;;  %s210_s5 = scalar_select %p209_p10, %s6975_s19, 1  ;;  %vm264_vm1 = vsmask.f32 3328  ;;  %vm265_vm2 = vsmask.f32 7440 }
  0x1a   : > { %6634 = vmatprep.subr.msk.bf16.mxu1 %vm750_vm0, %v247_v4  ;;  %6639 = vmatprep.subr.msk.bf16.mxu0 %vm750_vm0, %v5503_v5  ;;  %vm701_vm3 = vcmask 31744   ;;  %v7043_v17 = vsel %vm750_vm0, %v247_v4, 0  ;;  %v7049_v26 = vld [vmem:[%s8881_s1 + $0xc] sm:$0x3]  ;;  %vm7056_vm4 = vmor %vm264_vm1, %vm265_vm2  ;;  %v7062_v37 = vsel %vm750_vm0, %v5503_v5, 0  ;;  %vm1255_vm5 = vcmask 1042432  }
  0x1b   : > { %s6643_s10 = smul.u32 216, %s210_s5  ;;  %v7066_v41 = vsel %vm750_vm0, %v7049_v26, 0  ;;  %vm1256_vm6 = vcmask 1046532   ;;  %s8717_s12 = sand.u32 1, %s6914_s16  }
  0x1c   : > { %vm7282_vm7 = vmor %vm1255_vm5, %vm1256_vm6  ;;  %s5208_s22 = sshll.u32 %s8717_s12, 3  ;;  %s5820_s23 = sshll.u32 %s6975_s19, 11 }
  0x1d   : > { %s7030_s13 = scalar_lea.vmem %s8880_s0, %s6643_s10  ;;  %s8748_s5 = scalar_lea.hbm %s8882_s2, %s5820_s23 }
  0x1e   : > { %v215_v6 = vld [vmem:[%s7030_s13] sm:$0xf]  ;;  %v216_v7 = vld [vmem:[%s7030_s13 + $0x4] sm:$0xf]  ;;  %v248_v8 = vld [vmem:[%s7030_s13 + $0x8] sm:$0x1] }
  0x1f   : > { %v268_v9 = vshrl.u32 %v215_v6, 16  ;;  %v271_v10 = vshll.u32 %v215_v6, 16  ;;  %v277_v11 = vshll.u32 %v216_v7, 16  ;;  %v281_v12 = vshrl.u32 %v216_v7, 16  ;;  %v5390_v13 = vld [vmem:[%s7030_s13 + $0xc] sm:$0xf] }
  0x20   : > { %v287_v14 = vshll.u32 %v248_v8, 16  ;;  %v7037_v15 = vld [vmem:[%s7030_s13 + $0x10] sm:$0xf]  ;;  %v7040_v16 = vld [vmem:[%s7030_s13 + $0x14] sm:$0x1]  ;;  %v2072_v23 = vshrl.u32 %v5390_v13, 16 }
  0x21   : > { %v270_v18 = vrot.slane %v268_v9, 4  ;;  %v273_v19 = vrot.slane %v271_v10, 5  ;;  %v279_v20 = vrot.slane %v277_v11, 5  ;;  %v283_v21 = vrot.slane %v281_v12, 4  ;;  %v217_v31 = vld [vmem:[%s7030_s13 + $0xc] sm:$0xf] }
  0x22   : > { %v289_v22 = vrot.slane %v287_v14, 5  ;;  %v2075_v24 = vshll.u32 %v5390_v13, 16  ;;  %v2081_v25 = vshll.u32 %v7037_v15, 16  ;;  %v2085_v29 = vshrl.u32 %v7037_v15, 16  ;;  %v218_v36 = vld [vmem:[%s7030_s13 + $0x10] sm:$0xf] }
  0x23   : > { %v274_v27 = vor.u32 %v273_v19, %v270_v18  ;;  %v284_v28 = vor.u32 %v283_v21, %v279_v20  ;;  %v2091_v30 = vshll.u32 %v7040_v16, 16  ;;  %v2074_v33 = vrot.slane %v2072_v23, 4  ;;  %v249_v44 = vld [vmem:[%s7030_s13 + $0x14] sm:$0x1]  ;;  %v5393_v55 = vld [vmem:[%s7030_s13 + $0x18] sm:$0xf] }
  0x24   : > { %v2077_v34 = vrot.slane %v2075_v24, 5  ;;  %v2083_v35 = vrot.slane %v2081_v25, 5  ;;  %v2087_v40 = vrot.slane %v2085_v29, 4  ;;  %v292_v45 = vshrl.u32 %v217_v31, 16  ;;  %v7075_v60 = vld [vmem:[%s7030_s13 + $0x1c] sm:$0xf] }
  0x25   : > { %v275_v38 = vrot.slane %v274_v27, 4  ;;  %v285_v39 = vrot.slane %v284_v28, 4  ;;  %v2093_v43 = vrot.slane %v2091_v30, 5  ;;  %v295_v46 = vshll.u32 %v217_v31, 16  ;;  %v7083_v1 = vld [vmem:[%s7030_s13 + $0x20] sm:$0x1] }
  0x26   : > { %v2078_v42 = vor.u32 %v2077_v34, %v2074_v33  ;;  %v2088_v49 = vor.u32 %v2087_v40, %v2083_v35  ;;  %v301_v50 = vshll.u32 %v218_v36, 16  ;;  %v294_v53 = vrot.slane %v292_v45, 4  ;;  %v219_v18 = vld [vmem:[%s7030_s13 + $0x18] sm:$0xf]  ;;  %v220_v23 = vld [vmem:[%s7030_s13 + $0x1c] sm:$0xf] }
  0x27   : > { %v280_v47 = vsel %vm7056_vm4, %v275_v38, %v279_v20  ;;  %v290_v48 = vsel %vm7056_vm4, %v285_v39, %v289_v22  ;;  %v297_v54 = vrot.slane %v295_v46, 5  ;;  %v305_v58 = vshrl.u32 %v218_v36, 16  ;;  %v250_v31 = vld [vmem:[%s7030_s13 + $0x20] sm:$0x1]  ;;  %v5396_v40 = vld [vmem:[%s7030_s13 + $0x24] sm:$0xf] }
  0x28   : > { %v5212_v51 = vcombine.low %v280_v47, %v290_v48  ;;  %v2079_v52 = vrot.slane %v2078_v42, 4  ;;  %v2089_v56 = vrot.slane %v2088_v49, 4  ;;  %v303_v57 = vrot.slane %v301_v50, 5  ;;  %v7106_v46 = vld [vmem:[%s7030_s13 + $0x28] sm:$0xf]  ;;  %s5784_s6 = sshll.u32 %s6975_s19, 7 }
  0x29   : > { %v311_v59 = vshll.u32 %v249_v44, 16  ;;  %v2815_v62 = vrot.slane %v7037_v15, 5  ;;  %v2818_v63 = vrot.slane %v7040_v16, 5  ;;  %v298_v0 = vor.u32 %v297_v54, %v294_v53  ;;  %v7115_v54 = vld [vmem:[%s7030_s13 + $0x2c] sm:$0x1]  ;;  %s8756_s7 = scalar_lea.vmem [#allocation4], %s5208_s22 }
  0x2a   : > { %6071 = vmatprep.mubr.msk.bf16.mxu1 %vm701_vm3, %v5212_v51  ;;  %v2084_v61 = vsel %vm7056_vm4, %v2079_v52, %v2083_v35  ;;  %v2094_v2 = vsel %vm7056_vm4, %v2089_v56, %v2093_v43  ;;  %v307_v4 = vrot.slane %v305_v58, 4  ;;  %v2096_v6 = vshrl.u32 %v5393_v55, 16  ;;  %v5292_v51 = vld [vmem:[%s8881_s1 + $0x4] sm:$0x3]  ;;  %v7315_v16 = vld [vmem:[%s7030_s13 + $0x7c] sm:$0xf] }
  0x2b   : > { %v313_v5 = vrot.slane %v311_v59, 5  ;;  %v5439_v7 = vcombine.low %v2084_v61, %v2094_v2  ;;  %v299_v8 = vrot.slane %v298_v0, 4  ;;  %v2099_v9 = vshll.u32 %v5393_v55, 16  ;;  %v221_v0 = vld [vmem:[%s7030_s13 + $0x24] sm:$0xf]  ;;  %s5070_s8 = sshll.u32 %s8756_s7, 4  ;;  %s8798_s8 = int_to_ptr.vmem [resolvable:$true] %s5070_s8 }
  0x2c   : > { %v2105_v10 = vshll.u32 %v7075_v60, 16  ;;  %v308_v11 = vor.u32 %v307_v4, %v303_v57  ;;  %v2098_v12 = vrot.slane %v2096_v6, 4  ;;  %v2109_v13 = vshrl.u32 %v7075_v60, 16  ;;  %s8762_s9 = scalar_lea.vmem [#allocation6], %s5208_s22  ;;  %s5031_s11 = scalar_lea.sflag [#allocation3], %s8717_s12 }
  0x2d   : > { %v2115_v14 = vshll.u32 %v7083_v1, 16  ;;  %6207 = vmatprep.mubr.msk.bf16.mxu0 %vm701_vm3, %v5439_v7  ;;  %v304_v19 = vsel %vm7056_vm4, %v299_v8, %v303_v57  ;;  %v2101_v20 = vrot.slane %v2099_v9, 5  ;;  %v2822_v22 = vrot.slane %v7075_v60, 5  ;;  %v222_v7 = vld [vmem:[%s7030_s13 + $0x28] sm:$0xf]  ;;  %s5083_s10 = sshll.u32 %s8762_s9, 4  ;;  %s8810_s10 = int_to_ptr.vmem [resolvable:$true] %s5083_s10 }
  0x2e   : > { %v2107_v21 = vrot.slane %v2105_v10, 5  ;;  %v309_v24 = vrot.slane %v308_v11, 4  ;;  %v2111_v25 = vrot.slane %v2109_v13, 4  ;;  %v2825_v28 = vrot.slane %v7083_v1, 5  ;;  %v251_v13 = vld [vmem:[%s7030_s13 + $0x2c] sm:$0x1] }
  0x2f   : > { %v2117_v27 = vrot.slane %v2115_v14, 5  ;;  %v2102_v29 = vor.u32 %v2101_v20, %v2098_v12  ;;  %v7099_v30 = vrot.slane %v2822_v22, 4  ;;  %v316_v33 = vshrl.u32 %v219_v18, 16  ;;  %s6924_s23 = smov [#allocation2]  }
  0x30   : > { %v319_v34 = vshll.u32 %v219_v18, 16  ;;  %v314_v35 = vsel %vm7056_vm4, %v309_v24, %v313_v5  ;;  %v2112_v36 = vor.u32 %v2111_v25, %v2107_v21  ;;  %v325_v38 = vshll.u32 %v220_v23, 16  ;;  %v5399_v24 = vld [vmem:[%s7030_s13 + $0x30] sm:$0xf]  ;;  %s6804_s29 = sshll.u32 %s6924_s23, 4  ;;  %s6805_s29 = int_to_ptr.vmem [resolvable:$false] %s6804_s29 }
  0x31   : > { %v329_v39 = vshrl.u32 %v220_v23, 16  ;;  %v5213_v42 = vcombine.low %v304_v19, %v314_v35  ;;  %v2103_v43 = vrot.slane %v2102_v29, 4  ;;  %v318_v44 = vrot.slane %v316_v33, 4  ;;  %v7135_v33 = vld [vmem:[%s7030_s13 + $0x34] sm:$0xf]  ;;  %s6806_s30 = scalar_lea.vmem %s6805_s29, 4096 }
  0x32   : > { %v321_v45 = vrot.slane %v319_v34, 5  ;;  %v2113_v47 = vrot.slane %v2112_v36, 4  ;;  %v327_v48 = vrot.slane %v325_v38, 5  ;;  %v335_v50 = vshll.u32 %v250_v31, 16 }
  0x33   : > { %v331_v49 = vrot.slane %v329_v39, 4  ;;  %6072 = vmatmul.mubr.msk.bf16.vlgmr.msra.gmra.mrb[0].mxu1 %vm701_vm3, %v5213_v42  ;;  %v2108_v52 = vsel %vm7056_vm4, %v2103_v43, %v2107_v21  ;;  %v2120_v55 = vshrl.u32 %v5396_v40, 16  ;;  %v2123_v56 = vshll.u32 %v5396_v40, 16  ;;  %v7143_v40 = vld [vmem:[%s7030_s13 + $0x38] sm:$0x1] }
  0x34   : > { %v322_v53 = vor.u32 %v321_v45, %v318_v44  ;;  %6104 = vmatpush3.bf16.msra.mxu1 %v7043_v17  ;;  %v2118_v57 = vsel %vm7056_vm4, %v2113_v47, %v2117_v27  ;;  %v337_v59 = vrot.slane %v335_v50, 5  ;;  %v2129_v61 = vshll.u32 %v7106_v46, 16 }
  0x35   : > { %v332_v58 = vor.u32 %v331_v49, %v327_v48  ;;  %v5440_v2 = vcombine.low %v2108_v52, %v2118_v57  ;;  %v2122_v5 = vrot.slane %v2120_v55, 4  ;;  %v2125_v6 = vrot.slane %v2123_v56, 5  ;;  %6635 = vmatprep.subr.msk.bf16.mxu1 %vm750_vm0, %v5292_v51  ;;  %v223_v52 = vld [vmem:[%s7030_s13 + $0x30] sm:$0xf] }
  0x36   : > { %v323_v4 = vrot.slane %v322_v53, 4  ;;  %v2131_v9 = vrot.slane %v2129_v61, 5  ;;  %v2133_v17 = vshrl.u32 %v7106_v46, 16  ;;  %v2139_v10 = vshll.u32 %v7115_v54, 16 }
  0x37   : > { %v333_v8 = vrot.slane %v332_v58, 4  ;;  %6208 = vmatmul.mubr.msk.bf16.vlgmr.msra.gmra.mrb[0].mxu0 %vm701_vm3, %v5440_v2  ;;  %v2126_v12 = vor.u32 %v2125_v6, %v2122_v5  ;;  %v340_v14 = vshrl.u32 %v221_v0, 16  ;;  %v343_v18 = vshll.u32 %v221_v0, 16  ;;  %v224_v58 = vld [vmem:[%s7030_s13 + $0x34] sm:$0xf] }
  0x38   : > { %v328_v11 = vsel %vm7056_vm4, %v323_v4, %v327_v48  ;;  %6240 = vmatpush3.bf16.msra.mxu0 %v7062_v37  ;;  %v2135_v20 = vrot.slane %v2133_v17, 4  ;;  %v2141_v21 = vrot.slane %v2139_v10, 5  ;;  %v349_v23 = vshll.u32 %v222_v7, 16  ;;  %v252_v4 = vld [vmem:[%s7030_s13 + $0x38] sm:$0x1] }
  0x39   : > { %v338_v19 = vsel %vm7056_vm4, %v333_v8, %v337_v59  ;;  %v2127_v27 = vrot.slane %v2126_v12, 4  ;;  %v342_v29 = vrot.slane %v340_v14, 4  ;;  %v345_v31 = vrot.slane %v343_v18, 5  ;;  %6640 = vmatprep.subr.msk.bf16.mxu0 %vm750_vm0, %v7049_v26  ;;  %v5402_v12 = vld [vmem:[%s7030_s13 + $0x3c] sm:$0xf] }
  0x3a   : > { %v5214_v25 = vcombine.low %v328_v11, %v338_v19  ;;  %v2136_v34 = vor.u32 %v2135_v20, %v2131_v9  ;;  %v351_v35 = vrot.slane %v349_v23, 5  ;;  %v353_v37 = vshrl.u32 %v222_v7, 16  ;;  %v7160_v20 = vld [vmem:[%s7030_s13 + $0x40] sm:$0xf] }
  0x3b   : > { %v359_v36 = vshll.u32 %v251_v13, 16  ;;  %v2132_v38 = vsel %vm7056_vm4, %v2127_v27, %v2131_v9  ;;  %v346_v39 = vor.u32 %v345_v31, %v342_v29  ;;  %v2144_v42 = vshrl.u32 %v5399_v24, 16 }
  0x3c   : > { %6075 = vmatprep.mubr.msk.bf16.mxu1 %vm701_vm3, %v5214_v25  ;;  %v2147_v43 = vshll.u32 %v5399_v24, 16  ;;  %v2137_v44 = vrot.slane %v2136_v34, 4  ;;  %v355_v45 = vrot.slane %v353_v37, 4  ;;  %v2153_v26 = vshll.u32 %v7135_v33, 16  ;;  %v7165_v34 = vld [vmem:[%s7030_s13 + $0x44] sm:$0x1] }
  0x3d   : > { %v361_v47 = vrot.slane %v359_v36, 5  ;;  %v347_v48 = vrot.slane %v346_v39, 4  ;;  %v2146_v49 = vrot.slane %v2144_v42, 4  ;;  %v2157_v51 = vshrl.u32 %v7135_v33, 16  ;;  %v225_v42 = vld [vmem:[%s7030_s13 + $0x3c] sm:$0xf] }
  0x3e   : > { %v2149_v50 = vrot.slane %v2147_v43, 5  ;;  %v2142_v53 = vsel %vm7056_vm4, %v2137_v44, %v2141_v21  ;;  %v356_v55 = vor.u32 %v355_v45, %v351_v35  ;;  %v2155_v56 = vrot.slane %v2153_v26, 5  ;;  %v226_v26 = vld [vmem:[%s7030_s13 + $0x40] sm:$0xf] }
  0x3f   : > { %v2163_v57 = vshll.u32 %v7143_v40, 16  ;;  %v5441_v59 = vcombine.low %v2132_v38, %v2142_v53  ;;  %v352_v61 = vsel %vm7056_vm4, %v347_v48, %v351_v35  ;;  %v2159_v2 = vrot.slane %v2157_v51, 4 }
  0x40   : > { %v2150_v0 = vor.u32 %v2149_v50, %v2146_v49  ;;  %v357_v5 = vrot.slane %v356_v55, 4  ;;  %v364_v7 = vshrl.u32 %v223_v52, 16  ;;  %v367_v8 = vshll.u32 %v223_v52, 16 }
  0x41   : > { %v2165_v6 = vrot.slane %v2163_v57, 5  ;;  %6211 = vmatprep.mubr.msk.bf16.mxu0 %vm701_vm3, %v5441_v59  ;;  %v2160_v17 = vor.u32 %v2159_v2, %v2155_v56  ;;  %v373_v10 = vshll.u32 %v224_v58, 16  ;;  %v377_v11 = vshrl.u32 %v224_v58, 16  ;;  %v5405_v2 = vld [vmem:[%s7030_s13 + $0x48] sm:$0xf] }
  0x42   : > { %v2151_v9 = vrot.slane %v2150_v0, 4  ;;  %v362_v13 = vsel %vm7056_vm4, %v357_v5, %v361_v47  ;;  %v366_v14 = vrot.slane %v364_v7, 4  ;;  %v369_v18 = vrot.slane %v367_v8, 5  ;;  %v7183_v8 = vld [vmem:[%s7030_s13 + $0x4c] sm:$0xf] }
  0x43   : > { %v383_v19 = vshll.u32 %v252_v4, 16  ;;  %v5215_v21 = vcombine.low %v352_v61, %v362_v13  ;;  %v2161_v24 = vrot.slane %v2160_v17, 4  ;;  %v375_v25 = vrot.slane %v373_v10, 5  ;;  %v253_v61 = vld [vmem:[%s7030_s13 + $0x44] sm:$0x1] }
  0x44   : > { %v2156_v23 = vsel %vm7056_vm4, %v2151_v9, %v2155_v56  ;;  %v370_v27 = vor.u32 %v369_v18, %v366_v14  ;;  %v379_v29 = vrot.slane %v377_v11, 4  ;;  %v2168_v35 = vshrl.u32 %v5402_v12, 16 }
  0x45   : > { %v385_v31 = vrot.slane %v383_v19, 5  ;;  %6076 = vmatmul.mubr.msk.bf16.gmra.mrb[4].mxu1 %vm701_vm3, %v5215_v21  ;;  %v2166_v37 = vsel %vm7056_vm4, %v2161_v24, %v2165_v6  ;;  %v2171_v36 = vshll.u32 %v5402_v12, 16  ;;  %v2177_v38 = vshll.u32 %v7160_v20, 16 }
  0x46   : > { %v2181_v39 = vshrl.u32 %v7160_v20, 16  ;;  %v5442_v43 = vcombine.low %v2156_v23, %v2166_v37  ;;  %v371_v44 = vrot.slane %v370_v27, 4  ;;  %v380_v45 = vor.u32 %v379_v29, %v375_v25  ;;  %v7191_v23 = vld [vmem:[%s7030_s13 + $0x50] sm:$0x1]  ;;  %v7195_v27 = vld [vmem:[%s7030_s13 + $0x48] sm:$0xf] }
  0x47   : > { %v2170_v47 = vrot.slane %v2168_v35, 4  ;;  %v2173_v48 = vrot.slane %v2171_v36, 5  ;;  %v2179_v49 = vrot.slane %v2177_v38, 5  ;;  %v2187_v51 = vshll.u32 %v7165_v34, 16  ;;  %v7198_v36 = vld [vmem:[%s7030_s13 + $0x4c] sm:$0xf] }
  0x48   : > { %v2183_v50 = vrot.slane %v2181_v39, 4  ;;  %6212 = vmatmul.mubr.msk.bf16.gmra.mrb[4].mxu0 %vm701_vm3, %v5442_v43  ;;  %v376_v52 = vsel %vm7056_vm4, %v371_v44, %v375_v25  ;;  %v381_v53 = vrot.slane %v380_v45, 4  ;;  %v388_v55 = vshrl.u32 %v225_v42, 16 }
  0x49   : > { %v391_v56 = vshll.u32 %v225_v42, 16  ;;  %v2174_v57 = vor.u32 %v2173_v48, %v2170_v47  ;;  %v2189_v59 = vrot.slane %v2187_v51, 5  ;;  %v397_v0 = vshll.u32 %v226_v26, 16 }
  0x4a   : > { %v2184_v58 = vor.u32 %v2183_v50, %v2179_v49  ;;  %v386_v4 = vsel %vm7056_vm4, %v381_v53, %v385_v31  ;;  %v390_v5 = vrot.slane %v388_v55, 4  ;;  %v401_v7 = vshrl.u32 %v226_v26, 16  ;;  %v254_v26 = vld [vmem:[%s7030_s13 + $0x50] sm:$0x1]  ;;  %v5408_v53 = vld [vmem:[%s7030_s13 + $0x54] sm:$0xf] }
  0x4b   : > { %v393_v6 = vrot.slane %v391_v56, 5  ;;  %v5216_v9 = vcombine.low %v376_v52, %v386_v4  ;;  %v2175_v17 = vrot.slane %v2174_v57, 4  ;;  %v399_v11 = vrot.slane %v397_v0, 5  ;;  %v7214_v4 = vld [vmem:[%s7030_s13 + $0x58] sm:$0xf] }
  0x4c   : > { %v2185_v10 = vrot.slane %v2184_v58, 4  ;;  %v403_v13 = vrot.slane %v401_v7, 4  ;;  %v407_v14 = vshll.u32 %v253_v61, 16  ;;  %v2192_v18 = vshrl.u32 %v5405_v2, 16 }
  0x4d   : > { %v394_v12 = vor.u32 %v393_v6, %v390_v5  ;;  %6079 = vmatprep.mubr.msk.bf16.mxu1 %vm701_vm3, %v5216_v9  ;;  %v2180_v19 = vsel %vm7056_vm4, %v2175_v17, %v2179_v49  ;;  %v2195_v24 = vshll.u32 %v5405_v2, 16  ;;  %v2201_v25 = vshll.u32 %v7183_v8, 16 }
  0x4e   : > { %v2190_v21 = vsel %vm7056_vm4, %v2185_v10, %v2189_v59  ;;  %v404_v35 = vor.u32 %v403_v13, %v399_v11  ;;  %v409_v37 = vrot.slane %v407_v14, 5  ;;  %v2194_v38 = vrot.slane %v2192_v18, 4 }
  0x4f   : > { %v5443_v29 = vcombine.low %v2180_v19, %v2190_v21  ;;  %v395_v31 = vrot.slane %v394_v12, 4  ;;  %v2197_v39 = vrot.slane %v2195_v24, 5  ;;  %v2203_v42 = vrot.slane %v2201_v25, 5  ;;  %v7220_v12 = vld [vmem:[%s7030_s13 + $0x5c] sm:$0x1] }
  0x50   : > { %v2205_v43 = vshrl.u32 %v7183_v8, 16  ;;  %v405_v45 = vrot.slane %v404_v35, 4  ;;  %v2211_v47 = vshll.u32 %v7191_v23, 16  ;;  %v412_v48 = vshrl.u32 %v7195_v27, 16  ;;  %v7224_v24 = vld [vmem:[%s7030_s13 + $0x54] sm:$0xf] }
  0x51   : > { %6215 = vmatprep.mubr.msk.bf16.mxu0 %vm701_vm3, %v5443_v29  ;;  %v400_v44 = vsel %vm7056_vm4, %v395_v31, %v399_v11  ;;  %v2198_v49 = vor.u32 %v2197_v39, %v2194_v38  ;;  %v415_v51 = vshll.u32 %v7195_v27, 16  ;;  %v421_v52 = vshll.u32 %v7198_v36, 16 }
  0x52   : > { %v2207_v50 = vrot.slane %v2205_v43, 4  ;;  %v410_v55 = vsel %vm7056_vm4, %v405_v45, %v409_v37  ;;  %v2213_v56 = vrot.slane %v2211_v47, 5  ;;  %v414_v57 = vrot.slane %v412_v48, 4  ;;  %v7230_v37 = vld [vmem:[%s7030_s13 + $0x58] sm:$0xf] }
  0x53   : > { %v425_v58 = vshrl.u32 %v7198_v36, 16  ;;  %v5217_v59 = vcombine.low %v400_v44, %v410_v55  ;;  %v2199_v61 = vrot.slane %v2198_v49, 4  ;;  %v417_v2 = vrot.slane %v415_v51, 5 }
  0x54   : > { %v2208_v0 = vor.u32 %v2207_v50, %v2203_v42  ;;  %v423_v5 = vrot.slane %v421_v52, 5  ;;  %v431_v7 = vshll.u32 %v254_v26, 16  ;;  %v2216_v9 = vshrl.u32 %v5408_v53, 16  ;;  %v255_v26 = vld [vmem:[%s7030_s13 + $0x5c] sm:$0x1] }
  0x55   : > { %v427_v6 = vrot.slane %v425_v58, 4  ;;  %6080 = vmatmul.mubr.msk.bf16.gmra.mrb[8].mxu1 %vm701_vm3, %v5217_v59  ;;  %v2204_v17 = vsel %vm7056_vm4, %v2199_v61, %v2203_v42  ;;  %v418_v11 = vor.u32 %v417_v2, %v414_v57  ;;  %v2219_v13 = vshll.u32 %v5408_v53, 16  ;;  %v5411_v53 = vld [vmem:[%s7030_s13 + $0x60] sm:$0xf]  ;;  %v7244_v59 = vld [vmem:[%s7030_s13 + $0x64] sm:$0xf] }
  0x56   : > { %v2209_v10 = vrot.slane %v2208_v0, 4  ;;  %v433_v18 = vrot.slane %v431_v7, 5  ;;  %v2218_v19 = vrot.slane %v2216_v9, 4  ;;  %v2225_v21 = vshll.u32 %v7214_v4, 16  ;;  %v7251_v9 = vld [vmem:[%s7030_s13 + $0x68] sm:$0x1] }
  0x57   : > { %v428_v14 = vor.u32 %v427_v6, %v423_v5  ;;  %v419_v29 = vrot.slane %v418_v11, 4  ;;  %v2221_v31 = vrot.slane %v2219_v13, 5  ;;  %v2229_v35 = vshrl.u32 %v7214_v4, 16 }
  0x58   : > { %v2214_v25 = vsel %vm7056_vm4, %v2209_v10, %v2213_v56  ;;  %v2227_v42 = vrot.slane %v2225_v21, 5  ;;  %v2235_v43 = vshll.u32 %v7220_v12, 16  ;;  %v436_v48 = vshrl.u32 %v7224_v24, 16 }
  0x59   : > { %v5444_v38 = vcombine.low %v2204_v17, %v2214_v25  ;;  %v429_v39 = vrot.slane %v428_v14, 4  ;;  %v424_v44 = vsel %vm7056_vm4, %v419_v29, %v423_v5  ;;  %v2222_v45 = vor.u32 %v2221_v31, %v2218_v19  ;;  %v7255_v19 = vld [vmem:[%s7030_s13 + $0x60] sm:$0xf] }
  0x5a   : > { %v2231_v47 = vrot.slane %v2229_v35, 4  ;;  %v2237_v50 = vrot.slane %v2235_v43, 5  ;;  %v439_v51 = vshll.u32 %v7224_v24, 16  ;;  %v445_v52 = vshll.u32 %v7230_v37, 16  ;;  %v7261_v35 = vld [vmem:[%s7030_s13 + $0x64] sm:$0xf] }
  0x5b   : > { %6216 = vmatmul.mubr.msk.bf16.gmra.mrb[8].mxu0 %vm701_vm3, %v5444_v38  ;;  %v434_v49 = vsel %vm7056_vm4, %v429_v39, %v433_v18  ;;  %v2223_v56 = vrot.slane %v2222_v45, 4  ;;  %v438_v58 = vrot.slane %v436_v48, 4  ;;  %v449_v2 = vshrl.u32 %v7230_v37, 16 }
  0x5c   : > { %v5218_v55 = vcombine.low %v424_v44, %v434_v49  ;;  %v2232_v57 = vor.u32 %v2231_v47, %v2227_v42  ;;  %v441_v61 = vrot.slane %v439_v51, 5  ;;  %v447_v0 = vrot.slane %v445_v52, 5 }
  0x5d   : > { %v455_v5 = vshll.u32 %v255_v26, 16  ;;  %v2228_v6 = vsel %vm7056_vm4, %v2223_v56, %v2227_v42  ;;  %v2240_v17 = vshrl.u32 %v5411_v53, 16  ;;  %v2243_v10 = vshll.u32 %v5411_v53, 16 }
  0x5e   : > { %6083 = vmatprep.mubr.msk.bf16.mxu1 %vm701_vm3, %v5218_v55  ;;  %v2233_v7 = vrot.slane %v2232_v57, 4  ;;  %v442_v11 = vor.u32 %v441_v61, %v438_v58  ;;  %v451_v13 = vrot.slane %v449_v2, 4  ;;  %v2249_v18 = vshll.u32 %v7244_v59, 16  ;;  %v5471_v58 = vld [vmem:[%s7030_s13 + $0xc] sm:$0xe] }
  0x5f   : > { %v457_v14 = vrot.slane %v455_v5, 5  ;;  %v2242_v25 = vrot.slane %v2240_v17, 4  ;;  %v2245_v29 = vrot.slane %v2243_v10, 5  ;;  %v2253_v31 = vshrl.u32 %v7244_v59, 16 }
  0x60   : > { %v2238_v21 = vsel %vm7056_vm4, %v2233_v7, %v2237_v50  ;;  %v443_v39 = vrot.slane %v442_v11, 4  ;;  %v452_v42 = vor.u32 %v451_v13, %v447_v0  ;;  %v2251_v43 = vrot.slane %v2249_v18, 5  ;;  %v256_v50 = vld [vmem:[%s7030_s13 + $0x68] sm:$0x1] }
  0x61   : > { %v5445_v38 = vcombine.low %v2228_v6, %v2238_v21  ;;  %v2246_v44 = vor.u32 %v2245_v29, %v2242_v25  ;;  %v2255_v45 = vrot.slane %v2253_v31, 4  ;;  %v2259_v47 = vshll.u32 %v7251_v9, 16  ;;  %v7289_v29 = vld [vmem:[%s7030_s13 + $0x70] sm:$0xf] }
  0x62   : > { %v460_v26 = vshrl.u32 %v7255_v19, 16  ;;  %v448_v48 = vsel %vm7056_vm4, %v443_v39, %v447_v0  ;;  %v453_v49 = vrot.slane %v452_v42, 4  ;;  %v463_v51 = vshll.u32 %v7255_v19, 16  ;;  %v7276_v0 = vld [vmem:[%s7030_s13 + $0x6c] sm:$0xf] }
  0x63   : > { %6219 = vmatprep.mubr.msk.bf16.mxu0 %vm701_vm3, %v5445_v38  ;;  %v469_v52 = vshll.u32 %v7261_v35, 16  ;;  %v2247_v53 = vrot.slane %v2246_v44, 4  ;;  %v2256_v55 = vor.u32 %v2255_v45, %v2251_v43  ;;  %v2261_v56 = vrot.slane %v2259_v47, 5 }
  0x64   : > { %v462_v57 = vrot.slane %v460_v26, 4  ;;  %v458_v61 = vsel %vm7056_vm4, %v453_v49, %v457_v14  ;;  %v465_v2 = vrot.slane %v463_v51, 5  ;;  %v473_v6 = vshrl.u32 %v7261_v35, 16  ;;  %v257_v26 = vld [vmem:[%s7030_s13 + $0x74] sm:$0x1] }
  0x65   : > { %v471_v5 = vrot.slane %v469_v52, 5  ;;  %v5219_v7 = vcombine.low %v448_v48, %v458_v61  ;;  %v2252_v17 = vsel %vm7056_vm4, %v2247_v53, %v2251_v43  ;;  %v2257_v10 = vrot.slane %v2256_v55, 4  ;;  %v5472_v48 = vld [vmem:[%s7030_s13 + $0x18] sm:$0xe] }
  0x66   : > { %v479_v11 = vshll.u32 %v256_v50, 16  ;;  %v466_v14 = vor.u32 %v465_v2, %v462_v57  ;;  %v475_v18 = vrot.slane %v473_v6, 4  ;;  %v5487_v21 = vrot.slane %v5471_v58, 9  ;;  %v7308_v53 = vld [vmem:[%s7030_s13 + $0x78] sm:$0xf] }
  0x67   : > { %v2817_v25 = vrot.slane %v2815_v62, 4  ;;  %6084 = vmatmul.mubr.msk.bf16.gmra.mrb[12].mxu1 %vm701_vm3, %v5219_v7  ;;  %v2262_v31 = vsel %vm7056_vm4, %v2257_v10, %v2261_v56  ;;  %v484_v39 = vshrl.u32 %v7276_v0, 16  ;;  %v487_v42 = vshll.u32 %v7276_v0, 16  ;;  %v258_v57 = vld [vmem:[%s7030_s13 + $0x80] sm:$0x1] }
  0x68   : > { %v481_v38 = vrot.slane %v479_v11, 5  ;;  %v5446_v43 = vcombine.low %v2252_v17, %v2262_v31  ;;  %v467_v44 = vrot.slane %v466_v14, 4  ;;  %v476_v45 = vor.u32 %v475_v18, %v471_v5  ;;  %v5473_v10 = vld [vmem:[%s7030_s13 + $0x24] sm:$0xe] }
  0x69   : > { %v2816_v47 = vsel %vm7282_vm7, %v5487_v21, %v2815_v62  ;;  %v2819_v49 = vsel %vm7282_vm7, %v2817_v25, %v2818_v63  ;;  %v486_v50 = vrot.slane %v484_v39, 4  ;;  %v489_v51 = vrot.slane %v487_v42, 5  ;;  %v7334_v39 = vld [vmem:[%s7030_s13 + $0x84] sm:$0xf] }
  0x6a   : > { %v493_v52 = vshll.u32 %v7289_v29, 16  ;;  %6220 = vmatmul.mubr.msk.bf16.gmra.mrb[12].mxu0 %vm701_vm3, %v5446_v43  ;;  %v472_v15 = vsel %vm7056_vm4, %v467_v44, %v471_v5  ;;  %v477_v62 = vrot.slane %v476_v45, 4  ;;  %v5504_v55 = vcombine.low %v2816_v47, %v2819_v49  ;;  %v7342_v43 = vld [vmem:[%s7030_s13 + $0x88] sm:$0xf] }
  0x6b   : > { %v497_v56 = vshrl.u32 %v7289_v29, 16  ;;  %v490_v63 = vor.u32 %v489_v51, %v486_v50  ;;  %v503_v61 = vshll.u32 %v257_v26, 16  ;;  %v5488_v2 = vrot.slane %v5472_v48, 9 }
  0x6c   : > { %v495_v58 = vrot.slane %v493_v52, 5  ;;  %v482_v6 = vsel %vm7056_vm4, %v477_v62, %v481_v38  ;;  %6241 = vmatprep.mubr.msk.bf16.mxu0 %vm701_vm3, %v5504_v55  ;;  %v2826_v5 = vsel %vm7282_vm7, %v7099_v30, %v2825_v28  ;;  %v508_v17 = vshrl.u32 %v7308_v53, 16  ;;  %v259_v52 = vld [vmem:[%s7030_s13 + $0x8c] sm:$0x1] }
  0x6d   : > { %v499_v7 = vrot.slane %v497_v56, 4  ;;  %v5220_v11 = vcombine.low %v472_v15, %v482_v6  ;;  %v491_v14 = vrot.slane %v490_v63, 4  ;;  %v505_v18 = vrot.slane %v503_v61, 5 }
  0x6e   : > { %v2823_v21 = vsel %vm7282_vm7, %v5488_v2, %v2822_v22  ;;  %v510_v38 = vrot.slane %v508_v17, 4  ;;  %v511_v1 = vshll.u32 %v7308_v53, 16  ;;  %v517_v30 = vshll.u32 %v7315_v16, 16  ;;  %v7347_v22 = vld [vmem:[%s8881_s1 + $0xe] sm:$0x3] }
  0x6f   : > { %v500_v25 = vor.u32 %v499_v7, %v495_v58  ;;  %v5505_v31 = vcombine.low %v2823_v21, %v2826_v5  ;;  %6087 = vmatprep.mubr.msk.bf16.mxu1 %vm701_vm3, %v5220_v11  ;;  %v496_v28 = vsel %vm7056_vm4, %v491_v14, %v495_v58  ;;  %v521_v60 = vshrl.u32 %v7315_v16, 16  ;;  %v7366_v5 = vld [vmem:[%s7030_s13 + $0x90] sm:$0xf] }
  0x70   : > { %v527_v42 = vshll.u32 %v258_v57, 16  ;;  %v513_v45 = vrot.slane %v511_v1, 5  ;;  %v5489_v47 = vrot.slane %v5473_v10, 9  ;;  %v2829_v26 = vrot.slane %v7106_v46, 5  ;;  %v5474_v57 = vld [vmem:[%s7030_s13 + $0x30] sm:$0xe] }
  0x71   : > { %v501_v44 = vrot.slane %v500_v25, 4  ;;  %v519_v48 = vrot.slane %v517_v30, 5  ;;  %v523_v49 = vrot.slane %v521_v60, 4  ;;  %v2832_v51 = vrot.slane %v7115_v54, 5  ;;  %v7378_v30 = vld [vmem:[%s7030_s13 + $0x94] sm:$0xf] }
  0x72   : > { %v529_v50 = vrot.slane %v527_v42, 5  ;;  %6242 = vmatmul.mubr.msk.bf16.vlgmr.msra.gmra.mrb[0].mxu0 %vm701_vm3, %v5505_v31  ;;  %v514_v62 = vor.u32 %v513_v45, %v510_v38  ;;  %v2830_v55 = vsel %vm7282_vm7, %v5489_v47, %v2829_v26  ;;  %v2831_v56 = vrot.slane %v2829_v26, 4  ;;  %v260_v60 = vld [vmem:[%s7030_s13 + $0x98] sm:$0x1]  ;;  %v5475_v26 = vld [vmem:[%s7030_s13 + $0x3c] sm:$0xe] }
  0x73   : > { %v506_v15 = vsel %vm7056_vm4, %v501_v44, %v505_v18  ;;  %6274 = vmatpush3.bf16.msra.mxu0 %v7066_v41  ;;  %v524_v46 = vor.u32 %v523_v49, %v519_v48  ;;  %v532_v58 = vshrl.u32 %v7334_v39, 16  ;;  %v535_v54 = vshll.u32 %v7334_v39, 16 }
  0x74   : > { %v5221_v63 = vcombine.low %v496_v28, %v506_v15  ;;  %v515_v61 = vrot.slane %v514_v62, 4  ;;  %v2833_v2 = vsel %vm7282_vm7, %v2831_v56, %v2832_v51  ;;  %v541_v6 = vshll.u32 %v7342_v43, 16  ;;  %6641 = vmatprep.subr.msk.bf16.mxu0 %vm750_vm0, %v7347_v22 }
  0x75   : > { %v545_v7 = vshrl.u32 %v7342_v43, 16  ;;  %v525_v41 = vrot.slane %v524_v46, 4  ;;  %v5506_v17 = vcombine.low %v2830_v55, %v2833_v2  ;;  %v534_v10 = vrot.slane %v532_v58, 4  ;;  %v7398_v46 = vld [vmem:[%s7030_s13 + $0xa0] sm:$0xf] }
  0x76   : > { %6088 = vmatmul.mubr.msk.bf16.gmra.mrb[16].mxu1 %vm701_vm3, %v5221_v63  ;;  %v537_v11 = vrot.slane %v535_v54, 5  ;;  %v520_v14 = vsel %vm7056_vm4, %v515_v61, %v519_v48  ;;  %v543_v18 = vrot.slane %v541_v6, 5  ;;  %v551_v25 = vshll.u32 %v259_v52, 16  ;;  %v7387_v52 = vld [vmem:[%s7030_s13 + $0x9c] sm:$0xf] }
  0x77   : > { %v547_v21 = vrot.slane %v545_v7, 4  ;;  %v530_v31 = vsel %vm7056_vm4, %v525_v41, %v529_v50  ;;  %6245 = vmatprep.mubr.msk.bf16.mxu0 %vm701_vm3, %v5506_v17  ;;  %v5490_v1 = vrot.slane %v5474_v57, 9  ;;  %v2836_v28 = vrot.slane %v7135_v33, 5 }
  0x78   : > { %v538_v38 = vor.u32 %v537_v11, %v534_v10  ;;  %v5222_v42 = vcombine.low %v520_v14, %v530_v31  ;;  %v553_v45 = vrot.slane %v551_v25, 5  ;;  %v2839_v47 = vrot.slane %v7143_v40, 5  ;;  %v261_v10 = vld [vmem:[%s7030_s13 + $0xa4] sm:$0x1]  ;;  %v5476_v11 = vld [vmem:[%s7030_s13 + $0x48] sm:$0xe] }
  0x79   : > { %v548_v44 = vor.u32 %v547_v21, %v543_v18  ;;  %v2837_v49 = vsel %vm7282_vm7, %v5490_v1, %v2836_v28  ;;  %v2838_v50 = vrot.slane %v2836_v28, 4  ;;  %v556_v51 = vshrl.u32 %v7366_v5, 16 }
  0x7a   : > { %v539_v48 = vrot.slane %v538_v38, 4  ;;  %6091 = vmatprep.mubr.msk.bf16.mxu1 %vm701_vm3, %v5222_v42  ;;  %v559_v15 = vshll.u32 %v7366_v5, 16  ;;  %v565_v62 = vshll.u32 %v7378_v30, 16  ;;  %v569_v40 = vshrl.u32 %v7378_v30, 16 }
  0x7b   : > { %v549_v33 = vrot.slane %v548_v44, 4  ;;  %v2840_v56 = vsel %vm7282_vm7, %v2838_v50, %v2839_v47  ;;  %v558_v57 = vrot.slane %v556_v51, 4  ;;  %v575_v63 = vshll.u32 %v260_v60, 16 }
  0x7c   : > { %v544_v55 = vsel %vm7056_vm4, %v539_v48, %v543_v18  ;;  %v5507_v54 = vcombine.low %v2837_v49, %v2840_v56  ;;  %v561_v61 = vrot.slane %v559_v15, 5  ;;  %v567_v2 = vrot.slane %v565_v62, 5  ;;  %v7424_v56 = vld [vmem:[%s7030_s13 + $0xac] sm:$0xf] }
  0x7d   : > { %v554_v58 = vsel %vm7056_vm4, %v549_v33, %v553_v45  ;;  %v571_v7 = vrot.slane %v569_v40, 4  ;;  %v577_v41 = vrot.slane %v575_v63, 5  ;;  %v5491_v17 = vrot.slane %v5475_v26, 9  ;;  %v7419_v33 = vld [vmem:[%s7030_s13 + $0xa8] sm:$0xf] }
  0x7e   : > { %v5223_v6 = vcombine.low %v544_v55, %v554_v58  ;;  %6246 = vmatmul.mubr.msk.bf16.gmra.mrb[4].mxu0 %vm701_vm3, %v5507_v54  ;;  %v562_v14 = vor.u32 %v561_v61, %v558_v57  ;;  %v2843_v18 = vrot.slane %v7160_v20, 5  ;;  %v2846_v21 = vrot.slane %v7165_v34, 5  ;;  %v262_v61 = vld [vmem:[%s7030_s13 + $0xb0] sm:$0x1] }
  0x7f   : > { %v580_v25 = vshrl.u32 %v7387_v52, 16  ;;  %v572_v31 = vor.u32 %v571_v7, %v567_v2  ;;  %v583_v38 = vshll.u32 %v7387_v52, 16  ;;  %v589_v1 = vshll.u32 %v7398_v46, 16 }
  0x80   : > { %6092 = vmatmul.mubr.msk.bf16.gmra.mrb[20].mxu1 %vm701_vm3, %v5223_v6  ;;  %v593_v28 = vshrl.u32 %v7398_v46, 16  ;;  %v563_v60 = vrot.slane %v562_v14, 4  ;;  %v2844_v42 = vsel %vm7282_vm7, %v5491_v17, %v2843_v18  ;;  %v2845_v20 = vrot.slane %v2843_v18, 4  ;;  %v7439_v14 = vld [vmem:[%s7030_s13 + $0xb4] sm:$0xf] }
  0x81   : > { %v582_v44 = vrot.slane %v580_v25, 4  ;;  %v573_v34 = vrot.slane %v572_v31, 4  ;;  %v585_v45 = vrot.slane %v583_v38, 5  ;;  %v591_v47 = vrot.slane %v589_v1, 5 }
  0x82   : > { %v595_v26 = vrot.slane %v593_v28, 4  ;;  %v568_v48 = vsel %vm7056_vm4, %v563_v60, %v567_v2  ;;  %v2847_v49 = vsel %vm7282_vm7, %v2845_v20, %v2846_v21  ;;  %v599_v50 = vshll.u32 %v261_v10, 16  ;;  %v5477_v2 = vld [vmem:[%s7030_s13 + $0x54] sm:$0xe] }
  0x83   : > { %v5492_v51 = vrot.slane %v5476_v11, 9  ;;  %v578_v15 = vsel %vm7056_vm4, %v573_v34, %v577_v41  ;;  %v5508_v62 = vcombine.low %v2844_v42, %v2847_v49  ;;  %v586_v40 = vor.u32 %v585_v45, %v582_v44  ;;  %v7448_v42 = vld [vmem:[%s7030_s13 + $0xb8] sm:$0xf]  ;;  %v263_v49 = vld [vmem:[%s7030_s13 + $0xbc] sm:$0x1] }
  0x84   : > { %v596_v55 = vor.u32 %v595_v26, %v591_v47  ;;  %v5224_v57 = vcombine.low %v568_v48, %v578_v15  ;;  %v601_v63 = vrot.slane %v599_v50, 5  ;;  %v2850_v58 = vrot.slane %v7183_v8, 5 }
  0x85   : > { %v2853_v54 = vrot.slane %v7191_v23, 5  ;;  %6249 = vmatprep.mubr.msk.bf16.mxu0 %vm701_vm3, %v5508_v62  ;;  %v587_v6 = vrot.slane %v586_v40, 4  ;;  %v604_v41 = vshrl.u32 %v7419_v33, 16  ;;  %v607_v17 = vshll.u32 %v7419_v33, 16 }
  0x86   : > { %v597_v7 = vrot.slane %v596_v55, 4  ;;  %6095 = vmatprep.mubr.msk.bf16.mxu1 %vm701_vm3, %v5224_v57  ;;  %v2851_v10 = vsel %vm7282_vm7, %v5492_v51, %v2850_v58  ;;  %v2852_v11 = vrot.slane %v2850_v58, 4  ;;  %v613_v8 = vshll.u32 %v7424_v56, 16  ;;  %v5478_v55 = vld [vmem:[%s7030_s13 + $0x60] sm:$0xe] }
  0x87   : > { %v617_v23 = vshrl.u32 %v7424_v56, 16  ;;  %v592_v18 = vsel %vm7056_vm4, %v587_v6, %v591_v47  ;;  %v606_v25 = vrot.slane %v604_v41, 4  ;;  %v609_v31 = vrot.slane %v607_v17, 5  ;;  %v5479_v6 = vld [vmem:[%s7030_s13 + $0x6c] sm:$0xe] }
  0x88   : > { %v602_v21 = vsel %vm7056_vm4, %v597_v7, %v601_v63  ;;  %v2854_v1 = vsel %vm7282_vm7, %v2852_v11, %v2853_v54  ;;  %v615_v28 = vrot.slane %v613_v8, 5  ;;  %v623_v34 = vshll.u32 %v262_v61, 16  ;;  %v5415_v11 = vld [vmem:[%s7030_s13 + $0x70] sm:$0xf]  ;;  %v5416_v8 = vld [vmem:[%s7030_s13 + $0x74] sm:$0x1] }
  0x89   : > { %v5225_v38 = vcombine.low %v592_v18, %v602_v21  ;;  %v619_v60 = vrot.slane %v617_v23, 4  ;;  %v5509_v20 = vcombine.low %v2851_v10, %v2854_v1  ;;  %v610_v44 = vor.u32 %v609_v31, %v606_v25 }
  0x8a   : > { %v5493_v45 = vrot.slane %v5477_v2, 9  ;;  %v2857_v26 = vrot.slane %v7214_v4, 5  ;;  %v2860_v48 = vrot.slane %v7220_v12, 5  ;;  %v628_v50 = vshrl.u32 %v7439_v14, 16 }
  0x8b   : > { %6096 = vmatmul.mubr.msk.bf16.gmra.mrb[24].mxu1 %vm701_vm3, %v5225_v38  ;;  %v620_v47 = vor.u32 %v619_v60, %v615_v28  ;;  %6250 = vmatmul.mubr.msk.bf16.gmra.mrb[8].mxu0 %vm701_vm3, %v5509_v20  ;;  %v611_v51 = vrot.slane %v610_v44, 4  ;;  %v625_v15 = vrot.slane %v623_v34, 5  ;;  %v631_v62 = vshll.u32 %v7439_v14, 16 }
  0x8c   : > { %v637_v40 = vshll.u32 %v7448_v42, 16  ;;  %v2858_v4 = vsel %vm7282_vm7, %v5493_v45, %v2857_v26  ;;  %v2859_v12 = vrot.slane %v2857_v26, 4  ;;  %v630_v63 = vrot.slane %v628_v50, 4 }
  0x8d   : > { %v621_v57 = vrot.slane %v620_v47, 4  ;;  %v616_v58 = vsel %vm7056_vm4, %v611_v51, %v615_v28  ;;  %v633_v54 = vrot.slane %v631_v62, 5  ;;  %v641_v2 = vshrl.u32 %v7448_v42, 16  ;;  %v5480_v47 = vld [vmem:[%s7030_s13 + $0x78] sm:$0xe] }
  0x8e   : > { %v639_v61 = vrot.slane %v637_v40, 5  ;;  %v2861_v41 = vsel %vm7282_vm7, %v2859_v12, %v2860_v48  ;;  %v647_v17 = vshll.u32 %v263_v49, 16  ;;  %v5494_v10 = vrot.slane %v5478_v55, 9  ;;  %v6743_v51 = vld [vmem:[%s7030_s13] sm:$0xf] }
  0x8f   : > { %v626_v7 = vsel %vm7056_vm4, %v621_v57, %v625_v15  ;;  %v5510_v18 = vcombine.low %v2858_v4, %v2861_v41  ;;  %v634_v21 = vor.u32 %v633_v54, %v630_v63  ;;  %v643_v25 = vrot.slane %v641_v2, 4  ;;  %v7486_v15 = vld [vmem:[%s7030_s13 + $0x4] sm:$0xf]  ;;  %v7490_v40 = vld [vmem:[%s7030_s13 + $0x7c] sm:$0xf] }
  0x90   : > { %v5226_v23 = vcombine.low %v616_v58, %v626_v7  ;;  %v649_v31 = vrot.slane %v647_v17, 5  ;;  %v2864_v38 = vrot.slane %v7244_v59, 5  ;;  %v2867_v1 = vrot.slane %v7251_v9, 5  ;;  %v7493_v55 = vld [vmem:[%s7030_s13 + $0x80] sm:$0x1] }
  0x91   : > { %v5495_v28 = vrot.slane %v5479_v6, 9  ;;  %6253 = vmatprep.mubr.msk.bf16.mxu0 %vm701_vm3, %v5510_v18  ;;  %v635_v60 = vrot.slane %v634_v21, 4  ;;  %v644_v20 = vor.u32 %v643_v25, %v639_v61  ;;  %v2871_v44 = vrot.slane %v5415_v11, 5  ;;  %v5421_v57 = vld [vmem:[%s7030_s13 + $0x88] sm:$0xf] }
  0x92   : > { %6099 = vmatprep.mubr.msk.bf16.mxu1 %vm701_vm3, %v5226_v23  ;;  %v2874_v34 = vrot.slane %v5416_v8, 5  ;;  %v2865_v45 = vsel %vm7282_vm7, %v5494_v10, %v2864_v38  ;;  %v2866_v59 = vrot.slane %v2864_v38, 4  ;;  %v5244_v62 = vcombine.low %v6743_v51, %v7486_v15  ;;  %v5422_v54 = vld [vmem:[%s7030_s13 + $0x8c] sm:$0x1]  ;;  %v5424_v17 = vld [vmem:[%s7030_s13 + $0x94] sm:$0xf] }
  0x93   : > { %v640_v9 = vsel %vm7056_vm4, %v635_v60, %v639_v61  ;;  %v645_v26 = vrot.slane %v644_v20, 4  ;;  %v2872_v48 = vsel %vm7282_vm7, %v5495_v28, %v2871_v44  ;;  %v2873_v49 = vrot.slane %v2871_v44, 4  ;;  %v5481_v61 = vld [vmem:[%s7030_s13 + $0x84] sm:$0xe]  ;;  %v5482_v23 = vld [vmem:[%s7030_s13 + $0x90] sm:$0xe] }
  0x94   : > { %v2868_v50 = vsel %vm7282_vm7, %v2866_v59, %v2867_v1  ;;  %v5496_v58 = vrot.slane %v5480_v47, 9  ;;  %v2878_v7 = vrot.slane %v7490_v40, 5  ;;  %v2881_v41 = vrot.slane %v7493_v55, 5  ;;  %v5425_v25 = vld [vmem:[%s7030_s13 + $0x98] sm:$0x1] }
  0x95   : > { %v650_v4 = vsel %vm7056_vm4, %v645_v26, %v649_v31  ;;  %v5511_v12 = vcombine.low %v2865_v45, %v2868_v50  ;;  %v2875_v63 = vsel %vm7282_vm7, %v2873_v49, %v2874_v34  ;;  %v5497_v10 = vrot.slane %v5481_v61, 9  ;;  %v5427_v31 = vld [vmem:[%s7030_s13 + $0xa0] sm:$0xf]  ;;  %v5428_v60 = vld [vmem:[%s7030_s13 + $0xa4] sm:$0x1] }
  0x96   : > { %v5227_v2 = vcombine.low %v640_v9, %v650_v4  ;;  %v5512_v6 = vcombine.low %v2872_v48, %v2875_v63  ;;  %v2885_v11 = vrot.slane %v5421_v57, 5  ;;  %v2888_v8 = vrot.slane %v5422_v54, 5  ;;  %v5483_v20 = vld [vmem:[%s7030_s13 + $0x9c] sm:$0xe]  ;;  %v6745_v44 = vld [vmem:[%s7030_s13 + $0xc] sm:$0xf] }
  0x97   : > { %6254 = vmatmul.mubr.msk.bf16.gmra.mrb[12].mxu0 %vm701_vm3, %v5511_v12  ;;  %v2879_v18 = vsel %vm7282_vm7, %v5496_v58, %v2878_v7  ;;  %v2880_v21 = vrot.slane %v2878_v7, 4  ;;  %v2892_v28 = vrot.slane %v5424_v17, 5  ;;  %v7520_v34 = vld [vmem:[%s7030_s13 + $0x10] sm:$0xf]  ;;  %v6747_v47 = vld [vmem:[%s7030_s13 + $0x18] sm:$0xf] }
  0x98   : > { %6100 = vmatmul.mubr.msk.bf16.gmra.mrb[28].mxu1 %vm701_vm3, %v5227_v2  ;;  %6257 = vmatprep.mubr.msk.bf16.mxu0 %vm701_vm3, %v5512_v6  ;;  %v2886_v38 = vsel %vm7282_vm7, %v5497_v10, %v2885_v11  ;;  %v2887_v1 = vrot.slane %v2885_v11, 4  ;;  %v5245_v45 = vcombine.low %v6745_v44, %v7520_v34  ;;  %v7527_v9 = vld [vmem:[%s7030_s13 + $0x1c] sm:$0xf]  ;;  %v5498_v48 = vrot.slane %v5482_v23, 9  ;;  %v5430_v57 = vld [vmem:[%s7030_s13 + $0xac] sm:$0xf] }
  0x99   : > { %6105 = vmatprep.mubr.msk.bf16.mxu1 %vm701_vm3, %v5244_v62  ;;  %v2882_v59 = vsel %vm7282_vm7, %v2880_v21, %v2881_v41  ;;  %v5246_v26 = vcombine.low %v6747_v47, %v7527_v9  ;;  %v2894_v51 = vrot.slane %v2892_v28, 4  ;;  %v2895_v62 = vrot.slane %v5425_v25, 5  ;;  %v6749_v54 = vld [vmem:[%s8881_s1 + $0x4] sm:$0x3]  ;;  %v5433_v2 = vld [vmem:[%s7030_s13 + $0xb8] sm:$0xf] }
  0x9a   : > { %v5513_v49 = vcombine.low %v2879_v18, %v2882_v59  ;;  %v2889_v50 = vsel %vm7282_vm7, %v2887_v1, %v2888_v8  ;;  %v5499_v12 = vrot.slane %v5483_v20, 9  ;;  %v2899_v63 = vrot.slane %v5427_v31, 5  ;;  %v7542_v7 = vld [vmem:[%s8881_s1 + $0x6] sm:$0x3]  ;;  %v5431_v10 = vld [vmem:[%s7030_s13 + $0xb0] sm:$0x1] }
  0x9b   : > { %v5514_v4 = vcombine.low %v2886_v38, %v2889_v50  ;;  %v2902_v58 = vrot.slane %v5428_v60, 5  ;;  %v1469_v61 = vsel %vm750_vm0, %v6749_v54, 0  ;;  %v2893_v41 = vsel %vm7282_vm7, %v5498_v48, %v2892_v28  ;;  %v5484_v11 = vld [vmem:[%s7030_s13 + $0xa8] sm:$0xe]  ;;  %v5434_v25 = vld [vmem:[%s7030_s13 + $0xbc] sm:$0x1] }
  0x9c   : > { %v2901_v6 = vrot.slane %v2899_v63, 4  ;;  %v2896_v17 = vsel %vm7282_vm7, %v2894_v51, %v2895_v62  ;;  %v2906_v8 = vrot.slane %v5430_v57, 5  ;;  %v2900_v23 = vsel %vm7282_vm7, %v5499_v12, %v2899_v63  ;;  %v5485_v31 = vld [vmem:[%s7030_s13 + $0xb4] sm:$0xe]  ;;  %v6750_v38 = vld [vmem:[%s7030_s13 + $0x24] sm:$0xf] }
  0x9d   : > { %v2913_v21 = vrot.slane %v5433_v2, 5  ;;  %v7563_v1 = vld [vmem:[%s7030_s13 + $0x28] sm:$0xf]  ;;  %v5515_v60 = vcombine.low %v2893_v41, %v2896_v17  ;;  %v5500_v44 = vrot.slane %v5484_v11, 9  ;;  %v2909_v59 = vrot.slane %v5431_v10, 5 }
  0x9e   : > { %v2903_v18 = vsel %vm7282_vm7, %v2901_v6, %v2902_v58  ;;  %v5247_v28 = vcombine.low %v6750_v38, %v7563_v1  ;;  %v6752_v47 = vld [vmem:[%s7030_s13 + $0x30] sm:$0xf]  ;;  %v2916_v51 = vrot.slane %v5434_v25, 5  ;;  %v5436_v62 = vld [vmem:[%s7030_s13 + $0xc4] sm:$0xf]  ;;  %v2301_v25 = vshrl.u32 %v7490_v40, 16 }
  0x9f   : > { %6258 = vmatmul.mubr.msk.bf16.gmra.mrb[16].mxu0 %vm701_vm3, %v5513_v49  ;;  %v5516_v20 = vcombine.low %v2900_v23, %v2903_v18  ;;  %v5501_v49 = vrot.slane %v5485_v31, 9  ;;  %v2915_v50 = vrot.slane %v2913_v21, 4  ;;  %v2907_v57 = vsel %vm7282_vm7, %v5500_v44, %v2906_v8  ;;  %v5486_v12 = vld [vmem:[%s7030_s13 + $0xc0] sm:$0xe]  ;;  %v6754_v41 = vld [vmem:[%s7030_s13 + $0x3c] sm:$0xf] }
  0xa0   : > { %6106 = vmatmul.mubr.msk.bf16.vlgmr.msra.gmra.mrb[0].mxu1 %vm701_vm3, %v5245_v45  ;;  %6261 = vmatprep.mubr.msk.bf16.mxu0 %vm701_vm3, %v5514_v4  ;;  %v2908_v45 = vrot.slane %v2906_v8, 4  ;;  %v2920_v63 = vrot.slane %v5436_v62, 5  ;;  %v5502_v6 = vrot.slane %v5486_v12, 9  ;;  %v7588_v17 = vld [vmem:[%s7030_s13 + $0x40] sm:$0xf]  ;;  %v5250_v18 = vcombine.low %v7195_v27, %v7198_v36  ;;  %v6706_v62 = vld [vmem:[%s7030_s13 + $0x24] sm:$0xff]  }
  0xa1   : > { %6138 = vmatpush3.bf16.msra.mxu1 %v1469_v61  ;;  %6109 = vmatprep.mubr.msk.bf16.mxu1 %vm701_vm3, %v5246_v26  ;;  %v7568_v26 = vld [vmem:[%s7030_s13 + $0x34] sm:$0xf]  ;;  %v2914_v58 = vsel %vm7282_vm7, %v5501_v49, %v2913_v21  ;;  %v2917_v54 = vsel %vm7282_vm7, %v2915_v50, %v2916_v51  ;;  %v5437_v61 = vld [vmem:[%s7030_s13 + $0xc8] sm:$0x1]  ;;  %v5249_v10 = vcombine.low %v6754_v41, %v7588_v17  ;;  %v2297_v21 = vshll.u32 %v7490_v40, 16 }
  0xa2   : > { %6636 = vmatprep.subr.msk.bf16.mxu1 %vm750_vm0, %v7542_v7  ;;  %v5248_v48 = vcombine.low %v6752_v47, %v7568_v26  ;;  %v2910_v4 = vsel %vm7282_vm7, %v2908_v45, %v2909_v59  ;;  %v5518_v11 = vcombine.low %v2914_v58, %v2917_v54  ;;  %v2922_v8 = vrot.slane %v2920_v63, 4  ;;  %v1207_v45 = vld [vmem:[%s7030_s13] sm:$0xe]  ;;  %v1208_v59 = vld [vmem:[%s7030_s13 + $0xc] sm:$0xe] }
  0xa3   : > { %v5517_v2 = vcombine.low %v2907_v57, %v2910_v4  ;;  %v2923_v23 = vrot.slane %v5437_v61, 5  ;;  %v2921_v31 = vsel %vm7282_vm7, %v5502_v6, %v2920_v63  ;;  %v7603_v27 = vrot.slane %v2297_v21, 5  ;;  %v1211_v41 = vld [vmem:[%s7030_s13 + $0x30] sm:$0xe] }
  0xa4   : > { %v2303_v36 = vrot.slane %v2301_v25, 4  ;;  %v5252_v44 = vcombine.low %v7255_v19, %v7261_v35  ;;  %v2307_v47 = vshll.u32 %v7493_v55, 16  ;;  %v5276_v19 = vrot.slane %v1207_v45, 9 }
  0xa5   : > { %v2924_v38 = vsel %vm7282_vm7, %v2922_v8, %v2923_v23  ;;  %8906 = vst [vmem:[#allocation10_spill] sm:$0xff] %v7603_v27  ;;  %v5277_v35 = vrot.slane %v1208_v59, 9  ;;  %v1274_v4 = vrot.slane %v7527_v9, 5  ;;  %v1281_v12 = vrot.slane %v7563_v1, 5  ;;  %v1212_v8 = vld [vmem:[%s7030_s13 + $0x3c] sm:$0xe] }
  0xa6   : > { %v5519_v40 = vcombine.low %v2921_v31, %v2924_v38  ;;  %v2304_v49 = vor.u32 %v2303_v36, %v7603_v27  ;;  %v7623_v51 = vrot.slane %v2307_v47, 5  ;;  %v5253_v58 = vcombine.low %v7276_v0, %v7289_v29  ;;  %v1213_v31 = vld [vmem:[%s7030_s13 + $0x48] sm:$0xe]  ;;  %v6760_v59 = vld [vmem:[%s7030_s13 + $0x38] sm:$0x1] }
  0xa7   : > { %6262 = vmatmul.mubr.msk.bf16.gmra.mrb[20].mxu0 %vm701_vm3, %v5515_v60  ;;  %v5251_v60 = vcombine.low %v7224_v24, %v7230_v37  ;;  %v6757_v24 = vld [vmem:[%s7030_s13 + $0x14] sm:$0x1]  ;;  %v4109_v54 = vsel %vm750_vm0, %v7347_v22, 0  ;;  %v5254_v61 = vcombine.low %v7308_v53, %v7315_v16  ;;  %v5255_v6 = vcombine.low %v7334_v39, %v7342_v43  ;;  %v6758_v16 = vld [vmem:[%s7030_s13 + $0x20] sm:$0x1] }
  0xa8   : > { %6110 = vmatmul.mubr.msk.bf16.gmra.mrb[4].mxu1 %vm701_vm3, %v5247_v28  ;;  %6265 = vmatprep.mubr.msk.bf16.mxu0 %vm701_vm3, %v5516_v20  ;;  %v1267_v28 = vrot.slane %v7520_v34, 5  ;;  %v6704_v20 = vld [vmem:[%s7030_s13 + $0x18] sm:$0xff]   ;;  %v6756_v34 = vld [vmem:[%s7030_s13 + $0x8] sm:$0x1]  ;;  %v1270_v37 = vrot.slane %v6757_v24, 5  ;;  %8907 = vst [vmem:[#allocation11_spill] sm:$0xff] %v7623_v51  ;;  %v5256_v9 = vcombine.low %v7366_v5, %v7378_v30 }
  0xa9   : > { %6113 = vmatprep.mubr.msk.bf16.mxu1 %vm701_vm3, %v5248_v48  ;;  %v1260_v48 = vrot.slane %v7486_v15, 5  ;;  %v1263_v50 = vrot.slane %v6756_v34, 5  ;;  %v1209_v15 = vld [vmem:[%s7030_s13 + $0x18] sm:$0xe]  ;;  %v7628_v63 = vrot.slane %v2304_v49, 4  ;;  %v1277_v22 = vrot.slane %v6758_v16, 5 }
  0xaa   : > { %v1269_v55 = vrot.slane %v1267_v28, 4  ;;  %v5278_v1 = vrot.slane %v1209_v15, 9  ;;  %v7650_v29 = vsel %vm7282_vm7, %v5277_v35, %v1267_v28  ;;  %v1283_v25 = vrot.slane %v1281_v12, 4  ;;  %v5601_v24 = vld [vmem:[%s7030_s13 + $0x18] sm:$0xf] }
  0xab   : > { %v1262_v57 = vrot.slane %v1260_v48, 4  ;;  %8908 = vst [vmem:[#allocation12_spill] sm:$0xff] %v7628_v63  ;;  %v7646_v0 = vsel %vm7282_vm7, %v5276_v19, %v1260_v48  ;;  %v1291_v47 = vrot.slane %v6760_v59, 5  ;;  %v7687_v49 = vsel %vm750_vm0, %v7542_v7, 0  ;;  %v5602_v7 = vld [vmem:[%s7030_s13 + $0x1c] sm:$0xf] }
  0xac   : > { %v7654_v53 = vsel %vm7282_vm7, %v1269_v55, %v1270_v37  ;;  %v7691_v34 = vsel %vm7282_vm7, %v5278_v1, %v1274_v4  ;;  %v6710_v37 = vld [vmem:[%s7030_s13 + $0x3c] sm:$0xff]   ;;  %v5281_v35 = vrot.slane %v1212_v8, 9  ;;  %v6761_v55 = vld [vmem:[%s7030_s13 + $0x44] sm:$0x1]  ;;  %v3630_v8 = vshll.u32 %v5601_v24, 16 }
  0xad   : > { %v7665_v23 = vsel %vm7282_vm7, %v1262_v57, %v1263_v50  ;;  %v1214_v50 = vld [vmem:[%s7030_s13 + $0x54] sm:$0xe]  ;;  %v1298_v15 = vrot.slane %v6761_v55, 5  ;;  %v5605_v39 = vld [vmem:[%s7030_s13 + $0x28] sm:$0xf] }
  0xae   : > { %v6768_v5 = vld [vmem:[%s7030_s13 + $0x70] sm:$0xf] }
  0xaf   : > { %6266 = vmatmul.mubr.msk.bf16.gmra.mrb[24].mxu0 %vm701_vm3, %v5517_v2  ;;  %v1210_v2 = vld [vmem:[%s7030_s13 + $0x24] sm:$0xe]  ;;  %v1323_v30 = vrot.slane %v6768_v5, 5 }
  0xb0   : > { %6114 = vmatmul.mubr.msk.bf16.gmra.mrb[8].mxu1 %vm701_vm3, %v5249_v10  ;;  %6269 = vmatprep.mubr.msk.bf16.mxu0 %vm701_vm3, %v5518_v11  ;;  %v1288_v10 = vrot.slane %v7568_v26, 5  ;;  %v6708_v11 = vld [vmem:[%s7030_s13 + $0x30] sm:$0xff]   ;;  %v5279_v21 = vrot.slane %v1210_v2, 9 }
  0xb1   : > { %6117 = vmatprep.mubr.msk.bf16.mxu1 %vm701_vm3, %v5250_v18  ;;  %v7661_v26 = vld [vmem:[%s8881_s1 + $0x10] sm:$0x3]  ;;  %v1276_v18 = vrot.slane %v1274_v4, 4  ;;  %v1325_v48 = vrot.slane %v1323_v30, 4 }
  0xb2   : > { %v1290_v45 = vrot.slane %v1288_v10, 4  ;;  %v7698_v19 = vsel %vm7282_vm7, %v5279_v21, %v1281_v12  ;;  %v3640_v21 = vshrl.u32 %v5602_v7, 16 }
  0xb3   : > { %v7707_v4 = vsel %vm7282_vm7, %v1276_v18, %v1277_v22  ;;  %v3627_v22 = vshrl.u32 %v5601_v24, 16  ;;  %v3636_v18 = vshll.u32 %v5602_v7, 16  ;;  %v5604_v24 = vld [vmem:[%s7030_s13 + $0x24] sm:$0xf] }
  0xb4   : > { %v7720_v1 = vsel %vm7282_vm7, %v1290_v45, %v1291_v47 }
  0xb5   : > { %v3629_v43 = vrot.slane %v3627_v22, 4  ;;  %v7762_v7 = vrot.slane %v3636_v18, 5  ;;  %v3654_v22 = vshll.u32 %v5604_v24, 16  ;;  %v3664_v18 = vshrl.u32 %v5605_v39, 16 }
  0xb7   : > { %6270 = vmatmul.mubr.msk.bf16.gmra.mrb[28].mxu0 %vm701_vm3, %v5519_v40  ;;  %v6759_v40 = vld [vmem:[%s7030_s13 + $0x2c] sm:$0x1]  ;;  %v3656_v27 = vrot.slane %v3654_v22, 5 }
  0xb8   : > { %6118 = vmatmul.mubr.msk.bf16.gmra.mrb[12].mxu1 %vm701_vm3, %v5251_v60  ;;  %6275 = vmatprep.mubr.msk.bf16.mxu0 %vm701_vm3, %v6704_v20  ;;  %v1284_v28 = vrot.slane %v6759_v40, 5  ;;  %v1295_v60 = vrot.slane %v7588_v17, 5  ;;  %v6764_v40 = vld [vmem:[%s7030_s13 + $0x50] sm:$0x1]  ;;  %v6769_v17 = vld [vmem:[%s7030_s13 + $0x74] sm:$0x1] }
  0xb9   : > { %6121 = vmatprep.mubr.msk.bf16.mxu1 %vm701_vm3, %v5252_v44  ;;  %v5280_v44 = vrot.slane %v1211_v41, 9  ;;  %v5283_v41 = vrot.slane %v1214_v50, 9  ;;  %v1215_v50 = vld [vmem:[%s7030_s13 + $0x60] sm:$0xe]  ;;  %v5606_v20 = vld [vmem:[%s7030_s13 + $0x2c] sm:$0x1] }
  0xba   : > { %v1297_v12 = vrot.slane %v1295_v60, 4  ;;  %v7733_v45 = vsel %vm7282_vm7, %v5281_v35, %v1295_v60  ;;  %v6765_v35 = vld [vmem:[%s7030_s13 + $0x5c] sm:$0x1] }
  0xbb   : > { %v7716_v2 = vsel %vm7282_vm7, %v5280_v44, %v1288_v10  ;;  %v1312_v55 = vrot.slane %v6765_v35, 5  ;;  %v1216_v35 = vld [vmem:[%s7030_s13 + $0x6c] sm:$0xe] }
  0xbc   : > { %v7737_v59 = vsel %vm7282_vm7, %v1297_v12, %v1298_v15  ;;  %v6766_v15 = vld [vmem:[%s7030_s13 + $0x64] sm:$0xf]  ;;  %v3642_v12 = vrot.slane %v3640_v21, 4  ;;  %v5285_v5 = vrot.slane %v1216_v35, 9 }
  0xbd   : > { %v6716_v21 = vld [vmem:[%s7030_s13 + $0x60] sm:$0xff]  }
  0xbf   : > { %6276 = vmatmul.mubr.msk.bf16.vlgmr.msra.gmra.mrb[0].mxu0 %vm701_vm3, %v6706_v62  ;;  %v6762_v62 = vld [vmem:[%s7030_s13 + $0x4c] sm:$0xf] }
  0xc0   : > { %6122 = vmatmul.mubr.msk.bf16.gmra.mrb[16].mxu1 %vm701_vm3, %v5253_v58  ;;  %6308 = vmatpush3.bf16.msra.mxu0 %v4109_v54  ;;  %v1302_v57 = vrot.slane %v6762_v62, 5  ;;  %v7711_v58 = vsel %vm7282_vm7, %v1283_v25, %v1284_v28  ;;  %v5282_v54 = vrot.slane %v1213_v31, 9  ;;  %v1305_v28 = vrot.slane %v6764_v40, 5 }
  0xc1   : > { %6125 = vmatprep.mubr.msk.bf16.mxu1 %vm701_vm3, %v5254_v61  ;;  %6279 = vmatprep.mubr.msk.bf16.mxu0 %vm701_vm3, %v6708_v11  ;;  %v6712_v61 = vld [vmem:[%s7030_s13 + $0x48] sm:$0xff]   ;;  %v6763_v11 = vld [vmem:[%s7030_s13 + $0x58] sm:$0xf]  ;;  %v1316_v62 = vrot.slane %v6766_v15, 5  ;;  %v5608_v15 = vld [vmem:[%s7030_s13 + $0x34] sm:$0xf] }
  0xc2   : > { %6642 = vmatprep.subr.msk.bf16.mxu0 %vm750_vm0, %v7661_v26  ;;  %v1309_v16 = vrot.slane %v6763_v11, 5  ;;  %v1304_v31 = vrot.slane %v1302_v57, 4  ;;  %v7741_v47 = vsel %vm7282_vm7, %v5282_v54, %v1302_v57  ;;  %v5603_v57 = vld [vmem:[%s7030_s13 + $0x20] sm:$0x1]  ;;  %v5607_v54 = vld [vmem:[%s7030_s13 + $0x30] sm:$0xf] }
  0xc3   : > { %v5284_v11 = vrot.slane %v1215_v50, 9  ;;  %v3678_v50 = vshll.u32 %v5607_v54, 16  ;;  %v3646_v25 = vshll.u32 %v5603_v57, 16  ;;  %v3684_v36 = vshll.u32 %v5608_v15, 16 }
  0xc4   : > { %v7752_v60 = vsel %vm7282_vm7, %v5283_v41, %v1309_v16  ;;  %v7768_v41 = vsel %vm7282_vm7, %v1304_v31, %v1305_v28  ;;  %v1318_v31 = vrot.slane %v1316_v62, 4  ;;  %v3675_v28 = vshrl.u32 %v5607_v54, 16 }
  0xc5   : > { %v7810_v35 = vrot.slane %v3684_v36, 5 }
  0xc7   : > { %6280 = vmatmul.mubr.msk.bf16.gmra.mrb[4].mxu0 %vm701_vm3, %v6710_v37  ;;  %v1311_v37 = vrot.slane %v1309_v16, 4  ;;  %v6767_v16 = vld [vmem:[%s7030_s13 + $0x68] sm:$0x1] }
  0xc8   : > { %6126 = vmatmul.mubr.msk.bf16.gmra.mrb[20].mxu1 %vm701_vm3, %v5255_v6  ;;  %6283 = vmatprep.mubr.msk.bf16.mxu0 %vm701_vm3, %v6712_v61  ;;  %v3632_v6 = vrot.slane %v3630_v8, 5  ;;  %v6714_v61 = vld [vmem:[%s7030_s13 + $0x54] sm:$0xff]   ;;  %v1319_v40 = vrot.slane %v6767_v16, 5  ;;  %v3660_v8 = vshll.u32 %v5605_v39, 16  ;;  %v3643_v16 = vor.u32 %v3642_v12, %v7762_v7 }
  0xc9   : > { %6129 = vmatprep.mubr.msk.bf16.mxu1 %vm701_vm3, %v5256_v9  ;;  %v3651_v9 = vshrl.u32 %v5604_v24, 16  ;;  %v7777_v44 = vsel %vm7282_vm7, %v1311_v37, %v1312_v55  ;;  %v1326_v24 = vrot.slane %v6769_v17, 5  ;;  %v3688_v39 = vshrl.u32 %v5608_v15, 16 }
  0xca   : > { %v3633_v10 = vor.u32 %v3632_v6, %v3629_v43  ;;  %v7783_v37 = vrot.slane %v3660_v8, 5  ;;  %v3666_v55 = vrot.slane %v3664_v18, 4  ;;  %v8909_v43 = vcombine.low %v7387_v52, %v7398_v46  ;;  %v6770_v8 = vld [vmem:[%s7030_s13 + $0x7c] sm:$0xf]  ;;  %v7819_v18 = vld [vmem:[%s7030_s13 + $0x38] sm:$0x1] }
  0xcb   : > { %v3653_v38 = vrot.slane %v3651_v9, 4  ;;  %v7792_v17 = vsel %vm7282_vm7, %v5284_v11, %v1316_v62  ;;  %v7796_v57 = vsel %vm7282_vm7, %v1318_v31, %v1319_v40  ;;  %v3677_v6 = vrot.slane %v3675_v28, 4  ;;  %8911 = vst [vmem:[#allocation13_spill] sm:$0xff] %v7819_v18 }
  0xcc   : > { %v3680_v12 = vrot.slane %v3678_v50, 5  ;;  %v8910_v52 = vcombine.low %v7419_v33, %v7424_v56  ;;  %v3634_v46 = vrot.slane %v3633_v10, 4  ;;  %v3644_v54 = vrot.slane %v3643_v16, 4  ;;  %v6718_v33 = vld [vmem:[%s7030_s13 + $0x6c] sm:$0xff]   ;;  %v1218_v16 = vld [vmem:[%s7030_s13 + $0x84] sm:$0xe] }
  0xcd   : > { %v3670_v62 = vshll.u32 %v5606_v20, 16  ;;  %v7804_v11 = vsel %vm7282_vm7, %v5285_v5, %v1323_v30  ;;  %v7808_v40 = vsel %vm7282_vm7, %v1325_v48, %v1326_v24  ;;  %v3690_v9 = vrot.slane %v3688_v39, 4  ;;  %v6719_v48 = vld [vmem:[%s7030_s13 + $0x78] sm:$0xff]  }
  0xce   : > { %v3657_v10 = vor.u32 %v3656_v27, %v3653_v38  ;;  %v3667_v20 = vor.u32 %v3666_v55, %v7783_v37  ;;  %v1330_v30 = vrot.slane %v6770_v8, 5  ;;  %v3681_v38 = vor.u32 %v3680_v12, %v3677_v6  ;;  %v5610_v5 = vld [vmem:[%s7030_s13 + $0x3c] sm:$0xf] }
  0xcf   : > { %6284 = vmatmul.mubr.msk.bf16.gmra.mrb[8].mxu0 %vm701_vm3, %v6714_v61  ;;  %v3648_v61 = vrot.slane %v3646_v25, 5  ;;  %v1217_v25 = vld [vmem:[%s7030_s13 + $0x78] sm:$0xe]  ;;  %v7835_v50 = vrot.slane %v3670_v62, 5  ;;  %v3691_v39 = vor.u32 %v3690_v9, %v7810_v35  ;;  %v3694_v55 = vshll.u32 %v7819_v18, 16 }
  0xd0   : > { %6130 = vmatmul.mubr.msk.bf16.gmra.mrb[24].mxu1 %vm701_vm3, %v8909_v43  ;;  %6287 = vmatprep.mubr.msk.bf16.mxu0 %vm701_vm3, %v6716_v21  ;;  %v3639_v21 = vsel %vm7056_vm4, %v3634_v46, %v7762_v7  ;;  %v5286_v24 = vrot.slane %v1217_v25, 9  ;;  %v6771_v43 = vld [vmem:[%s7030_s13 + $0x88] sm:$0xf]  ;;  %v7843_v7 = vld [vmem:[%s7030_s13 + $0x40] sm:$0xf]  ;;  %v3658_v12 = vrot.slane %v3657_v10, 4  ;;  %v8913_v62 = vcombine.low %v7439_v14, %v7448_v42 }
  0xd1   : > { %6133 = vmatprep.mubr.msk.bf16.mxu1 %vm701_vm3, %v8910_v52  ;;  %v3649_v31 = vsel %vm7056_vm4, %v3644_v54, %v3648_v61  ;;  %v1337_v6 = vrot.slane %v6771_v43, 5  ;;  %8912 = vst [vmem:[#allocation14_spill] sm:$0xff] %v7843_v7  ;;  %v3668_v52 = vrot.slane %v3667_v20, 4  ;;  %v1332_v46 = vrot.slane %v1330_v30, 4  ;;  %v6772_v54 = vld [vmem:[%s7030_s13 + $0x80] sm:$0x1] }
  0xd2   : > { %v1333_v61 = vrot.slane %v6772_v54, 5  ;;  %v3682_v9 = vrot.slane %v3681_v38, 4  ;;  %v5287_v25 = vrot.slane %v1218_v16, 9  ;;  %v3699_v8 = vshrl.u32 %v5610_v5, 16  ;;  %v6720_v10 = vld [vmem:[%s7030_s13 + $0x84] sm:$0xff]  }
  0xd3   : > { %v3702_v43 = vshll.u32 %v5610_v5, 16  ;;  %v7857_v20 = vcombine.low %v3639_v21, %v3649_v31  ;;  %v7861_v14 = vsel %vm750_vm0, %v7661_v26, 0  ;;  %v3712_v38 = vshrl.u32 %v7843_v7, 16  ;;  %v6721_v21 = vld [vmem:[%s7030_s13 + $0x90] sm:$0xff]   ;;  %v6777_v18 = vld [vmem:[%s7030_s13 + $0xa0] sm:$0xf] }
  0xd4   : > { %v3692_v16 = vrot.slane %v3691_v39, 4  ;;  %v3696_v5 = vrot.slane %v3694_v55, 5  ;;  %v1339_v54 = vrot.slane %v1337_v6, 4  ;;  %v3663_v31 = vsel %vm7056_vm4, %v3658_v12, %v7783_v37 }
  0xd5   : > { %v3673_v26 = vsel %vm7056_vm4, %v3668_v52, %v7835_v50  ;;  %v7876_v39 = vsel %vm7282_vm7, %v5286_v24, %v1330_v30  ;;  %v7880_v55 = vsel %vm7282_vm7, %v1332_v46, %v1333_v61  ;;  %v3687_v37 = vsel %vm7056_vm4, %v3682_v9, %v7810_v35  ;;  %v5616_v30 = vld [vmem:[%s7030_s13 + $0x54] sm:$0xf]  ;;  %v7897_v24 = vld [vmem:[%s7030_s13 + $0x58] sm:$0xf]  ;;  %v7902_v61 = vld [vmem:[%s7030_s13 + $0x90] sm:$0xe] }
  0xd6   : > { %v7893_v12 = vsel %vm7282_vm7, %v5287_v25, %v1337_v6  ;;  %v3701_v50 = vrot.slane %v3699_v8, 4  ;;  %v3704_v52 = vrot.slane %v3702_v43, 5  ;;  %v3714_v46 = vrot.slane %v3712_v38, 4 }
  0xd7   : > { %6288 = vmatmul.mubr.msk.bf16.gmra.mrb[12].mxu0 %vm701_vm3, %v6718_v33  ;;  %v8914_v33 = vcombine.low %v7646_v0, %v7665_v23  ;;  %v6773_v0 = vld [vmem:[%s7030_s13 + $0x8c] sm:$0x1]  ;;  %v3697_v36 = vsel %vm7056_vm4, %v3692_v16, %v3696_v5  ;;  %v3747_v25 = vshrl.u32 %v5616_v30, 16  ;;  %v3750_v8 = vshll.u32 %v5616_v30, 16 }
  0xd8   : > { %6134 = vmatmul.mubr.msk.bf16.gmra.mrb[28].mxu1 %vm701_vm3, %v8913_v62  ;;  %6291 = vmatprep.mubr.msk.bf16.mxu0 %vm701_vm3, %v6719_v48  ;;  %v3708_v48 = vshll.u32 %v7843_v7, 16  ;;  %v1340_v23 = vrot.slane %v6773_v0, 5  ;;  %v5613_v62 = vld [vmem:[%s7030_s13 + $0x48] sm:$0xf]  ;;  %v7886_v0 = vld [vmem:[%s7030_s13 + $0x4c] sm:$0xf]  ;;  %v8916_v38 = vcombine.low %v7650_v29, %v7654_v53  ;;  %v7920_v16 = vcombine.low %v3663_v31, %v3673_v26 }
  0xd9   : > { %6139 = vmatprep.mubr.msk.bf16.mxu1 %vm701_vm3, %v8914_v33  ;;  %v7883_v33 = vld [vmem:[%s7030_s13 + $0x44] sm:$0x1]  ;;  %v3723_v27 = vshrl.u32 %v5613_v62, 16  ;;  %v3726_v15 = vshll.u32 %v5613_v62, 16  ;;  %v3732_v6 = vshll.u32 %v7886_v0, 16  ;;  %v3736_v9 = vshrl.u32 %v7886_v0, 16 }
  0xda   : > { %8915 = vst [vmem:[#allocation15_spill] sm:$0xff] %v7883_v33  ;;  %v7899_v28 = vrot.slane %v3708_v48, 5  ;;  %v7908_v35 = vsel %vm7282_vm7, %v1339_v54, %v1340_v23  ;;  %v3756_v43 = vshll.u32 %v7897_v24, 16  ;;  %v3760_v48 = vshrl.u32 %v7897_v24, 16  ;;  %v5619_v31 = vld [vmem:[%s7030_s13 + $0x60] sm:$0xf] }
  0xdb   : > { %v3718_v5 = vshll.u32 %v7883_v33, 16  ;;  %v5288_v54 = vrot.slane %v7902_v61, 9  ;;  %v8917_v23 = vcombine.low %v7691_v34, %v7707_v4  ;;  %v7931_v29 = vcombine.low %v3687_v37, %v3697_v36  ;;  %v6722_v26 = vld [vmem:[%s7030_s13 + $0x9c] sm:$0xff]   ;;  %v6723_v30 = vld [vmem:[%s7030_s13 + $0xa8] sm:$0xff]  }
  0xdc   : > { %v3705_v53 = vor.u32 %v3704_v52, %v3701_v50  ;;  %v3725_v62 = vrot.slane %v3723_v27, 4  ;;  %v7942_v34 = vrot.slane %v3732_v6, 5  ;;  %v3738_v4 = vrot.slane %v3736_v9, 4  ;;  %v6774_v36 = vld [vmem:[%s8881_s1 + $0x8] sm:$0x3] }
  0xdd   : > { %v3749_v27 = vrot.slane %v3747_v25, 4  ;;  %v3752_v37 = vrot.slane %v3750_v8, 5  ;;  %v7951_v50 = vrot.slane %v3756_v43, 5  ;;  %v3762_v52 = vrot.slane %v3760_v48, 4  ;;  %v6775_v6 = vld [vmem:[%s7030_s13 + $0x94] sm:$0xf] }
  0xde   : > { %v7957_v9 = vld [vmem:[%s7030_s13 + $0x64] sm:$0xf]  ;;  %v3771_v61 = vshrl.u32 %v5619_v31, 16  ;;  %v7959_v22 = vrot.slane %v3705_v53, 4  ;;  %v1351_v25 = vrot.slane %v6777_v18, 5  ;;  %v3739_v43 = vor.u32 %v3738_v4, %v7942_v34 }
  0xdf   : > { %6292 = vmatmul.mubr.msk.bf16.gmra.mrb[16].mxu0 %vm701_vm3, %v6720_v10  ;;  %8918 = vst [vmem:[#allocation16_spill] sm:$0xff] %v7957_v9  ;;  %v3774_v10 = vshll.u32 %v5619_v31, 16  ;;  %v3753_v31 = vor.u32 %v3752_v37, %v3749_v27  ;;  %v3763_v53 = vor.u32 %v3762_v52, %v7951_v50  ;;  %v8919_v18 = vcombine.low %v7698_v19, %v7711_v58  ;;  %v6724_v37 = vld [vmem:[%s7030_s13 + $0xb4] sm:$0xff]  }
  0xe0   : > { %6140 = vmatmul.mubr.msk.bf16.vlgmr.msra.gmra.mrb[0].mxu1 %vm701_vm3, %v8916_v38  ;;  %6295 = vmatprep.mubr.msk.bf16.mxu0 %vm701_vm3, %v6721_v21  ;;  %v3728_v21 = vrot.slane %v3726_v15, 5  ;;  %v7940_v38 = vld [vmem:[%s7030_s13 + $0x50] sm:$0x1]  ;;  %v7949_v15 = vld [vmem:[%s7030_s13 + $0x5c] sm:$0x1]  ;;  %v8920_v27 = vcombine.low %v7716_v2, %v7720_v1  ;;  %v1353_v52 = vrot.slane %v1351_v25, 4 }
  0xe1   : > { %6172 = vmatpush3.bf16.msra.mxu1 %v7687_v49  ;;  %6143 = vmatprep.mubr.msk.bf16.mxu1 %vm701_vm3, %v8917_v23  ;;  %v3715_v49 = vor.u32 %v3714_v46, %v7899_v28  ;;  %v7953_v46 = vrot.slane %v3718_v5, 5  ;;  %v1344_v23 = vrot.slane %v6775_v6, 5  ;;  %v3742_v48 = vshll.u32 %v7940_v38, 16  ;;  %v1220_v5 = vld [vmem:[%s7030_s13 + $0x9c] sm:$0xe] }
  0xe2   : > { %6638 = vmatprep.subr.msk.bf16.mxu1 %vm750_vm0, %v6774_v36  ;;  %v6776_v36 = vld [vmem:[%s7030_s13 + $0x98] sm:$0x1]  ;;  %v3729_v7 = vor.u32 %v3728_v21, %v3725_v62  ;;  %v3766_v6 = vshll.u32 %v7949_v15, 16  ;;  %v3784_v62 = vshrl.u32 %v7957_v9, 16  ;;  %v3776_v4 = vrot.slane %v3774_v10, 5 }
  0xe3   : > { %v1347_v33 = vrot.slane %v6776_v36, 5  ;;  %v3716_v8 = vrot.slane %v3715_v49, 4  ;;  %v3780_v36 = vshll.u32 %v7957_v9, 16  ;;  %v7978_v21 = vsel %vm7282_vm7, %v5288_v54, %v1344_v23  ;;  %v7989_v2 = vld [vmem:[%s7030_s13 + $0x68] sm:$0x1] }
  0xe4   : > { %v3773_v49 = vrot.slane %v3771_v61, 4  ;;  %v3730_v19 = vrot.slane %v3729_v7, 4  ;;  %v5289_v58 = vrot.slane %v1220_v5, 9  ;;  %v3740_v3 = vrot.slane %v3739_v43, 4  ;;  %8921 = vst [vmem:[#allocation17_spill] sm:$0xff] %v7989_v2  ;;  %v6725_v5 = vld [vmem:[%s7030_s13 + $0xc0] sm:$0xff]  }
  0xe5   : > { %v3744_v54 = vrot.slane %v3742_v48, 5  ;;  %v3768_v63 = vrot.slane %v3766_v6, 5  ;;  %v1358_v61 = vrot.slane %v7424_v56, 5  ;;  %v3754_v10 = vrot.slane %v3753_v31, 4  ;;  %v1222_v31 = vld [vmem:[%s7030_s13 + $0xb4] sm:$0xe] }
  0xe6   : > { %v3764_v51 = vrot.slane %v3763_v53, 4  ;;  %v7991_v1 = vrot.slane %v3780_v36, 5  ;;  %v3786_v7 = vrot.slane %v3784_v62, 4  ;;  %v3711_v43 = vsel %vm7056_vm4, %v7959_v22, %v7899_v28  ;;  %v6779_v62 = vld [vmem:[%s7030_s13 + $0xb0] sm:$0x1] }
  0xe7   : > { %6296 = vmatmul.mubr.msk.bf16.gmra.mrb[20].mxu0 %vm701_vm3, %v6722_v26  ;;  %v1346_v26 = vrot.slane %v1344_v23, 4  ;;  %v1221_v23 = vld [vmem:[%s7030_s13 + $0xa8] sm:$0xe]  ;;  %v3721_v48 = vsel %vm7056_vm4, %v3716_v8, %v7953_v46  ;;  %v3777_v6 = vor.u32 %v3776_v4, %v3773_v49  ;;  %v3735_v53 = vsel %vm7056_vm4, %v3730_v19, %v7942_v34  ;;  %v5622_v46 = vld [vmem:[%s7030_s13 + $0x6c] sm:$0xf] }
  0xe8   : > { %6144 = vmatmul.mubr.msk.bf16.gmra.mrb[4].mxu1 %vm701_vm3, %v8919_v18  ;;  %6299 = vmatprep.mubr.msk.bf16.mxu0 %vm701_vm3, %v6723_v30  ;;  %v6778_v18 = vld [vmem:[%s7030_s13 + $0xa4] sm:$0x1]  ;;  %v8011_v36 = vsel %vm7282_vm7, %v5289_v58, %v1351_v25  ;;  %v5290_v28 = vrot.slane %v1221_v23, 9  ;;  %v1360_v8 = vrot.slane %v1358_v61, 4  ;;  %v3790_v49 = vshll.u32 %v7989_v2, 16 }
  0xe9   : > { %6147 = vmatprep.mubr.msk.bf16.mxu1 %vm701_vm3, %v8920_v27  ;;  %v1354_v30 = vrot.slane %v6778_v18, 5  ;;  %v8003_v56 = vsel %vm7282_vm7, %v1346_v26, %v1347_v33  ;;  %v3745_v33 = vsel %vm7056_vm4, %v3740_v3, %v3744_v54  ;;  %v1361_v26 = vrot.slane %v6779_v62, 5  ;;  %v5625_v18 = vld [vmem:[%s7030_s13 + $0x78] sm:$0xf]  ;;  %v8066_v54 = vld [vmem:[%s7030_s13 + $0xbc] sm:$0x1] }
  0xea   : > { %v3759_v34 = vsel %vm7056_vm4, %v3754_v10, %v7951_v50  ;;  %v3769_v25 = vsel %vm7056_vm4, %v3764_v51, %v3768_v63  ;;  %v3787_v4 = vor.u32 %v3786_v7, %v7991_v1  ;;  %v5291_v27 = vrot.slane %v1222_v31, 9  ;;  %v8040_v51 = vld [vmem:[%s7030_s13 + $0x70] sm:$0xf]  ;;  %v8070_v10 = vld [vmem:[%s7030_s13 + $0x7c] sm:$0xf] }
  0xeb   : > { %v8015_v22 = vsel %vm7282_vm7, %v1353_v52, %v1354_v30  ;;  %v8923_v3 = vcombine.low %v7733_v45, %v7737_v59  ;;  %v8036_v19 = vrot.slane %v3777_v6, 4  ;;  %v1365_v50 = vrot.slane %v7448_v42, 5  ;;  %8924 = vst [vmem:[#allocation19_spill] sm:$0xff] %v8040_v51  ;;  %8926 = vst [vmem:[#allocation20_spill] sm:$0xff] %v8070_v10  ;;  %v5628_v7 = vld [vmem:[%s7030_s13 + $0x84] sm:$0xf] }
  0xec   : > { %8922 = vst [vmem:[#allocation18_spill] sm:$0xff] %v8015_v22  ;;  %v3795_v63 = vshrl.u32 %v5622_v46, 16  ;;  %v8925_v45 = vcombine.low %v7741_v47, %v7768_v41  ;;  %v8048_v58 = vcombine.low %v3735_v53, %v3745_v33  ;;  %v8054_v42 = vsel %vm7282_vm7, %v5290_v28, %v1358_v61  ;;  %v6726_v61 = vld [vmem:[%s7030_s13 + $0xcc] sm:$0xff]   ;;  %v8082_v31 = vld [vmem:[%s7030_s13 + $0x88] sm:$0xf] }
  0xed   : > { %v8057_v30 = vcombine.low %v3759_v34, %v3769_v25  ;;  %v8061_v47 = vsel %vm7282_vm7, %v1360_v8, %v1361_v26  ;;  %v8063_v41 = vrot.slane %v3790_v49, 5  ;;  %v3804_v6 = vshll.u32 %v8040_v51, 16  ;;  %8927 = vst [vmem:[#allocation21_spill] sm:$0xff] %v8082_v31  ;;  %v5631_v62 = vld [vmem:[%s7030_s13 + $0x90] sm:$0xf] }
  0xee   : > { %v8088_v28 = vrot.slane %v1365_v50, 4  ;;  %v8090_v33 = vrot.slane %v3795_v63, 4  ;;  %v3808_v8 = vshrl.u32 %v8040_v51, 16  ;;  %v3819_v26 = vshrl.u32 %v5625_v18, 16  ;;  %v8097_v25 = vld [vmem:[%s7030_s13 + $0x94] sm:$0xf] }
  0xef   : > { %6300 = vmatmul.mubr.msk.bf16.gmra.mrb[24].mxu0 %vm701_vm3, %v6724_v37  ;;  %v8034_v37 = vcombine.low %v3711_v43, %v3721_v48  ;;  %v8078_v43 = vsel %vm7282_vm7, %v5291_v27, %v1365_v50  ;;  %v3798_v48 = vshll.u32 %v5622_v46, 16  ;;  %v3822_v49 = vshll.u32 %v5625_v18, 16  ;;  %8928 = vst [vmem:[#allocation22_spill] sm:$0xff] %v8097_v25  ;;  %v8135_v2 = vld [vmem:[%s7030_s13 + $0x8c] sm:$0x1] }
  0xf0   : > { %6148 = vmatmul.mubr.msk.bf16.gmra.mrb[8].mxu1 %vm701_vm3, %v8923_v3  ;;  %6303 = vmatprep.mubr.msk.bf16.mxu0 %vm701_vm3, %v6725_v5  ;;  %v8074_v5 = vrot.slane %v3787_v4, 4  ;;  %v3828_v46 = vshll.u32 %v8070_v10, 16  ;;  %v3832_v34 = vshrl.u32 %v8070_v10, 16  ;;  %v3843_v4 = vshrl.u32 %v5628_v7, 16 }
  0xf1   : > { %6151 = vmatprep.mubr.msk.bf16.mxu1 %vm701_vm3, %v8925_v45  ;;  %v3846_v27 = vshll.u32 %v5628_v7, 16  ;;  %v3852_v3 = vshll.u32 %v8082_v31, 16  ;;  %v3856_v50 = vshrl.u32 %v8082_v31, 16  ;;  %v8107_v45 = vld [vmem:[%s7030_s13 + $0x74] sm:$0x1]  ;;  %v3800_v18 = vrot.slane %v3798_v48, 5 }
  0xf2   : > { %v3867_v52 = vshrl.u32 %v5631_v62, 16  ;;  %v3870_v53 = vshll.u32 %v5631_v62, 16  ;;  %v8929_v7 = vcombine.low %v7752_v60, %v7777_v44  ;;  %v3810_v59 = vrot.slane %v3808_v8, 4  ;;  %v5634_v48 = vld [vmem:[%s7030_s13 + $0x9c] sm:$0xf] }
  0xf3   : > { %v3876_v63 = vshll.u32 %v8097_v25, 16  ;;  %v3880_v23 = vshrl.u32 %v8097_v25, 16  ;;  %v8930_v62 = vcombine.low %v7792_v17, %v7796_v57  ;;  %v8125_v44 = vld [vmem:[%s7030_s13 + $0x80] sm:$0x1]  ;;  %v3821_v60 = vrot.slane %v3819_v26, 4 }
  0xf4   : > { %8931 = vst [vmem:[#allocation23_spill] sm:$0xff] %v8125_v44  ;;  %v3845_v31 = vrot.slane %v3843_v4, 4  ;;  %v3848_v8 = vrot.slane %v3846_v27, 5  ;;  %v8129_v10 = vrot.slane %v3852_v3, 5  ;;  %v3858_v51 = vrot.slane %v3856_v50, 4 }
  0xf5   : > { %v8132_v25 = vld [vmem:[%s7030_s13 + $0xa0] sm:$0xf]  ;;  %v3869_v17 = vrot.slane %v3867_v52, 4  ;;  %v3872_v57 = vrot.slane %v3870_v53, 5  ;;  %v3894_v9 = vshll.u32 %v5634_v48, 16  ;;  %v3801_v26 = vor.u32 %v3800_v18, %v8090_v33 }
  0xf6   : > { %v3838_v27 = vshll.u32 %v8125_v44, 16  ;;  %v8144_v3 = vld [vmem:[%s7030_s13 + $0x98] sm:$0x1]  ;;  %v3900_v50 = vshll.u32 %v8132_v25, 16  ;;  %v3904_v52 = vshrl.u32 %v8132_v25, 16  ;;  %v3849_v22 = vor.u32 %v3848_v8, %v3845_v31 }
  0xf7   : > { %6304 = vmatmul.mubr.msk.bf16.gmra.mrb[28].mxu0 %vm701_vm3, %v6726_v61  ;;  %v8115_v61 = vrot.slane %v3804_v6, 5  ;;  %v3834_v6 = vrot.slane %v3832_v34, 4  ;;  %v3882_v34 = vrot.slane %v3880_v23, 4  ;;  %v3862_v33 = vshll.u32 %v8135_v2, 16 }
  0xf8   : > { %6152 = vmatmul.mubr.msk.bf16.gmra.mrb[12].mxu1 %vm701_vm3, %v8929_v7  ;;  %6309 = vmatprep.mubr.msk.bf16.mxu0 %vm701_vm3, %v7857_v20  ;;  %v3824_v7 = vrot.slane %v3822_v49, 5  ;;  %v8127_v20 = vrot.slane %v3828_v46, 5  ;;  %v3814_v49 = vshll.u32 %v8107_v45, 16  ;;  %v8139_v46 = vrot.slane %v3876_v63, 5 }
  0xf9   : > { %6155 = vmatprep.mubr.msk.bf16.mxu1 %vm701_vm3, %v8930_v62  ;;  %v3891_v62 = vshrl.u32 %v5634_v48, 16  ;;  %v3811_v4 = vor.u32 %v3810_v59, %v8115_v61  ;;  %v3859_v23 = vor.u32 %v3858_v51, %v8129_v10  ;;  %v3873_v59 = vor.u32 %v3872_v57, %v3869_v17  ;;  %v8177_v57 = vld [vmem:[%s7030_s13 + $0xa4] sm:$0x1] }
  0xfa   : > { %v3825_v53 = vor.u32 %v3824_v7, %v3821_v60  ;;  %v3835_v48 = vor.u32 %v3834_v6, %v8127_v20  ;;  %v3896_v18 = vrot.slane %v3894_v9, 5  ;;  %v8932_v44 = vcombine.low %v7804_v11, %v7808_v40 }
  0xfb   : > { %v3893_v63 = vrot.slane %v3891_v62, 4  ;;  %v8933_v31 = vrot.slane %v8066_v54, 5  ;;  %v3816_v51 = vrot.slane %v3814_v49, 5  ;;  %v3883_v60 = vor.u32 %v3882_v34, %v8139_v46  ;;  %v8180_v34 = vld [vmem:[%s7030_s13 + $0xac] sm:$0xf] }
  0xfc   : > { %v3886_v9 = vshll.u32 %v8144_v3, 16  ;;  %v8934_v11 = vcombine.low %v7876_v39, %v7880_v55  ;;  %v3802_v40 = vrot.slane %v3801_v26, 4  ;;  %v8173_v54 = vrot.slane %v3900_v50, 5 }
  0xfd   : > { %v3826_v7 = vrot.slane %v3825_v53, 4  ;;  %v3836_v6 = vrot.slane %v3835_v48, 4  ;;  %v3840_v8 = vrot.slane %v3838_v27, 5  ;;  %v3864_v17 = vrot.slane %v3862_v33, 5  ;;  %v8190_v48 = vld [vmem:[%s7030_s13 + $0xb0] sm:$0x1] }
  0xfe   : > { %v3850_v39 = vrot.slane %v3849_v22, 4  ;;  %v3860_v55 = vrot.slane %v3859_v23, 4  ;;  %v3874_v62 = vrot.slane %v3873_v59, 4  ;;  %v3897_v49 = vor.u32 %v3896_v18, %v3893_v63 }
  0xff   : > { %6310 = vmatmul.mubr.msk.bf16.vlgmr.msra.gmra.mrb[0].mxu0 %vm701_vm3, %v7920_v16  ;;  %v8163_v16 = vsel %vm7282_vm7, %v8088_v28, %v8933_v31  ;;  %v3906_v28 = vrot.slane %v3904_v52, 4  ;;  %v3888_v26 = vrot.slane %v3886_v9, 5  ;;  %v3807_v52 = vsel %vm7056_vm4, %v3802_v40, %v8115_v61 }
 0x100   : > { %6156 = vmatmul.mubr.msk.bf16.gmra.mrb[16].mxu1 %vm701_vm3, %v8932_v44  ;;  %6342 = vmatpush3.bf16.msra.mxu0 %v7861_v14  ;;  %v3812_v14 = vrot.slane %v3811_v4, 4  ;;  %v5637_v44 = vld [vmem:[%s7030_s13 + $0xa8] sm:$0xf]  ;;  %v3910_v22 = vshll.u32 %v8177_v57, 16  ;;  %v3831_v33 = vsel %vm7056_vm4, %v3826_v7, %v8127_v20  ;;  %v3841_v23 = vsel %vm7056_vm4, %v3836_v6, %v3840_v8 }
 0x101   : > { %6159 = vmatprep.mubr.msk.bf16.mxu1 %vm701_vm3, %v8934_v11  ;;  %6313 = vmatprep.mubr.msk.bf16.mxu0 %vm701_vm3, %v7931_v29  ;;  %v3884_v29 = vrot.slane %v3883_v60, 4  ;;  %v3915_v4 = vshrl.u32 %v5637_v44, 16  ;;  %v3918_v50 = vshll.u32 %v5637_v44, 16  ;;  %v3907_v53 = vor.u32 %v3906_v28, %v8173_v54  ;;  %v5686_v11 = vld [vmem:[%s7030_s13 + $0x48] sm:$0xe] }
 0x102   : > { %v3817_v27 = vsel %vm7056_vm4, %v3812_v14, %v3816_v51  ;;  %v3924_v59 = vshll.u32 %v8180_v34, 16  ;;  %v3928_v61 = vshrl.u32 %v8180_v34, 16  ;;  %v3855_v63 = vsel %vm7056_vm4, %v3850_v39, %v8129_v10  ;;  %v8255_v39 = vld [vmem:[%s7030_s13 + $0xb8] sm:$0xf] }
 0x103   : > { %v3865_v18 = vsel %vm7056_vm4, %v3860_v55, %v3864_v17  ;;  %v3879_v20 = vsel %vm7056_vm4, %v3874_v62, %v8139_v46  ;;  %v3898_v31 = vrot.slane %v3897_v49, 4  ;;  %v8935_v51 = vcombine.low %v7893_v12, %v7908_v35 }
 0x104   : > { %v3917_v10 = vrot.slane %v3915_v4, 4  ;;  %v3920_v60 = vrot.slane %v3918_v50, 5  ;;  %v3934_v9 = vshll.u32 %v8190_v48, 16  ;;  %v8936_v46 = vcombine.low %v7978_v21, %v8003_v56  ;;  %v5640_v21 = vld [vmem:[%s7030_s13 + $0xb4] sm:$0xf] }
 0x105   : > { %v5307_v12 = vcombine.low %v8054_v42, %v8061_v47  ;;  %v8937_v35 = vsel %vm7056_vm4, %v8074_v5, %v8063_v41  ;;  %v3908_v14 = vrot.slane %v3907_v53, 4  ;;  %v3912_v28 = vrot.slane %v3910_v22, 5  ;;  %v5688_v4 = vld [vmem:[%s7030_s13 + $0x60] sm:$0xe]  ;;  %v5689_v53 = vld [vmem:[%s7030_s13 + $0x6c] sm:$0xe] }
 0x106   : > { %v5308_v56 = vcombine.low %v8078_v43, %v8163_v16  ;;  %v8238_v44 = vcombine.low %v3807_v52, %v3817_v27  ;;  %v8240_v42 = vrot.slane %v3924_v59, 5  ;;  %v3930_v47 = vrot.slane %v3928_v61, 4  ;;  %v8946_v16 = vld [vmem:[#allocation11_spill] sm:$0xff] }
 0x107   : > { %6314 = vmatmul.mubr.msk.bf16.gmra.mrb[4].mxu0 %vm701_vm3, %v8034_v37  ;;  %v3889_v37 = vsel %vm7056_vm4, %v3884_v29, %v3888_v26  ;;  %v8242_v41 = vcombine.low %v3831_v33, %v3841_v23  ;;  %v8244_v5 = vcombine.low %v3855_v63, %v3865_v18  ;;  %v3903_v6 = vsel %vm7056_vm4, %v3898_v31, %v8173_v54  ;;  %v8939_v23 = vld [vmem:[#allocation18_spill] sm:$0xff]  ;;  %v5643_v63 = vld [vmem:[%s7030_s13 + $0xc0] sm:$0xf]  ;;  %v8941_v18 = vld [vmem:[#allocation16_spill] sm:$0xff] }
 0x108   : > { %6160 = vmatmul.mubr.msk.bf16.gmra.mrb[20].mxu1 %vm701_vm3, %v8935_v51  ;;  %6317 = vmatprep.mubr.msk.bf16.mxu0 %vm701_vm3, %v8048_v58  ;;  %v8938_v58 = vsel %vm7056_vm4, %v8036_v19, %v7991_v1  ;;  %v8246_v7 = vcombine.low %v3879_v20, %v3889_v37  ;;  %v5702_v1 = vrot.slane %v5686_v11, 9  ;;  %v5687_v19 = vld [vmem:[%s7030_s13 + $0x54] sm:$0xe]  ;;  %v3921_v8 = vor.u32 %v3920_v60, %v3917_v10  ;;  %v8942_v31 = vld [vmem:[#allocation17_spill] sm:$0xff] }
 0x109   : > { %6163 = vmatprep.mubr.msk.bf16.mxu1 %vm701_vm3, %v8936_v46  ;;  %v5656_v40 = vcombine.low %v8938_v58, %v8937_v35  ;;  %v8252_v17 = vrot.slane %v3934_v9, 5  ;;  %v3939_v55 = vshrl.u32 %v5640_v21, 16  ;;  %v3913_v62 = vsel %vm7056_vm4, %v3908_v14, %v3912_v28  ;;  %v8943_v9 = vld [vmem:[#allocation19_spill] sm:$0xff]  ;;  %v8304_v35 = vld [vmem:[%s7030_s13 + $0xbc] sm:$0x1] }
 0x10a   : > { %v3942_v49 = vshll.u32 %v5640_v21, 16  ;;  %v4398_v29 = vrot.slane %v7886_v0, 5  ;;  %v4401_v26 = vrot.slane %v7940_v38, 5  ;;  %v3931_v50 = vor.u32 %v3930_v47, %v8240_v42  ;;  %v8307_v58 = vld [vmem:[%s7030_s13 + $0xc4] sm:$0xf] }
 0x10b   : > { %v5703_v52 = vrot.slane %v5687_v19, 9  ;;  %v4405_v54 = vrot.slane %v7897_v24, 5  ;;  %v4408_v27 = vrot.slane %v7949_v15, 5  ;;  %v3948_v22 = vshll.u32 %v8255_v39, 16  ;;  %v5690_v19 = vld [vmem:[%s7030_s13 + $0x78] sm:$0xe] }
 0x10c   : > { %v3952_v33 = vshrl.u32 %v8255_v39, 16  ;;  %v8272_v0 = vsel %vm7282_vm7, %v5702_v1, %v4398_v29  ;;  %v4400_v38 = vrot.slane %v4398_v29, 4  ;;  %v8940_v59 = vcombine.low %v8011_v36, %v8939_v23  ;;  %v8944_v23 = vld [vmem:[#allocation20_spill] sm:$0xff] }
 0x10d   : > { %v8279_v24 = vcombine.low %v3903_v6, %v3913_v62  ;;  %v8283_v15 = vsel %vm7282_vm7, %v5703_v52, %v4405_v54  ;;  %v5704_v61 = vrot.slane %v5688_v4, 9  ;;  %v4412_v20 = vrot.slane %v8941_v18, 5  ;;  %v6727_v6 = vld [vmem:[%s7030_s13 + $0xc] sm:$0xff]  }
 0x10e   : > { %v8289_v36 = vsel %vm7282_vm7, %v4400_v38, %v4401_v26  ;;  %v4415_v51 = vrot.slane %v8942_v31, 5  ;;  %v5705_v37 = vrot.slane %v5689_v53, 9  ;;  %v4419_v11 = vrot.slane %v8943_v9, 5 }
 0x10f   : > { %6318 = vmatmul.mubr.msk.bf16.gmra.mrb[8].mxu0 %vm701_vm3, %v8057_v30  ;;  %v4407_v30 = vrot.slane %v4405_v54, 4  ;;  %v5719_v10 = vcombine.low %v8272_v0, %v8289_v36  ;;  %v4422_v46 = vrot.slane %v8107_v45, 5  ;;  %v8313_v14 = vsel %vm7282_vm7, %v5704_v61, %v4412_v20 }
 0x110   : > { %6164 = vmatmul.mubr.msk.bf16.gmra.mrb[24].mxu1 %vm701_vm3, %v8940_v59  ;;  %6321 = vmatprep.mubr.msk.bf16.mxu0 %vm701_vm3, %v5656_v40  ;;  %v4414_v28 = vrot.slane %v4412_v20, 4  ;;  %v8315_v21 = vrot.slane %v3939_v55, 4  ;;  %v3963_v47 = vshrl.u32 %v5643_v63, 16  ;;  %v8319_v45 = vsel %vm7282_vm7, %v5705_v37, %v4419_v11  ;;  %v5417_v55 = vld [vmem:[%s7030_s13 + $0x78] sm:$0xf]  ;;  %v8945_v59 = vld [vmem:[#allocation23_spill] sm:$0xff] }
 0x111   : > { %6167 = vmatprep.mubr.msk.bf16.mxu1 %vm701_vm3, %v5307_v12  ;;  %v8297_v60 = vsel %vm7282_vm7, %v4407_v30, %v4408_v27  ;;  %v8301_v12 = vrot.slane %v3921_v8, 4  ;;  %v4421_v1 = vrot.slane %v4419_v11, 4  ;;  %v8323_v8 = vrot.slane %v3931_v50, 4 }
 0x112   : > { %v5720_v40 = vcombine.low %v8283_v15, %v8297_v60  ;;  %v8325_v62 = vrot.slane %v3942_v49, 5  ;;  %v3966_v29 = vshll.u32 %v5643_v63, 16  ;;  %v8329_v26 = vsel %vm7282_vm7, %v4414_v28, %v4415_v51  ;;  %v8948_v28 = vld [vmem:[#allocation21_spill] sm:$0xff] }
 0x113   : > { %v8332_v4 = vrot.slane %v3948_v22, 5  ;;  %v8334_v52 = vrot.slane %v3952_v33, 4  ;;  %v5721_v54 = vcombine.low %v8313_v14, %v8329_v26  ;;  %v8340_v27 = vsel %vm7282_vm7, %v4421_v1, %v4422_v46  ;;  %v5691_v33 = vld [vmem:[%s7030_s13 + $0x84] sm:$0xe]  ;;  %v6728_v1 = vld [vmem:[%s7030_s13 + $0x18] sm:$0xff]  }
 0x114   : > { %v3958_v49 = vshll.u32 %v8304_v35, 16  ;;  %v3972_v50 = vshll.u32 %v8307_v58, 16  ;;  %v5722_v53 = vcombine.low %v8319_v45, %v8340_v27  ;;  %v5706_v22 = vrot.slane %v5690_v19, 9  ;;  %v6790_v60 = vld [vmem:[%s7030_s13 + $0xa0] sm:$0xf] }
 0x115   : > { %v3965_v38 = vrot.slane %v3963_v47, 4  ;;  %v4429_v30 = vrot.slane %v8945_v59, 5  ;;  %v2288_v61 = vshrl.u32 %v5417_v55, 16  ;;  %v3968_v63 = vrot.slane %v3966_v29, 5  ;;  %v5646_v29 = vld [vmem:[%s7030_s13 + $0xcc] sm:$0xf] }
 0x116   : > { %v3976_v18 = vshrl.u32 %v8307_v58, 16  ;;  %v2291_v43 = vshll.u32 %v5417_v55, 16  ;;  %v5707_v37 = vrot.slane %v5691_v33, 9  ;;  %v3927_v9 = vsel %vm7056_vm4, %v8301_v12, %v8240_v42  ;;  %v8383_v55 = vld [vmem:[%s7030_s13 + $0xd0] sm:$0xf] }
 0x117   : > { %6322 = vmatmul.mubr.msk.bf16.gmra.mrb[12].mxu0 %vm701_vm3, %v8238_v44  ;;  %v4426_v44 = vrot.slane %v8944_v23, 5  ;;  %v2290_v51 = vrot.slane %v2288_v61, 4  ;;  %v3945_v11 = vor.u32 %v8325_v62, %v8315_v21  ;;  %v4433_v47 = vrot.slane %v8948_v28, 5  ;;  %v6729_v21 = vld [vmem:[%s7030_s13 + $0x24] sm:$0xff]   ;;  %v6794_v27 = vld [vmem:[%s7030_s13 + $0xac] sm:$0xf] }
 0x118   : > { %6168 = vmatmul.mubr.msk.bf16.gmra.mrb[28].mxu1 %vm701_vm3, %v5308_v56  ;;  %6325 = vmatprep.mubr.msk.bf16.mxu0 %vm701_vm3, %v8242_v41  ;;  %v8947_v56 = vld [vmem:[#allocation12_spill] sm:$0xff]  ;;  %v2293_v46 = vrot.slane %v2291_v43, 5  ;;  %v3937_v19 = vsel %vm7056_vm4, %v8323_v8, %v8252_v17  ;;  %v4436_v12 = vrot.slane %v8135_v2, 5  ;;  %v8391_v62 = vrot.slane %v3972_v50, 5  ;;  %v5692_v8 = vld [vmem:[%s7030_s13 + $0x90] sm:$0xe] }
 0x119   : > { %6173 = vmatprep.mubr.msk.bf16.mxu1 %vm701_vm3, %v6727_v6  ;;  %v2310_v41 = vsel %vm7056_vm4, %v8947_v56, %v8946_v16  ;;  %v8365_v20 = vsel %vm7282_vm7, %v5706_v22, %v4426_v44  ;;  %v4428_v31 = vrot.slane %v4426_v44, 4  ;;  %v3955_v6 = vor.u32 %v8334_v52, %v8332_v4  ;;  %v8397_v52 = vld [vmem:[%s7030_s13 + $0xc8] sm:$0x1]  ;;  %v8950_v16 = vld [vmem:[#allocation9_spill] sm:$0xff] }
 0x11a   : > { %v3978_v22 = vrot.slane %v3976_v18, 4  ;;  %v2294_v17 = vor.u32 %v2293_v46, %v2290_v51  ;;  %v3960_v23 = vrot.slane %v3958_v49, 5  ;;  %v3969_v44 = vor.u32 %v3968_v63, %v3965_v38  ;;  %v8951_v51 = vld [vmem:[#allocation10_spill] sm:$0xff] }
 0x11b   : > { %v8387_v42 = vsel %vm7282_vm7, %v4428_v31, %v4429_v30  ;;  %v8401_v59 = vsel %vm7282_vm7, %v5707_v37, %v4433_v47  ;;  %v4435_v30 = vrot.slane %v4433_v47, 4  ;;  %v3987_v2 = vshrl.u32 %v5646_v29, 16 }
 0x11c   : > { %v5723_v33 = vcombine.low %v8365_v20, %v8387_v42  ;;  %v3990_v50 = vshll.u32 %v5646_v29, 16  ;;  %v3996_v61 = vshll.u32 %v8383_v55, 16  ;;  %v2295_v18 = vrot.slane %v2294_v17, 4  ;;  %v6730_v29 = vld [vmem:[%s7030_s13 + $0x30] sm:$0xff]  }
 0x11d   : > { %v4000_v49 = vshrl.u32 %v8383_v55, 16  ;;  %v8412_v38 = vsel %vm7282_vm7, %v4435_v30, %v4436_v12  ;;  %v5708_v63 = vrot.slane %v5692_v8, 9  ;;  %v3979_v56 = vor.u32 %v3978_v22, %v8391_v62 }
 0x11e   : > { %v3982_v31 = vshll.u32 %v8397_v52, 16  ;;  %v5724_v37 = vcombine.low %v8401_v59, %v8412_v38  ;;  %v5662_v46 = vcombine.low %v3927_v9, %v3937_v19  ;;  %v3946_v28 = vrot.slane %v3945_v11, 4  ;;  %v5693_v11 = vld [vmem:[%s7030_s13 + $0x9c] sm:$0xe] }
 0x11f   : > { %6326 = vmatmul.mubr.msk.bf16.gmra.mrb[16].mxu0 %vm701_vm3, %v8244_v5  ;;  %v8949_v5 = vld [vmem:[#allocation22_spill] sm:$0xff]  ;;  %v3956_v47 = vrot.slane %v3955_v6, 4  ;;  %v3970_v12 = vrot.slane %v3969_v44, 4  ;;  %v4443_v8 = vrot.slane %v8144_v3, 5  ;;  %v3989_v30 = vrot.slane %v3987_v2, 4  ;;  %v6731_v19 = vld [vmem:[%s7030_s13 + $0x3c] sm:$0xff]  }
 0x120   : > { %6174 = vmatmul.mubr.msk.bf16.vlgmr.msra.gmra.mrb[0].mxu1 %vm701_vm3, %v6728_v1  ;;  %6329 = vmatprep.mubr.msk.bf16.mxu0 %vm701_vm3, %v8246_v7  ;;  %v4440_v43 = vrot.slane %v8949_v5, 5  ;;  %v2300_v7 = vsel %vm7056_vm4, %v2295_v18, %v8951_v51  ;;  %v3992_v18 = vrot.slane %v3990_v50, 5  ;;  %v8435_v5 = vrot.slane %v3996_v61, 5 }
 0x121   : > { %6376 = vmatpush3.bf16.msra.mxu1 %v8950_v16  ;;  %6177 = vmatprep.mubr.msk.bf16.mxu1 %vm701_vm3, %v6729_v21  ;;  %v8424_v1 = vcombine.low %v2300_v7, %v2310_v41  ;;  %v8428_v21 = vld [vmem:[%s7030_s13 + $0xd4] sm:$0x1]  ;;  %v4002_v9 = vrot.slane %v4000_v49, 4  ;;  %v3980_v41 = vrot.slane %v3979_v56, 4  ;;  %v3984_v6 = vrot.slane %v3982_v31, 5 }
 0x122   : > { %v8432_v22 = vsel %vm7282_vm7, %v5708_v63, %v4440_v43  ;;  %v4442_v17 = vrot.slane %v4440_v43, 4  ;;  %v3951_v63 = vsel %vm7056_vm4, %v3946_v28, %v8332_v4  ;;  %v3961_v2 = vsel %vm7056_vm4, %v3956_v47, %v3960_v23  ;;  %v6781_v16 = vld [vmem:[%s7030_s13 + $0x1c] sm:$0xf]  ;;  %v5694_v28 = vld [vmem:[%s7030_s13 + $0xa8] sm:$0xe] }
 0x123   : > { %v4006_v50 = vshll.u32 %v8428_v21, 16  ;;  %v5709_v61 = vrot.slane %v5693_v11, 9  ;;  %v4447_v49 = vrot.slane %v8132_v25, 5  ;;  %v3975_v4 = vsel %vm7056_vm4, %v3970_v12, %v8391_v62  ;;  %v5682_v62 = vld [vmem:[%s7030_s13 + $0x18] sm:$0xe]  ;;  %v6732_v47 = vld [vmem:[%s7030_s13 + $0x48] sm:$0xff]  }
 0x124   : > { %v8441_v44 = vsel %vm7282_vm7, %v4442_v17, %v4443_v8  ;;  %v4003_v43 = vor.u32 %v4002_v9, %v8435_v5  ;;  %v4450_v23 = vrot.slane %v8177_v57, 5  ;;  %v3985_v25 = vsel %vm7056_vm4, %v3980_v41, %v3984_v6  ;;  %v6782_v11 = vld [vmem:[%s7030_s13 + $0x20] sm:$0x1] }
 0x125   : > { %v5725_v3 = vcombine.low %v8432_v22, %v8441_v44  ;;  %v4370_v56 = vrot.slane %v6781_v16, 5  ;;  %v8467_v31 = vsel %vm7282_vm7, %v5709_v61, %v4447_v49  ;;  %v4449_v51 = vrot.slane %v4447_v49, 4  ;;  %v5695_v49 = vld [vmem:[%s7030_s13 + $0xb4] sm:$0xe] }
 0x126   : > { %v5663_v7 = vcombine.low %v3951_v63, %v3961_v2  ;;  %v4004_v17 = vrot.slane %v4003_v43, 4  ;;  %v5710_v41 = vrot.slane %v5694_v28, 9  ;;  %v4454_v6 = vrot.slane %v8180_v34, 5  ;;  %v5683_v2 = vld [vmem:[%s7030_s13 + $0x24] sm:$0xe] }
 0x127   : > { %6330 = vmatmul.mubr.msk.bf16.gmra.mrb[20].mxu0 %vm701_vm3, %v8279_v24  ;;  %v3993_v24 = vor.u32 %v3992_v18, %v3989_v30  ;;  %v8472_v57 = vsel %vm7282_vm7, %v4449_v51, %v4450_v23  ;;  %v6733_v30 = vld [vmem:[%s7030_s13 + $0x54] sm:$0xff]   ;;  %v5698_v18 = vrot.slane %v5682_v62, 9  ;;  %v4372_v9 = vrot.slane %v4370_v56, 4  ;;  %v6785_v28 = vld [vmem:[%s7030_s13 + $0x2c] sm:$0x1] }
 0x128   : > { %6178 = vmatmul.mubr.msk.bf16.gmra.mrb[4].mxu1 %vm701_vm3, %v6730_v29  ;;  %6333 = vmatprep.mubr.msk.bf16.mxu0 %vm701_vm3, %v5662_v46  ;;  %v4008_v46 = vrot.slane %v4006_v50, 5  ;;  %v5664_v29 = vcombine.low %v3975_v4, %v3985_v25  ;;  %v5726_v8 = vcombine.low %v8467_v31, %v8472_v57  ;;  %v4457_v63 = vrot.slane %v8190_v48, 5  ;;  %v6783_v50 = vld [vmem:[%s7030_s13 + $0x28] sm:$0xf]  ;;  %v5684_v25 = vld [vmem:[%s7030_s13 + $0x30] sm:$0xe] }
 0x129   : > { %6181 = vmatprep.mubr.msk.bf16.mxu1 %vm701_vm3, %v6731_v19  ;;  %v3994_v12 = vrot.slane %v3993_v24, 4  ;;  %v4373_v19 = vrot.slane %v6782_v11, 5  ;;  %v4377_v61 = vrot.slane %v6783_v50, 5  ;;  %v8495_v48 = vsel %vm7282_vm7, %v5710_v41, %v4454_v6  ;;  %v6735_v11 = vld [vmem:[%s7030_s13 + $0x6c] sm:$0xff]   ;;  %v8952_v41 = vld [vmem:[#allocation13_spill] sm:$0xff] }
 0x12a   : > { %v4009_v34 = vsel %vm7056_vm4, %v4004_v17, %v4008_v46  ;;  %v4456_v24 = vrot.slane %v4454_v6, 4  ;;  %v4371_v43 = vsel %vm7282_vm7, %v5698_v18, %v4370_v56  ;;  %v5699_v51 = vrot.slane %v5683_v2, 9  ;;  %v5696_v50 = vld [vmem:[%s7030_s13 + $0xc0] sm:$0xe]  ;;  %v6799_v31 = vld [vmem:[%s7030_s13 + $0xc8] sm:$0x1] }
 0x12b   : > { %v3999_v4 = vsel %vm7056_vm4, %v3994_v12, %v8435_v5  ;;  %v4374_v23 = vsel %vm7282_vm7, %v4372_v9, %v4373_v19  ;;  %v6784_v5 = vld [vmem:[%s7030_s13 + $0x34] sm:$0xf]  ;;  %v6734_v12 = vld [vmem:[%s7030_s13 + $0x60] sm:$0xff]   ;;  %v5700_v18 = vrot.slane %v5684_v25, 9  ;;  %v4464_v9 = vrot.slane %v8304_v35, 5 }
 0x12c   : > { %v4384_v16 = vrot.slane %v6784_v5, 5  ;;  %v8506_v62 = vsel %vm7282_vm7, %v4456_v24, %v4457_v63  ;;  %v5665_v46 = vcombine.low %v3999_v4, %v4009_v34  ;;  %v5715_v17 = vcombine.low %v4371_v43, %v4374_v23  ;;  %v5685_v24 = vld [vmem:[%s7030_s13 + $0x3c] sm:$0xe] }
 0x12d   : > { %v5727_v56 = vcombine.low %v8495_v48, %v8506_v62  ;;  %v4387_v6 = vrot.slane %v8952_v41, 5  ;;  %v4378_v35 = vsel %vm7282_vm7, %v5699_v51, %v4377_v61  ;;  %v5712_v5 = vrot.slane %v5696_v50, 9 }
 0x12e   : > { %v4386_v19 = vrot.slane %v4384_v16, 4  ;;  %v4385_v23 = vsel %vm7282_vm7, %v5700_v18, %v4384_v16  ;;  %v4471_v51 = vrot.slane %v8397_v52, 5  ;;  %v2451_v57 = vshll.u32 %v6799_v31, 16 }
 0x12f   : > { %6334 = vmatmul.mubr.msk.bf16.gmra.mrb[24].mxu0 %vm701_vm3, %v5663_v7  ;;  %v5711_v7 = vrot.slane %v5695_v49, 9 }
 0x130   : > { %6182 = vmatmul.mubr.msk.bf16.gmra.mrb[8].mxu1 %vm701_vm3, %v6732_v47  ;;  %6337 = vmatprep.mubr.msk.bf16.mxu0 %vm701_vm3, %v5664_v29  ;;  %v4380_v47 = vrot.slane %v6785_v28, 5  ;;  %v4461_v29 = vrot.slane %v8255_v39, 5  ;;  %v8953_v39 = vld [vmem:[#allocation14_spill] sm:$0xff]  ;;  %v4388_v25 = vsel %vm7282_vm7, %v4386_v19, %v4387_v6  ;;  %v5701_v28 = vrot.slane %v5685_v24, 9 }
 0x131   : > { %6185 = vmatprep.mubr.msk.bf16.mxu1 %vm701_vm3, %v6733_v30  ;;  %v4379_v30 = vrot.slane %v4377_v61, 4  ;;  %v4391_v49 = vrot.slane %v8953_v39, 5  ;;  %v4468_v61 = vrot.slane %v8307_v58, 5  ;;  %v6786_v39 = vld [vmem:[%s7030_s13 + $0x70] sm:$0xf]  ;;  %v4475_v24 = vrot.slane %v8383_v55, 5 }
 0x132   : > { %v8518_v63 = vsel %vm7282_vm7, %v5711_v7, %v4461_v29  ;;  %v4463_v2 = vrot.slane %v4461_v29, 4  ;;  %v5414_v7 = vld [vmem:[%s7030_s13 + $0x6c] sm:$0xf]  ;;  %v8954_v29 = vld [vmem:[#allocation15_spill] sm:$0xff] }
 0x133   : > { %v4381_v34 = vsel %vm7282_vm7, %v4379_v30, %v4380_v47  ;;  %v4393_v47 = vrot.slane %v4391_v49, 4  ;;  %v6736_v30 = vld [vmem:[%s7030_s13 + $0x78] sm:$0xff]   ;;  %v8549_v16 = vsel %vm7282_vm7, %v5712_v5, %v4468_v61  ;;  %v4470_v18 = vrot.slane %v4468_v61, 4 }
 0x134   : > { %v8525_v4 = vsel %vm7282_vm7, %v4463_v2, %v4464_v9  ;;  %v5717_v9 = vcombine.low %v4385_v23, %v4388_v25  ;;  %v2264_v19 = vshrl.u32 %v5414_v7, 16  ;;  %v2267_v41 = vshll.u32 %v5414_v7, 16 }
 0x135   : > { %v5728_v43 = vcombine.low %v8518_v63, %v8525_v4  ;;  %v8554_v58 = vsel %vm7282_vm7, %v4470_v18, %v4471_v51  ;;  %v4392_v6 = vsel %vm7282_vm7, %v5701_v28, %v4391_v49  ;;  %v4478_v49 = vrot.slane %v8428_v21, 5  ;;  %v6738_v51 = vld [vmem:[%s7030_s13 + $0x90] sm:$0xff]   ;;  %v6739_v21 = vld [vmem:[%s7030_s13 + $0x9c] sm:$0xff]  }
 0x136   : > { %v5729_v50 = vcombine.low %v8549_v16, %v8554_v58  ;;  %v2266_v23 = vrot.slane %v2264_v19, 4  ;;  %v2269_v25 = vrot.slane %v2267_v41, 5  ;;  %v4477_v7 = vrot.slane %v4475_v24, 4 }
 0x137   : > { %6338 = vmatmul.mubr.msk.bf16.gmra.mrb[28].mxu0 %vm701_vm3, %v5665_v46  ;;  %v5716_v46 = vcombine.low %v4378_v35, %v4381_v34  ;;  %v2273_v35 = vshll.u32 %v6786_v39, 16  ;;  %v2277_v34 = vshrl.u32 %v6786_v39, 16 }
 0x138   : > { %6186 = vmatmul.mubr.msk.bf16.gmra.mrb[12].mxu1 %vm701_vm3, %v6734_v12  ;;  %6343 = vmatprep.mubr.msk.bf16.mxu0 %vm701_vm3, %v5715_v17  ;;  %v4394_v12 = vrot.slane %v8954_v29, 5  ;;  %v5697_v17 = vld [vmem:[%s7030_s13 + $0xcc] sm:$0xe]  ;;  %v8576_v55 = vsel %vm7282_vm7, %v4477_v7, %v4478_v49 }
 0x139   : > { %6189 = vmatprep.mubr.msk.bf16.mxu1 %vm701_vm3, %v6735_v11  ;;  %v6737_v11 = vld [vmem:[%s7030_s13 + $0x84] sm:$0xff]   ;;  %v5713_v52 = vrot.slane %v5697_v17, 9  ;;  %v2279_v28 = vrot.slane %v2277_v34, 4  ;;  %v6787_v17 = vld [vmem:[%s7030_s13 + $0x74] sm:$0x1] }
 0x13a   : > { %v4395_v2 = vsel %vm7282_vm7, %v4393_v47, %v4394_v12  ;;  %v5420_v47 = vld [vmem:[%s7030_s13 + $0x84] sm:$0xf]  ;;  %v2270_v12 = vor.u32 %v2269_v25, %v2266_v23  ;;  %v6741_v34 = vld [vmem:[%s7030_s13 + $0xb4] sm:$0xff]  }
 0x13b   : > { %v8571_v5 = vsel %vm7282_vm7, %v5713_v52, %v4475_v24  ;;  %v5718_v61 = vcombine.low %v4392_v6, %v4395_v2  ;;  %v2315_v18 = vshll.u32 %v5420_v47, 16  ;;  %v5423_v6 = vld [vmem:[%s7030_s13 + $0x90] sm:$0xf]  ;;  %v6740_v2 = vld [vmem:[%s7030_s13 + $0xa8] sm:$0xff]  }
 0x13c   : > { %v5730_v29 = vcombine.low %v8571_v5, %v8576_v55  ;;  %v2271_v52 = vrot.slane %v2270_v12, 4  ;;  %v2336_v23 = vshrl.u32 %v5423_v6, 16  ;;  %v2339_v25 = vshll.u32 %v5423_v6, 16 }
 0x13d   : > { %v2369_v12 = vshll.u32 %v6790_v60, 16 }
 0x13e   : > { %v2341_v14 = vrot.slane %v2339_v25, 5  ;;  %v6793_v25 = vld [vmem:[%s7030_s13 + $0xa4] sm:$0x1] }
 0x13f   : > { %6344 = vmatmul.mubr.msk.bf16.vlgmr.msra.gmra.mrb[0].mxu0 %vm701_vm3, %v5716_v46  ;;  %v2275_v46 = vrot.slane %v2273_v35, 5  ;;  %v5426_v35 = vld [vmem:[%s7030_s13 + $0x9c] sm:$0xf]  ;;  %v8618_v6 = vrot.slane %v2369_v12, 5 }
 0x140   : > { %6190 = vmatmul.mubr.msk.bf16.gmra.mrb[16].mxu1 %vm701_vm3, %v6736_v30  ;;  %6347 = vmatprep.mubr.msk.bf16.mxu0 %vm701_vm3, %v5717_v9  ;;  %v2283_v30 = vshll.u32 %v6787_v17, 16  ;;  %v2312_v9 = vshrl.u32 %v5420_v47, 16  ;;  %v2363_v47 = vshll.u32 %v5426_v35, 16  ;;  %v6791_v17 = vld [vmem:[%s7030_s13 + $0x8c] sm:$0x1] }
 0x141   : > { %6193 = vmatprep.mubr.msk.bf16.mxu1 %vm701_vm3, %v6737_v11  ;;  %v2280_v13 = vor.u32 %v2279_v28, %v2275_v46  ;;  %v6788_v11 = vld [vmem:[%s7030_s13 + $0x88] sm:$0xf]  ;;  %v2276_v7 = vsel %vm7056_vm4, %v2271_v52, %v2275_v46 }
 0x142   : > { %v2321_v19 = vshll.u32 %v6788_v11, 16  ;;  %v2325_v41 = vshrl.u32 %v6788_v11, 16  ;;  %v2285_v0 = vrot.slane %v2283_v30, 5  ;;  %v2314_v36 = vrot.slane %v2312_v9, 4 }
 0x143   : > { %v2281_v39 = vrot.slane %v2280_v13, 4  ;;  %v2331_v30 = vshll.u32 %v6791_v17, 16  ;;  %v2338_v9 = vrot.slane %v2336_v23, 4  ;;  %v2365_v11 = vrot.slane %v2363_v47, 5 }
 0x144   : > { %v8595_v24 = vrot.slane %v2321_v19, 5  ;;  %v2327_v49 = vrot.slane %v2325_v41, 4  ;;  %v6742_v19 = vld [vmem:[%s7030_s13 + $0xc0] sm:$0xff]  }
 0x145   : > { %v2286_v46 = vsel %vm7056_vm4, %v2281_v39, %v2285_v0  ;;  %v5429_v39 = vld [vmem:[%s7030_s13 + $0xa8] sm:$0xf] }
 0x146   : > { %v2328_v13 = vor.u32 %v2327_v49, %v8595_v24  ;;  %v5447_v41 = vcombine.low %v2276_v7, %v2286_v46  ;;  %v2379_v7 = vshll.u32 %v6793_v25, 16  ;;  %v2387_v45 = vshll.u32 %v5429_v39, 16 }
 0x147   : > { %6348 = vmatmul.mubr.msk.bf16.gmra.mrb[4].mxu0 %vm701_vm3, %v5718_v61  ;;  %v6789_v61 = vld [vmem:[%s7030_s13 + $0x94] sm:$0xf] }
 0x148   : > { %6194 = vmatmul.mubr.msk.bf16.gmra.mrb[20].mxu1 %vm701_vm3, %v6738_v51  ;;  %6351 = vmatprep.mubr.msk.bf16.mxu0 %vm701_vm3, %v5719_v10  ;;  %v2317_v10 = vrot.slane %v2315_v18, 5  ;;  %v2345_v51 = vshll.u32 %v6789_v61, 16  ;;  %v2349_v28 = vshrl.u32 %v6789_v61, 16  ;;  %v2329_v0 = vrot.slane %v2328_v13, 4 }
 0x149   : > { %6197 = vmatprep.mubr.msk.bf16.mxu1 %vm701_vm3, %v6739_v21  ;;  %v2360_v21 = vshrl.u32 %v5426_v35, 16  ;;  %v6792_v35 = vld [vmem:[%s7030_s13 + $0x98] sm:$0x1]  ;;  %v2384_v61 = vshrl.u32 %v5429_v39, 16  ;;  %v5435_v39 = vld [vmem:[%s7030_s13 + $0xc0] sm:$0xf] }
 0x14a   : > { %v2318_v15 = vor.u32 %v2317_v10, %v2314_v36  ;;  %v8615_v26 = vrot.slane %v2345_v51, 5  ;;  %v2333_v36 = vrot.slane %v2331_v30, 5  ;;  %v2342_v10 = vor.u32 %v2341_v14, %v2338_v9  ;;  %v5432_v51 = vld [vmem:[%s7030_s13 + $0xb4] sm:$0xf] }
 0x14b   : > { %v2362_v18 = vrot.slane %v2360_v21, 4  ;;  %v2397_v21 = vshrl.u32 %v6794_v27, 16  ;;  %v2408_v20 = vshrl.u32 %v5432_v51, 16  ;;  %v2411_v42 = vshll.u32 %v5432_v51, 16 }
 0x14c   : > { %v2319_v52 = vrot.slane %v2318_v15, 4  ;;  %v2334_v46 = vsel %vm7056_vm4, %v2329_v0, %v2333_v36  ;;  %v2343_v15 = vrot.slane %v2342_v10, 4  ;;  %v2381_v30 = vrot.slane %v2379_v7, 5 }
 0x14d   : > { %v2366_v23 = vor.u32 %v2365_v11, %v2362_v18  ;;  %v2386_v9 = vrot.slane %v2384_v61, 4  ;;  %v2399_v11 = vrot.slane %v2397_v21, 4  ;;  %v6798_v61 = vld [vmem:[%s7030_s13 + $0xbc] sm:$0x1] }
 0x14e   : > { %v2324_v47 = vsel %vm7056_vm4, %v2319_v52, %v8595_v24  ;;  %v2348_v0 = vsel %vm7056_vm4, %v2343_v15, %v8615_v26  ;;  %v2427_v22 = vshll.u32 %v6798_v61, 16 }
 0x14f   : > { %6352 = vmatmul.mubr.msk.bf16.gmra.mrb[8].mxu0 %vm701_vm3, %v5720_v40  ;;  %v2373_v40 = vshrl.u32 %v6790_v60, 16  ;;  %v2367_v17 = vrot.slane %v2366_v23, 4  ;;  %v5449_v24 = vcombine.low %v2324_v47, %v2334_v46 }
 0x150   : > { %6198 = vmatmul.mubr.msk.bf16.gmra.mrb[24].mxu1 %vm701_vm3, %v6740_v2  ;;  %6355 = vmatprep.mubr.msk.bf16.mxu0 %vm701_vm3, %v5721_v54  ;;  %v2351_v54 = vrot.slane %v2349_v28, 4 }
 0x151   : > { %6201 = vmatprep.mubr.msk.bf16.mxu1 %vm701_vm3, %v6741_v34  ;;  %v2375_v2 = vrot.slane %v2373_v40, 4  ;;  %v2355_v34 = vshll.u32 %v6792_v35, 16  ;;  %v2372_v10 = vsel %vm7056_vm4, %v2367_v17, %v8618_v6  ;;  %v2453_v17 = vrot.slane %v2451_v57, 5 }
 0x152   : > { %v2352_v49 = vor.u32 %v2351_v54, %v8615_v26  ;;  %v2389_v54 = vrot.slane %v2387_v45, 5  ;;  %v6796_v26 = vld [vmem:[%s7030_s13 + $0xb0] sm:$0x1] }
 0x153   : > { %v2376_v28 = vor.u32 %v2375_v2, %v8618_v6  ;;  %v2357_v60 = vrot.slane %v2355_v34, 5  ;;  %v2403_v35 = vshll.u32 %v6796_v26, 16  ;;  %v2432_v34 = vshrl.u32 %v5435_v39, 16 }
 0x154   : > { %v2353_v13 = vrot.slane %v2352_v49, 4  ;;  %v2390_v38 = vor.u32 %v2389_v54, %v2386_v9  ;;  %v2435_v6 = vshll.u32 %v5435_v39, 16  ;;  %v6797_v49 = vld [vmem:[%s7030_s13 + $0xc4] sm:$0xf] }
 0x155   : > { %v2377_v14 = vrot.slane %v2376_v28, 4  ;;  %v2441_v23 = vshll.u32 %v6797_v49, 16  ;;  %v2445_v25 = vshrl.u32 %v6797_v49, 16  ;;  %v2405_v45 = vrot.slane %v2403_v35, 5 }
 0x156   : > { %v2358_v36 = vsel %vm7056_vm4, %v2353_v13, %v2357_v60  ;;  %v2391_v51 = vrot.slane %v2390_v38, 4  ;;  %v2429_v60 = vrot.slane %v2427_v22, 5 }
 0x157   : > { %6356 = vmatmul.mubr.msk.bf16.gmra.mrb[12].mxu0 %vm701_vm3, %v5722_v53  ;;  %v2393_v53 = vshll.u32 %v6794_v27, 16  ;;  %v2382_v59 = vsel %vm7056_vm4, %v2377_v14, %v2381_v30  ;;  %v5450_v44 = vcombine.low %v2348_v0, %v2358_v36  ;;  %v2434_v27 = vrot.slane %v2432_v34, 4 }
 0x158   : > { %6202 = vmatmul.mubr.msk.bf16.gmra.mrb[28].mxu1 %vm701_vm3, %v6742_v19  ;;  %6359 = vmatprep.mubr.msk.bf16.mxu0 %vm701_vm3, %v5723_v33  ;;  %v6795_v33 = vld [vmem:[%s7030_s13 + $0xb8] sm:$0xf]  ;;  %v2410_v19 = vrot.slane %v2408_v20, 4  ;;  %v2443_v21 = vrot.slane %v2441_v23, 5  ;;  %v2447_v47 = vrot.slane %v2445_v25, 4  ;;  %s5207_s13 = sshll.u32 %s8717_s12, 7 }
 0x159   : > { %6223 = vmatprep.mubr.msk.bf16.mxu1 %vm701_vm3, %v5447_v41  ;;  %v2417_v12 = vshll.u32 %v6795_v33, 16  ;;  %v2421_v40 = vshrl.u32 %v6795_v33, 16  ;;  %v2395_v18 = vrot.slane %v2393_v53, 5  ;;  %v2413_v41 = vrot.slane %v2411_v42, 5  ;;  %s8720_s14 = scalar_lea.vmem [#allocation2], %s5207_s13 }
 0x15a   : > { %v2437_v53 = vrot.slane %v2435_v6, 5  ;;  %s5054_s27 = sshll.u32 %s8720_s14, 4  ;;  %s8750_s27 = int_to_ptr.vmem [resolvable:$true] %s5054_s27 }
 0x15b   : > { %v2419_v52 = vrot.slane %v2417_v12, 5  ;;  %v2423_v2 = vrot.slane %v2421_v40, 4  ;;  %v2396_v20 = vsel %vm7056_vm4, %v2391_v51, %v2395_v18  ;;  %v2448_v12 = vor.u32 %v2447_v47, %v2443_v21  ;;  %s6800_s13 = scalar_lea.vmem %s8750_s27, 2048  ;;  %p6807_p0 = scmp.lt.s32.totalorder %s8750_s27, %s6805_s29 }
 0x15c   : > { %v2438_v33 = vor.u32 %v2437_v53, %v2434_v27  ;;  %p6801_p11 = scmp.ne.s32.totalorder %s8750_s27, %s6800_s13  ;;  %p6808_p1 = scmp.lt.s32.totalorder %s6806_s30, %s6800_s13 }
 0x15d   : > { %v2424_v7 = vor.u32 %v2423_v2, %v2419_v52  ;;  %v2449_v13 = vrot.slane %v2448_v12, 4 }
 0x15e   : > { %v2439_v40 = vrot.slane %v2438_v33, 4  ;;  %p6802_p12 = pnand %p6801_p11, %p6994_p5  ;;  %p6809_p2 = por %p6808_p1, %p6807_p0 }
 0x15f   : > { %6360 = vmatmul.mubr.msk.bf16.gmra.mrb[16].mxu0 %vm701_vm3, %v5724_v37  ;;  %v2400_v37 = vor.u32 %v2399_v11, %v2395_v18  ;;  %v2425_v15 = vrot.slane %v2424_v7, 4  ;;  %v2454_v9 = vsel %vm7056_vm4, %v2449_v13, %v2453_v17 }
 0x160   : > { %6224 = vmatmul.mubr.msk.bf16.vlgmr.msra.gmra.mrb[16].mxu1 %vm701_vm3, %v8424_v1  ;;  %6363 = vmatprep.mubr.msk.bf16.mxu0 %vm701_vm3, %v5725_v3  ;;  %v2414_v1 = vor.u32 %v2413_v41, %v2410_v19  ;;  %v5451_v3 = vcombine.low %v2372_v10, %v2382_v59  ;;  %v2444_v30 = vsel %vm7056_vm4, %v2439_v40, %v2443_v21  ;;  %p6803_p13 = pneg %p6802_p12 }
 0x161   : > { %6227 = vmatprep.mubr.msk.bf16.mxu1 %vm701_vm3, %v5449_v24  ;;  %v2401_v28 = vrot.slane %v2400_v37, 4  ;;  %v2430_v48 = vsel %vm7056_vm4, %v2425_v15, %v2429_v60  ;;  %v5454_v14 = vcombine.low %v2444_v30, %v2454_v9 }
 0x162   : > { %v2415_v46 = vrot.slane %v2414_v1, 4  ;;  %p6810_p3 = pnand %p6809_p2, %p6803_p13 }
 0x163   : > { %v2406_v42 = vsel %vm7056_vm4, %v2401_v28, %v2405_v45 }
 0x164   : > { %v5452_v62 = vcombine.low %v2396_v20, %v2406_v42 }
 0x167   : > { %6364 = vmatmul.mubr.msk.bf16.gmra.mrb[20].mxu0 %vm701_vm3, %v5726_v8  ;;  %v2420_v8 = vsel %vm7056_vm4, %v2415_v46, %v2419_v52 }
 0x168   : > { %6228 = vmatmul.mubr.msk.bf16.gmra.mrb[20].mxu1 %vm701_vm3, %v5450_v44  ;;  %6367 = vmatprep.mubr.msk.bf16.mxu0 %vm701_vm3, %v5727_v56  ;;  %v5453_v56 = vcombine.low %v2420_v8, %v2430_v48 }
 0x169   : > { %6231 = vmatprep.mubr.msk.bf16.mxu1 %vm701_vm3, %v5451_v3 }
 0x16f   : > { %6368 = vmatmul.mubr.msk.bf16.gmra.mrb[24].mxu0 %vm701_vm3, %v5728_v43 }
 0x170   : > { %6232 = vmatmul.mubr.msk.bf16.gmra.mrb[24].mxu1 %vm701_vm3, %v5452_v62  ;;  %6371 = vmatprep.mubr.msk.bf16.mxu0 %vm701_vm3, %v5729_v50 }
 0x171   : > { %6235 = vmatprep.mubr.msk.bf16.mxu1 %vm701_vm3, %v5453_v56 }
 0x177   : > { %6372 = vmatmul.mubr.msk.bf16.gmra.mrb[28].mxu0 %vm701_vm3, %v5730_v29 }
 0x178   : > { %6236 = vmatmul.mubr.msk.bf16.gmra.mrb[28].mxu1 %vm701_vm3, %v5454_v14 }
 0x1f3   : > { %v6175_v63 = vpop.f32.mrb[0].mxu1 }
 0x1f4   : > { %v1864_v4 = vpop.f32.mrb[1].mxu1 }
 0x1f5   : > { %v6176_v43 = vpop.f32.mrb[2].mxu1 }
 0x1f6   : > { %v1867_v16 = vpop.f32.mrb[3].mxu1 }
 0x1fb   : > { %v6179_v58 = vpop.f32.mrb[4].mxu1 }
 0x1fc   : > { %v1880_v50 = vpop.f32.mrb[5].mxu1 }
 0x1fd   : > { %v6180_v54 = vpop.f32.mrb[6].mxu1 }
 0x1fe   : > { %v1883_v18 = vpop.f32.mrb[7].mxu1 }
 0x203   : > { %v6183_v11 = vpop.f32.mrb[8].mxu1 }
 0x204   : > { %v1896_v32 = vpop.f32.mrb[9].mxu1 }
 0x205   : > { %v6184_v24 = vpop.f32.mrb[10].mxu1 }
 0x206   : > { %v8706_v19 = vpop.f32.mrb[11].mxu1 }
 0x20b   : > { %v8708_v41 = vpop.f32.mrb[12].mxu1 }
 0x20c   : > { %v8710_v5 = vpop.f32.mrb[13].mxu1 }
 0x20d   : > { %v8712_v55 = vpop.f32.mrb[14].mxu1 }
 0x20e   : > { %v8714_v29 = vpop.f32.mrb[15].mxu1 }
 0x212   : > { %v6345_v52 = vpop.f32.mrb[0].mxu0 }
 0x213   : > { %v6377_v2 = vadd.f32 %v6345_v52, %v6175_v63  ;;  %v4615_v39 = vpop.f32.mrb[1].mxu0 }
 0x214   : > { %v6378_v0 = vadd.f32 %v4615_v39, %v1864_v4  ;;  %v6346_v36 = vpop.f32.mrb[2].mxu0 }
 0x215   : > { %v6379_v10 = vadd.f32 %v6346_v36, %v6176_v43  ;;  %v4618_v59 = vpop.f32.mrb[3].mxu0  ;;  %v4968_v49 = vmul.f32 %v6377_v2, %v6377_v2 }
 0x216   : > { %v6380_v38 = vadd.f32 %v4618_v59, %v1867_v16  ;;  %v4966_v26 = vmul.f32 %v6378_v0, %v6378_v0 }
 0x217   : > { %v5829_v37 = vpack.c.bf16 %v6379_v10, %v6377_v2  ;;  %v4969_v22 = vmul.f32 %v6379_v10, %v6379_v10 }
 0x218   : > { %v5824_v35 = vpack.c.bf16 %v6380_v38, %v6378_v0  ;;  %v4934_v34 = vadd.f32 %v6380_v38, %v6378_v0  ;;  %v4967_v6 = vmul.f32 %v6380_v38, %v6380_v38 }
 0x219   : > { %5901 = vst [vmem:[%s8720_s14 + $0x8] sm:$0xff] %v5829_v37  }
 0x21a   : > { %5825 = vst [vmem:[%s8720_s14] sm:$0xff] %v5824_v35   ;;  %v4935_v23 = vadd.f32 %v6377_v2, %v4934_v34  ;;  %v4998_v25 = vadd.f32 %v4967_v6, %v4966_v26  ;;  %v6349_v1 = vpop.f32.mrb[4].mxu0 }
 0x21b   : > { %v6381_v7 = vadd.f32 %v6349_v1, %v6179_v58  ;;  %v4631_v61 = vpop.f32.mrb[5].mxu0 }
 0x21c   : > { %v4999_v44 = vadd.f32 %v4998_v25, %v4968_v49  ;;  %v6382_v3 = vadd.f32 %v4631_v61, %v1880_v50  ;;  %v4936_v51 = vadd.f32 %v6379_v10, %v4935_v23  ;;  %v6350_v28 = vpop.f32.mrb[6].mxu0 }
 0x21d   : > { %v6383_v45 = vadd.f32 %v6350_v28, %v6180_v54  ;;  %v4634_v27 = vpop.f32.mrb[7].mxu0  ;;  %v4972_v12 = vmul.f32 %v6381_v7, %v6381_v7 }
 0x21e   : > { %v4937_v53 = vadd.f32 %v6382_v3, %v4936_v51  ;;  %v4970_v21 = vmul.f32 %v6382_v3, %v6382_v3  ;;  %v5000_v47 = vadd.f32 %v4999_v44, %v4969_v22  ;;  %v6384_v46 = vadd.f32 %v4634_v27, %v1883_v18 }
 0x21f   : > { %v5839_v15 = vpack.c.bf16 %v6383_v45, %v6381_v7  ;;  %v4973_v56 = vmul.f32 %v6383_v45, %v6383_v45 }
 0x220   : > { %v5001_v60 = vadd.f32 %v5000_v47, %v4970_v21  ;;  %v5834_v20 = vpack.c.bf16 %v6384_v46, %v6382_v3  ;;  %v4938_v42 = vadd.f32 %v6384_v46, %v4937_v53  ;;  %v4971_v33 = vmul.f32 %v6384_v46, %v6384_v46 }
 0x221   : > { %5903 = vst [vmem:[%s8720_s14 + $0x18] sm:$0xff] %v5839_v15  }
 0x222   : > { %5902 = vst [vmem:[%s8720_s14 + $0x10] sm:$0xff] %v5834_v20   ;;  %v4939_v31 = vadd.f32 %v6381_v7, %v4938_v42  ;;  %v5002_v57 = vadd.f32 %v5001_v60, %v4971_v33  ;;  %v6353_v8 = vpop.f32.mrb[8].mxu0 }
 0x223   : > { %v6385_v48 = vadd.f32 %v6353_v8, %v6183_v11  ;;  %v4647_v62 = vpop.f32.mrb[9].mxu0 }
 0x224   : > { %v5003_v40 = vadd.f32 %v5002_v57, %v4972_v12  ;;  %v6386_v13 = vadd.f32 %v4647_v62, %v1896_v32  ;;  %v4940_v17 = vadd.f32 %v6383_v45, %v4939_v31  ;;  %v6354_v30 = vpop.f32.mrb[10].mxu0 }
 0x225   : > { %v6387_v9 = vadd.f32 %v6354_v30, %v6184_v24  ;;  %v4650_v14 = vpop.f32.mrb[11].mxu0  ;;  %v4976_v52 = vmul.f32 %v6385_v48, %v6385_v48 }
 0x226   : > { %v4941_v63 = vadd.f32 %v6386_v13, %v4940_v17  ;;  %v4974_v4 = vmul.f32 %v6386_v13, %v6386_v13  ;;  %v5004_v43 = vadd.f32 %v5003_v40, %v4973_v56  ;;  %v6388_v16 = vadd.f32 %v4650_v14, %v8706_v19 }
 0x227   : > { %v5849_v58 = vpack.c.bf16 %v6387_v9, %v6385_v48  ;;  %v4977_v36 = vmul.f32 %v6387_v9, %v6387_v9 }
 0x228   : > { %v5005_v50 = vadd.f32 %v5004_v43, %v4974_v4  ;;  %v5844_v54 = vpack.c.bf16 %v6388_v16, %v6386_v13  ;;  %v4942_v18 = vadd.f32 %v6388_v16, %v4941_v63  ;;  %v4975_v11 = vmul.f32 %v6388_v16, %v6388_v16 }
 0x229   : > { %5905 = vst [vmem:[%s8720_s14 + $0x28] sm:$0xff] %v5849_v58  }
 0x22a   : > { %5904 = vst [vmem:[%s8720_s14 + $0x20] sm:$0xff] %v5844_v54   ;;  %v4943_v2 = vadd.f32 %v6385_v48, %v4942_v18  ;;  %v5006_v32 = vadd.f32 %v5005_v50, %v4975_v11  ;;  %v6357_v39 = vpop.f32.mrb[12].mxu0 }
 0x22b   : > { %v6389_v0 = vadd.f32 %v6357_v39, %v8708_v41  ;;  %v4663_v24 = vpop.f32.mrb[13].mxu0 }
 0x22c   : > { %v5007_v10 = vadd.f32 %v5006_v32, %v4976_v52  ;;  %v6390_v59 = vadd.f32 %v4663_v24, %v8710_v5  ;;  %v4944_v19 = vadd.f32 %v6387_v9, %v4943_v2  ;;  %v6358_v38 = vpop.f32.mrb[14].mxu0 }
 0x22d   : > { %v6391_v37 = vadd.f32 %v6358_v38, %v8712_v55  ;;  %v4666_v26 = vpop.f32.mrb[15].mxu0  ;;  %v4980_v61 = vmul.f32 %v6389_v0, %v6389_v0 }
 0x22e   : > { %v4945_v35 = vadd.f32 %v6390_v59, %v4944_v19  ;;  %v4978_v34 = vmul.f32 %v6390_v59, %v6390_v59  ;;  %v5008_v6 = vadd.f32 %v5007_v10, %v4977_v36  ;;  %v6392_v49 = vadd.f32 %v4666_v26, %v8714_v29 }
 0x22f   : > { %v5859_v23 = vpack.c.bf16 %v6391_v37, %v6389_v0  ;;  %v4981_v55 = vmul.f32 %v6391_v37, %v6391_v37 }
 0x230   : > { %v5009_v25 = vadd.f32 %v5008_v6, %v4978_v34  ;;  %v5854_v41 = vpack.c.bf16 %v6392_v49, %v6390_v59  ;;  %v4946_v1 = vadd.f32 %v6392_v49, %v4945_v35  ;;  %v4979_v7 = vmul.f32 %v6392_v49, %v6392_v49 }
 0x231   : > { %5907 = vst [vmem:[%s8720_s14 + $0x38] sm:$0xff] %v5859_v23  }
 0x232   : > { %5906 = vst [vmem:[%s8720_s14 + $0x30] sm:$0xff] %v5854_v41   ;;  %v4947_v5 = vadd.f32 %v6389_v0, %v4946_v1  ;;  %v5010_v22 = vadd.f32 %v5009_v25, %v4979_v7  ;;  %v6361_v44 = vpop.f32.mrb[16].mxu0 }
 0x233   : > { %v6225_v3 = vpop.f32.mrb[16].mxu1  ;;  %v4679_v51 = vpop.f32.mrb[17].mxu0 }
 0x234   : > { %v5011_v28 = vadd.f32 %v5010_v22, %v4980_v61  ;;  %v6393_v45 = vadd.f32 %v6361_v44, %v6225_v3  ;;  %v2654_v27 = vpop.f32.mrb[17].mxu1  ;;  %v4948_v53 = vadd.f32 %v6391_v37, %v4947_v5  ;;  %v6362_v29 = vpop.f32.mrb[18].mxu0 }
 0x235   : > { %v6394_v21 = vadd.f32 %v4679_v51, %v2654_v27  ;;  %v6226_v47 = vpop.f32.mrb[18].mxu1  ;;  %v4682_v46 = vpop.f32.mrb[19].mxu0 }
 0x236   : > { %v5012_v15 = vadd.f32 %v5011_v28, %v4981_v55  ;;  %v6395_v60 = vadd.f32 %v6362_v29, %v6226_v47  ;;  %v2657_v20 = vpop.f32.mrb[19].mxu1  ;;  %v4984_v40 = vmul.f32 %v6393_v45, %v6393_v45 }
 0x237   : > { %v4949_v42 = vadd.f32 %v6394_v21, %v4948_v53  ;;  %v4982_v33 = vmul.f32 %v6394_v21, %v6394_v21  ;;  %v6396_v12 = vadd.f32 %v4682_v46, %v2657_v20 }
 0x238   : > { %v5869_v31 = vpack.c.bf16 %v6395_v60, %v6393_v45  ;;  %v4985_v43 = vmul.f32 %v6395_v60, %v6395_v60 }
 0x239   : > { %v5013_v57 = vadd.f32 %v5012_v15, %v4982_v33  ;;  %v5864_v8 = vpack.c.bf16 %v6396_v12, %v6394_v21  ;;  %v4950_v48 = vadd.f32 %v6396_v12, %v4949_v42  ;;  %v4983_v62 = vmul.f32 %v6396_v12, %v6396_v12 }
 0x23a   : > { %5909 = vst [vmem:[%s8720_s14 + $0x48] sm:$0xff] %v5869_v31   ;;  %v6365_v56 = vpop.f32.mrb[20].mxu0 }
 0x23b   : > { %5908 = vst [vmem:[%s8720_s14 + $0x40] sm:$0xff] %v5864_v8   ;;  %v4951_v13 = vadd.f32 %v6393_v45, %v4950_v48  ;;  %v5014_v17 = vadd.f32 %v5013_v57, %v4983_v62  ;;  %v6229_v30 = vpop.f32.mrb[20].mxu1  ;;  %v4695_v9 = vpop.f32.mrb[21].mxu0 }
 0x23c   : > { %v6397_v14 = vadd.f32 %v6365_v56, %v6229_v30  ;;  %v2670_v63 = vpop.f32.mrb[21].mxu1  ;;  %v6366_v4 = vpop.f32.mrb[22].mxu0 }
 0x23d   : > { %v5015_v16 = vadd.f32 %v5014_v17, %v4984_v40  ;;  %v6398_v58 = vadd.f32 %v4695_v9, %v2670_v63  ;;  %v4952_v50 = vadd.f32 %v6395_v60, %v4951_v13  ;;  %v6230_v54 = vpop.f32.mrb[22].mxu1  ;;  %v4698_v18 = vpop.f32.mrb[23].mxu0 }
 0x23e   : > { %v6399_v11 = vadd.f32 %v6366_v4, %v6230_v54  ;;  %v2673_v52 = vpop.f32.mrb[23].mxu1  ;;  %v4988_v37 = vmul.f32 %v6397_v14, %v6397_v14 }
 0x23f   : > { %v4953_v2 = vadd.f32 %v6398_v58, %v4952_v50  ;;  %v4986_v32 = vmul.f32 %v6398_v58, %v6398_v58  ;;  %v5016_v39 = vadd.f32 %v5015_v16, %v4985_v43  ;;  %v6400_v0 = vadd.f32 %v4698_v18, %v2673_v52 }
 0x240   : > { %v5879_v24 = vpack.c.bf16 %v6399_v11, %v6397_v14  ;;  %v4989_v41 = vmul.f32 %v6399_v11, %v6399_v11 }
 0x241   : > { %v5017_v36 = vadd.f32 %v5016_v39, %v4986_v32  ;;  %v5874_v10 = vpack.c.bf16 %v6400_v0, %v6398_v58  ;;  %v4954_v59 = vadd.f32 %v6400_v0, %v4953_v2  ;;  %v4987_v19 = vmul.f32 %v6400_v0, %v6400_v0 }
 0x242   : > { %5911 = vst [vmem:[%s8720_s14 + $0x58] sm:$0xff] %v5879_v24   ;;  %v6369_v38 = vpop.f32.mrb[24].mxu0 }
 0x243   : > { %5910 = vst [vmem:[%s8720_s14 + $0x50] sm:$0xff] %v5874_v10   ;;  %v4955_v26 = vadd.f32 %v6397_v14, %v4954_v59  ;;  %v5018_v35 = vadd.f32 %v5017_v36, %v4987_v19  ;;  %v6233_v34 = vpop.f32.mrb[24].mxu1  ;;  %v4711_v6 = vpop.f32.mrb[25].mxu0 }
 0x244   : > { %v6401_v49 = vadd.f32 %v6369_v38, %v6233_v34  ;;  %v2686_v23 = vpop.f32.mrb[25].mxu1  ;;  %v6370_v25 = vpop.f32.mrb[26].mxu0 }
 0x245   : > { %v5019_v1 = vadd.f32 %v5018_v35, %v4988_v37  ;;  %v6402_v7 = vadd.f32 %v4711_v6, %v2686_v23  ;;  %v4956_v61 = vadd.f32 %v6399_v11, %v4955_v26  ;;  %v6234_v5 = vpop.f32.mrb[26].mxu1  ;;  %v4714_v22 = vpop.f32.mrb[27].mxu0 }
 0x246   : > { %v6403_v44 = vadd.f32 %v6370_v25, %v6234_v5  ;;  %v2689_v3 = vpop.f32.mrb[27].mxu1  ;;  %v4992_v15 = vmul.f32 %v6401_v49, %v6401_v49 }
 0x247   : > { %v4957_v51 = vadd.f32 %v6402_v7, %v4956_v61  ;;  %v4990_v55 = vmul.f32 %v6402_v7, %v6402_v7  ;;  %v5020_v28 = vadd.f32 %v5019_v1, %v4989_v41  ;;  %v6404_v45 = vadd.f32 %v4714_v22, %v2689_v3 }
 0x248   : > { %v5889_v27 = vpack.c.bf16 %v6403_v44, %v6401_v49  ;;  %v4993_v8 = vmul.f32 %v6403_v44, %v6403_v44 }
 0x249   : > { %v5021_v53 = vadd.f32 %v5020_v28, %v4990_v55  ;;  %v5884_v29 = vpack.c.bf16 %v6404_v45, %v6402_v7  ;;  %v4958_v21 = vadd.f32 %v6404_v45, %v4957_v51  ;;  %v4991_v47 = vmul.f32 %v6404_v45, %v6404_v45 }
 0x24a   : > { %5913 = vst [vmem:[%s8720_s14 + $0x68] sm:$0xff] %v5889_v27   ;;  %v6373_v46 = vpop.f32.mrb[28].mxu0 }
 0x24b   : > { %5912 = vst [vmem:[%s8720_s14 + $0x60] sm:$0xff] %v5884_v29   ;;  %v4959_v60 = vadd.f32 %v6401_v49, %v4958_v21  ;;  %v5022_v20 = vadd.f32 %v5021_v53, %v4991_v47  ;;  %v6237_v42 = vpop.f32.mrb[28].mxu1  ;;  %v4727_v33 = vpop.f32.mrb[29].mxu0 }
 0x24c   : > { %v6405_v12 = vadd.f32 %v6373_v46, %v6237_v42  ;;  %v2702_v31 = vpop.f32.mrb[29].mxu1  ;;  %v6374_v57 = vpop.f32.mrb[30].mxu0 }
 0x24d   : > { %v5023_v48 = vadd.f32 %v5022_v20, %v4992_v15  ;;  %v6406_v62 = vadd.f32 %v4727_v33, %v2702_v31  ;;  %v4960_v56 = vadd.f32 %v6403_v44, %v4959_v60  ;;  %v6238_v40 = vpop.f32.mrb[30].mxu1  ;;  %v4730_v13 = vpop.f32.mrb[31].mxu0 }
 0x24e   : > { %v6407_v17 = vadd.f32 %v6374_v57, %v6238_v40  ;;  %v2705_v30 = vpop.f32.mrb[31].mxu1  ;;  %v4996_v18 = vmul.f32 %v6405_v12, %v6405_v12 }
 0x24f   : > { %v4961_v9 = vadd.f32 %v6406_v62, %v4960_v56  ;;  %v4994_v14 = vmul.f32 %v6406_v62, %v6406_v62  ;;  %v5024_v63 = vadd.f32 %v5023_v48, %v4993_v8  ;;  %v6408_v4 = vadd.f32 %v4730_v13, %v2705_v30 }
 0x250   : > { %v5899_v43 = vpack.c.bf16 %v6407_v17, %v6405_v12 }
 0x251   : > { %v5025_v16 = vadd.f32 %v5024_v63, %v4994_v14  ;;  %v5894_v58 = vpack.c.bf16 %v6408_v4, %v6406_v62  ;;  %v4962_v50 = vadd.f32 %v6408_v4, %v4961_v9  ;;  %v4995_v54 = vmul.f32 %v6408_v4, %v6408_v4 }
 0x252   : > { %5915 = vst [vmem:[%s8720_s14 + $0x78] sm:$0xff] %v5899_v43  }
 0x253   : > { %5914 = vst [vmem:[%s8720_s14 + $0x70] sm:$0xff] %v5894_v58   ;;  %v4963_v11 = vadd.f32 %v6405_v12, %v4962_v50  ;;  %v5026_v52 = vadd.f32 %v5025_v16, %v4995_v54 }
 0x254   : > { %6813 = shalt.err (!%p6810_p3)
}
 0x255   : > { %s6814_s14 = scalar_lea.hbm %s8748_s5, 2048  ;;  %s6818_s23 = scalar_lea.hbm %s8882_s2, 4096 }
 0x256   : > { %p6815_p4 = scmp.ne.s32.totalorder %s8748_s5, %s6814_s14  ;;  %p6819_p9 = scmp.lt.u32.totalorder %s8748_s5, %s8882_s2 }
 0x257   : > { %p6820_p10 = scmp.lt.u32.totalorder %s6818_s23, %s6814_s14  ;;  %p6822_p12 = scmp.lt.u32.totalorder %s6814_s14, %s8748_s5 }
 0x258   : > { %p6816_p7 = pnand %p6815_p4, %p6994_p5 }
 0x259   : > { %p6821_p11 = por %p6820_p10, %p6819_p9 }
 0x25a   : > { %p6817_p8 = pneg %p6816_p7 }
 0x25b   : > { %p6823_p13 = por %p6822_p12, %p6821_p11 }
 0x25d   : > { %p6824_p0 = pnand %p6823_p13, %p6817_p8 }
 0x25f   : > { %6827 = shalt.err (!%p6824_p0)
}
 0x260   : > { %s6925_s13 = smov 64   ;;  %s6926_s20 = smov 4   ;;  %v4997_v2 = vmul.f32 %v6407_v17, %v6407_v17  ;;  %v5027_v32 = vadd.f32 %v5026_v52, %v4996_v18  ;;  %v4964_v39 = vadd.f32 %v6407_v17, %v4963_v11 }
 0x261   : > { %6644 = dma.vmem_to_hbm [thread:$0]  (%p6994_p5), %s8750_s27, 2048, %s8748_s5, %s5031_s11, %s6925_s13, %s6925_s13, %s6926_s20  }
 0x262   : > { %s8794_s14 = scalar_lea.hbm %s8883_s3, %s5784_s6  ;;  %4965 = vst [vmem:[%s8756_s7] sm:$0xff] %v4964_v39  ;;  %s8806_s27 = scalar_lea.hbm %s8884_s4, %s5784_s6  ;;  %v5028_v0 = vadd.f32 %v5027_v32, %v4997_v2 }
 0x263   : > { %s8955_s5 = sand.u32 1, %s6975_s19   ;;  %s6828_s23 = scalar_lea.vmem %s8798_s8, 128 }
 0x264   : > { %s8814_s11 = scalar_lea.sflag [#allocation5], %s8955_s5  ;;  %p6829_p1 = scmp.ne.s32.totalorder %s8798_s8, %s6828_s23 }
 0x265   : > { %s6927_s29 = smov [#allocation4]  }
 0x266   : > { %p6830_p2 = pnand %p6829_p1, %p6994_p5  ;;  %s6832_s7 = sshll.u32 %s6927_s29, 4  ;;  %s6833_s7 = int_to_ptr.vmem [resolvable:$false] %s6832_s7 }
 0x267   : > { %s6834_s13 = scalar_lea.vmem %s6833_s7, 256  ;;  %p6835_p4 = scmp.lt.s32.totalorder %s8798_s8, %s6833_s7 }
 0x268   : > { %p6831_p3 = pneg %p6830_p2  ;;  %p6836_p7 = scmp.lt.s32.totalorder %s6834_s13, %s6828_s23 }
 0x26a   : > { %p6837_p8 = por %p6836_p7, %p6835_p4 }
 0x26c   : > { %p6838_p9 = pnand %p6837_p8, %p6831_p3 }
 0x26e   : > { %6841 = shalt.err (!%p6838_p9)
}
 0x26f   : > { %s6842_s19 = scalar_lea.hbm %s8794_s14, 128  ;;  %s6846_s28 = scalar_lea.hbm %s8883_s3, 256 }
 0x270   : > { %p6843_p10 = scmp.ne.s32.totalorder %s8794_s14, %s6842_s19  ;;  %p6847_p13 = scmp.lt.u32.totalorder %s8794_s14, %s8883_s3 }
 0x271   : > { %p6848_p0 = scmp.lt.u32.totalorder %s6846_s28, %s6842_s19  ;;  %p6850_p2 = scmp.lt.u32.totalorder %s6842_s19, %s8794_s14 }
 0x272   : > { %p6844_p11 = pnand %p6843_p10, %p6994_p5 }
 0x273   : > { %p6849_p1 = por %p6848_p0, %p6847_p13 }
 0x274   : > { %p6845_p12 = pneg %p6844_p11 }
 0x275   : > { %p6851_p3 = por %p6850_p2, %p6849_p1 }
 0x277   : > { %p6852_p4 = pnand %p6851_p3, %p6845_p12 }
 0x279   : > { %6855 = shalt.err (!%p6852_p4)
}
 0x27a   : > { %6645 = dma.vmem_to_hbm [thread:$0]  (%p6994_p5), %s8798_s8, 128, %s8794_s14, %s8814_s11   ;;  %5029 = vst [vmem:[%s8762_s9] sm:$0xff] %v5028_v0 }
 0x27b   : > { %s6856_s12 = scalar_lea.vmem %s8810_s10, 128  ;;  %s6928_s5 = smov [#allocation6]  }
 0x27c   : > { %p6857_p7 = scmp.ne.s32.totalorder %s8810_s10, %s6856_s12  ;;  %s6860_s23 = sshll.u32 %s6928_s5, 4  ;;  %s6861_s23 = int_to_ptr.vmem [resolvable:$false] %s6860_s23 }
 0x27d   : > { %s6862_s29 = scalar_lea.vmem %s6861_s23, 256  ;;  %p6863_p10 = scmp.lt.s32.totalorder %s8810_s10, %s6861_s23 }
 0x27e   : > { %p6858_p8 = pnand %p6857_p7, %p6994_p5  ;;  %p6864_p11 = scmp.lt.s32.totalorder %s6862_s29, %s6856_s12 }
 0x280   : > { %p6859_p9 = pneg %p6858_p8  ;;  %p6865_p12 = por %p6864_p11, %p6863_p10 }
 0x282   : > { %p6866_p13 = pnand %p6865_p12, %p6859_p9 }
 0x284   : > { %6869 = shalt.err (!%p6866_p13)
}
 0x285   : > { %s6870_s8 = scalar_lea.hbm %s8806_s27, 128  ;;  %s6874_s7 = scalar_lea.hbm %s8884_s4, 256 }
 0x286   : > { %p6871_p0 = scmp.ne.s32.totalorder %s8806_s27, %s6870_s8  ;;  %p6875_p3 = scmp.lt.u32.totalorder %s8806_s27, %s8884_s4 }
 0x287   : > { %p6876_p4 = scmp.lt.u32.totalorder %s6874_s7, %s6870_s8  ;;  %p6878_p8 = scmp.lt.u32.totalorder %s6870_s8, %s8806_s27 }
 0x288   : > { %p6872_p1 = pnand %p6871_p0, %p6994_p5 }
 0x289   : > { %p6877_p7 = por %p6876_p4, %p6875_p3 }
 0x28a   : > { %p6873_p2 = pneg %p6872_p1 }
 0x28b   : > { %p6879_p9 = por %p6878_p8, %p6877_p7 }
 0x28d   : > { %p6880_p10 = pnand %p6879_p9, %p6873_p2 }
 0x28f   : > { %6883 = shalt.err (!%p6880_p10)
}
 0x290   : > { %6646 = dma.vmem_to_hbm [thread:$0]  (%p6994_p5), %s8810_s10, 128, %s8806_s27, %s8814_s11  }
 0x291 PF: > { %p6660_p11 = scmp.ge.s32.totalorder %s6922_s18, 2  ;;  %s5095_s6 = sand.u32 1, %s6910_s15  }
 0x292   : > { %s5096_s20 = scalar_lea.sflag [#allocation3], %s5095_s6 }
 0x293   : > { %p6651_p12 = pnand %p6660_p11, %p6998_p6 }
 0x295   : > { %6901 = dma.done.wait (!%p6651_p12), %s5096_s20, 2048  }
 0x296   : > { %6903 = vsyncadd (!%p6651_p12), %s5096_s20, 4294965248  ;;  %s8956_s28 = sadd.s32 4294967294, %s6922_s18  }
 0x297   : > { %s5104_s30 = sand.u32 1, %s8956_s28  }
 0x298   : > { %s5105_s22 = scalar_lea.sflag [#allocation5], %s5104_s30 }
 0x299   : > { %6905 = dma.done.wait (!%p6651_p12), %s5105_s22, 256  }
 0x29a   : > { %6907 = vsyncadd (!%p6651_p12), %s5105_s22, 4294967040  ;;  %p18_p5 = scmp.ge.s32.totalorder %s6979_s21, 4   ;;  %s8957_s15 = smov %s6914_s16 }
 0x29b   : > { %s8958_s16 = smov %s6918_s17  ;;  %s8959_s17 = smov %s6992_s24 }
 0x29c   : > { %s8960_s18 = smov %s6979_s21  ;;  %20 = sbr.rel (!%p18_p5) target bundleno = 5 (0x5), region = 105 }
 0x2a3   :  { %5119 = vsyncpa [#allocation3], 1 }
 0x2a4   :  { %5121 = vsyncpa [#allocation3 + $0x1], 1 }
 0x2a5   :  { %5122 = vsyncpa [#allocation5], 1 }
 0x2a6   :  { %5124 = vsyncpa [#allocation5 + $0x1], 1 }

</bundles_post_ra>
